<compile_context>
chip_gen: v7x
topology: tpu7x:2x2x1
jax: 0.10.0
libtpu: 0.0.40
codegen_flags: <defaults>
</compile_context>

<pallas_src>
from functools import partial

import jax
import jax.numpy as jnp
from jax.experimental import pallas as pl
from jax.experimental.pallas import tpu as pltpu


def ngram_generator_kernel(x_ref, n_ref,
                           w1x_ref, w1n_ref, b1_ref,
                           w2_ref, b2_ref,
                           w3_ref, b3_ref,
                           w4_ref, b4_ref,
                           out_ref):
    """Whole MLP forward for one batch tile (all weights resident in VMEM)."""

    def linear(h_f32, w_ref, b_ref):
        # bf16 MXU operands (no-op if already bf16), f32 accumulation; the
        # bias add and activations stay in f32 (v5e VPU/EUP have no bf16).
        return jnp.dot(h_f32.astype(jnp.bfloat16), w_ref[...],
                       preferred_element_type=jnp.float32) + b_ref[...]

    def leaky_relu(h):
        # F.leaky_relu default negative_slope = 0.01
        return jnp.where(h >= 0, h, 0.01 * h)

    # Layer 1: the x/noise concat is fused as two partial matmuls
    # x @ W1[:d_x] + noise @ W1[d_x:].
    h = (jnp.dot(x_ref[...].astype(jnp.bfloat16), w1x_ref[...],
                 preferred_element_type=jnp.float32)
         + jnp.dot(n_ref[...].astype(jnp.bfloat16), w1n_ref[...],
                   preferred_element_type=jnp.float32)
         + b1_ref[...])
    h = leaky_relu(h)
    h = leaky_relu(linear(h, w2_ref, b2_ref))
    h = leaky_relu(linear(h, w3_ref, b3_ref))
    h = linear(h, w4_ref, b4_ref)
    # sigmoid(h) == 0.5 * tanh(0.5 * h) + 0.5: one EUP push, saturates cleanly.
    out_ref[...] = (0.5 * jnp.tanh(0.5 * h) + 0.5).astype(out_ref.dtype)


def ngram_generator_forward(x, noise, params, *, block_b=256,
                            out_dtype=jnp.float32):
    """Pallas wrapper. x: (B, input_layers), noise: (B, noise_dims)."""
    w1, b1, w2, b2, w3, b3, w4, b4 = params  # f32, W stored as (in, out)
    B, d_x = x.shape
    _, d_n = noise.shape
    d_l2, d_l3, d_l4 = w2.shape[0], w3.shape[0], w4.shape[0]
    d_out = w4.shape[1]

    # Batch tile: 256-512 fills the 256-deep MXUs of v6e/v7x and amortizes the
    # ~0.35 us per-grid-step overhead; 128-256 already saturates v5e's 128-wide
    # MXU.  Callers on v7x should keep the resulting grid length even (>=2) so
    # the "parallel" axis shards across both TensorCores.
    block_b = min(block_b, B)
    assert B % block_b == 0, "batch must be a multiple of the batch tile"

    # Split layer-1 weight so the concat happens as two partial matmuls.
    # TODO(synk): noise could instead be generated in-kernel with
    # pltpu.prng_seed/prng_random_bits (drops the noise HBM read entirely),
    # but that changes the RNG stream vs jax.random.uniform/torch.rand, so it
    # is kept as an explicit input to stay comparable to the reference.
    w1x, w1n = w1[:d_x], w1[d_x:]

    # Pre-cast weights to bf16 for the MXU; biases stay f32.
    bf16 = lambda w: w.astype(jnp.bfloat16)
    weights = (bf16(w1x), bf16(w1n), b1,
               bf16(w2), b2,
               bf16(w3), b3,
               bf16(w4), b4)

    def full(a):
        # Weights / biases are small and grid-invariant: single full block,
        # constant index_map (re-used across every batch tile).
        # TODO(synk): pipeline_mode=pl.Buffered(1) would drop the pointless
        # double-buffer for these invariant blocks (~1 MiB VMEM); left at the
        # default for maximally portable lowering — VMEM use is <5 MiB anyway.
        return pl.BlockSpec(a.shape, lambda i: (0, 0))

    # Advisory cost hint: at modest B this kernel is launch/latency-bound and
    # the estimate lets XLA overlap it with surrounding ops.
    flops = 2 * B * ((d_x + d_n) * d_l2 + d_l2 * d_l3 + d_l3 * d_l4
                     + d_l4 * d_out)
    bytes_accessed = (x.size * x.dtype.itemsize
                      + noise.size * noise.dtype.itemsize
                      + sum(int(w.size) * w.dtype.itemsize for w in weights)
                      + B * d_out * jnp.dtype(out_dtype).itemsize)
    cost = pl.CostEstimate(flops=int(flops),
                           transcendentals=int(B * d_out),
                           bytes_accessed=int(bytes_accessed))

    return pl.pallas_call(
        ngram_generator_kernel,
        out_shape=jax.ShapeDtypeStruct((B, d_out), out_dtype),
        grid=(B // block_b,),
        in_specs=[
            pl.BlockSpec((block_b, d_x), lambda i: (i, 0)),
            pl.BlockSpec((block_b, d_n), lambda i: (i, 0)),
            *[full(w) for w in weights],
        ],
        out_specs=pl.BlockSpec((block_b, d_out), lambda i: (i, 0)),
        compiler_params=pltpu.CompilerParams(
            dimension_semantics=("parallel",),
            vmem_limit_bytes=32 << 20,
        ),
        cost_estimate=cost,
    )(x, noise, *weights)


def init_linear(key, in_features, out_features):
    """Deterministic nn.Linear-style init; returns W as (in, out) and b as (1, out)."""
    kw, kb = jax.random.split(key)
    bound = 1.0 / jnp.sqrt(float(in_features))
    # PyTorch stores W as (out, in); generate that way then transpose for x @ W.
    w = jax.random.uniform(kw, (out_features, in_features), jnp.float32, -bound, bound)
    b = jax.random.uniform(kb, (out_features,), jnp.float32, -bound, bound)
    return w.T, b.reshape(1, out_features)


def reference_forward(x, noise, params, *, mxu_dtype=jnp.float32):
    """Pure-JAX reference. mxu_dtype=bfloat16 mimics the kernel's MXU casts."""
    w1, b1, w2, b2, w3, b3, w4, b4 = params
    lrelu = lambda h: jnp.where(h >= 0, h, 0.01 * h)

    def lin(h, w, b):
        return jnp.dot(h.astype(mxu_dtype), w.astype(mxu_dtype),
                       preferred_element_type=jnp.float32) + b

    h = jnp.concatenate([x, noise], axis=1)
    h = lrelu(lin(h, w1, b1))
    h = lrelu(lin(h, w2, b2))
    h = lrelu(lin(h, w3, b3))
    return jax.nn.sigmoid(lin(h, w4, b4))


if __name__ == "__main__":
    # TPU-friendly instantiation of the module's constructor arguments
    # (all widths multiples of 128/256 so matmuls and stores are lane-dense).
    noise_dims = 128
    input_layers = 256          # feature count of x; also the output width
    l2, l3, l4 = 256, 512, 256
    concat_dim = input_layers + noise_dims   # 384
    batch = 512                 # 2 grid steps of 256 rows: M=256 fills the
                                # v6e/v7x MXU and both v7x TCs stay busy.

    root = jax.random.PRNGKey(0)
    kx, knoise, k1, k2, k3, k4 = jax.random.split(root, 6)

    # Example input (ngram count features) and the uniform noise (torch.rand).
    x = jax.random.uniform(kx, (batch, input_layers), jnp.float32)
    noise = jax.random.uniform(knoise, (batch, noise_dims), jnp.float32)

    params = (
        *init_linear(k1, concat_dim, l2),       # self.input
        *init_linear(k2, l2, l3),               # self.fc1
        *init_linear(k3, l3, l4),               # self.fc3
        *init_linear(k4, l4, input_layers),     # self.output
    )

    y = ngram_generator_forward(x, noise, params, block_b=256)
    y = jax.block_until_ready(y)
    assert y.shape == (batch, input_layers)

    # Tight check against a bf16-matmul reference (same MXU numerics) ...
    y_bf16_ref = reference_forward(x, noise, params, mxu_dtype=jnp.bfloat16)
    assert jnp.allclose(y, y_bf16_ref, atol=1e-2, rtol=1e-2)
    # ... and a looser check against the full-f32 module semantics.
    y_f32_ref = reference_forward(x, noise, params, mxu_dtype=jnp.float32)
    assert jnp.allclose(y, y_f32_ref, atol=3e-2, rtol=3e-2)

    print("KERNEL_OK")
</pallas_src>

<mosaic_0001>
module attributes {stable_mosaic.version = 11 : i64} {
  func.func @ngram_generator_kernel(%arg0: i32, %arg1: memref<256x256xf32, #tpu.memory_space<vmem>>, %arg2: memref<256x128xf32, #tpu.memory_space<vmem>>, %arg3: memref<256x256xbf16, #tpu.memory_space<vmem>>, %arg4: memref<128x256xbf16, #tpu.memory_space<vmem>>, %arg5: memref<1x256xf32, #tpu.memory_space<vmem>>, %arg6: memref<256x512xbf16, #tpu.memory_space<vmem>>, %arg7: memref<1x512xf32, #tpu.memory_space<vmem>>, %arg8: memref<512x256xbf16, #tpu.memory_space<vmem>>, %arg9: memref<1x256xf32, #tpu.memory_space<vmem>>, %arg10: memref<256x256xbf16, #tpu.memory_space<vmem>>, %arg11: memref<1x256xf32, #tpu.memory_space<vmem>>, %arg12: memref<256x256xf32, #tpu.memory_space<vmem>>) attributes {dimension_semantics = [#tpu.dimension_semantics<parallel>], iteration_bounds = array<i64: 2>, scalar_prefetch = 0 : i64, scratch_operands = 0 : i64, tpu.core_type = #tpu.core_type<tc>, window_params = [{transform_indices = @transform_0, window_bounds = array<i64: 256, 256>}, {transform_indices = @transform_1, window_bounds = array<i64: 256, 128>}, {pipeline_mode = #tpu.pipeline_mode<synchronous>, transform_indices = @transform_2, window_bounds = array<i64: 256, 256>}, {pipeline_mode = #tpu.pipeline_mode<synchronous>, transform_indices = @transform_3, window_bounds = array<i64: 128, 256>}, {pipeline_mode = #tpu.pipeline_mode<synchronous>, transform_indices = @transform_4, window_bounds = array<i64: 1, 256>}, {pipeline_mode = #tpu.pipeline_mode<synchronous>, transform_indices = @transform_5, window_bounds = array<i64: 256, 512>}, {pipeline_mode = #tpu.pipeline_mode<synchronous>, transform_indices = @transform_6, window_bounds = array<i64: 1, 512>}, {pipeline_mode = #tpu.pipeline_mode<synchronous>, transform_indices = @transform_7, window_bounds = array<i64: 512, 256>}, {pipeline_mode = #tpu.pipeline_mode<synchronous>, transform_indices = @transform_8, window_bounds = array<i64: 1, 256>}, {pipeline_mode = #tpu.pipeline_mode<synchronous>, transform_indices = @transform_9, window_bounds = array<i64: 256, 256>}, {pipeline_mode = #tpu.pipeline_mode<synchronous>, transform_indices = @transform_10, window_bounds = array<i64: 1, 256>}, {transform_indices = @transform_11, window_bounds = array<i64: 256, 256>}]} {
    %c0 = arith.constant 0 : index
    %c0_0 = arith.constant 0 : index
    %0 = vector.load %arg1[%c0, %c0_0] : memref<256x256xf32, #tpu.memory_space<vmem>>, vector<256x256xf32>
    %1 = arith.truncf %0 : vector<256x256xf32> to vector<256x256xbf16>
    %c0_1 = arith.constant 0 : index
    %c0_2 = arith.constant 0 : index
    %2 = vector.load %arg3[%c0_1, %c0_2] : memref<256x256xbf16, #tpu.memory_space<vmem>>, vector<256x256xbf16>
    %cst = arith.constant dense<0.000000e+00> : vector<256x256xf32>
    %3 = tpu.matmul %1, %2, %cst {dimension_numbers = #tpu.dot_dimension_numbers<[1], [0], [0], [1], [0, 0, 1, 1], [], []>} : vector<256x256xbf16>, vector<256x256xbf16>, vector<256x256xf32> -> vector<256x256xf32>
    %c0_3 = arith.constant 0 : index
    %c0_4 = arith.constant 0 : index
    %4 = vector.load %arg2[%c0_3, %c0_4] : memref<256x128xf32, #tpu.memory_space<vmem>>, vector<256x128xf32>
    %5 = arith.truncf %4 : vector<256x128xf32> to vector<256x128xbf16>
    %c0_5 = arith.constant 0 : index
    %c0_6 = arith.constant 0 : index
    %6 = vector.load %arg4[%c0_5, %c0_6] : memref<128x256xbf16, #tpu.memory_space<vmem>>, vector<128x256xbf16>
    %cst_7 = arith.constant dense<0.000000e+00> : vector<256x256xf32>
    %7 = tpu.matmul %5, %6, %cst_7 {dimension_numbers = #tpu.dot_dimension_numbers<[1], [0], [0], [1], [0, 0, 1, 1], [], []>} : vector<256x128xbf16>, vector<128x256xbf16>, vector<256x256xf32> -> vector<256x256xf32>
    %8 = arith.addf %3, %7 : vector<256x256xf32>
    %c0_8 = arith.constant 0 : index
    %c0_9 = arith.constant 0 : index
    %9 = vector.load %arg5[%c0_8, %c0_9] : memref<1x256xf32, #tpu.memory_space<vmem>>, vector<1x256xf32>
    %10 = vector.broadcast %9 : vector<1x256xf32> to vector<256x256xf32>
    %11 = arith.addf %8, %10 : vector<256x256xf32>
    %cst_10 = arith.constant 0.000000e+00 : f32
    %12 = vector.broadcast %cst_10 : f32 to vector<256x256xf32>
    %13 = arith.cmpf oge, %11, %12 : vector<256x256xf32>
    %cst_11 = arith.constant 0.00999999977 : f32
    %14 = vector.broadcast %cst_11 : f32 to vector<256x256xf32>
    %15 = arith.mulf %14, %11 : vector<256x256xf32>
    %16 = arith.select %13, %11, %15 : vector<256x256xi1>, vector<256x256xf32>
    %17 = arith.truncf %16 : vector<256x256xf32> to vector<256x256xbf16>
    %c0_12 = arith.constant 0 : index
    %c0_13 = arith.constant 0 : index
    %18 = vector.load %arg6[%c0_12, %c0_13] : memref<256x512xbf16, #tpu.memory_space<vmem>>, vector<256x512xbf16>
    %cst_14 = arith.constant dense<0.000000e+00> : vector<256x512xf32>
    %19 = tpu.matmul %17, %18, %cst_14 {dimension_numbers = #tpu.dot_dimension_numbers<[1], [0], [0], [1], [0, 0, 1, 1], [], []>} : vector<256x256xbf16>, vector<256x512xbf16>, vector<256x512xf32> -> vector<256x512xf32>
    %c0_15 = arith.constant 0 : index
    %c0_16 = arith.constant 0 : index
    %20 = vector.load %arg7[%c0_15, %c0_16] : memref<1x512xf32, #tpu.memory_space<vmem>>, vector<1x512xf32>
    %21 = vector.broadcast %20 : vector<1x512xf32> to vector<256x512xf32>
    %22 = arith.addf %19, %21 : vector<256x512xf32>
    %cst_17 = arith.constant 0.000000e+00 : f32
    %23 = vector.broadcast %cst_17 : f32 to vector<256x512xf32>
    %24 = arith.cmpf oge, %22, %23 : vector<256x512xf32>
    %cst_18 = arith.constant 0.00999999977 : f32
    %25 = vector.broadcast %cst_18 : f32 to vector<256x512xf32>
    %26 = arith.mulf %25, %22 : vector<256x512xf32>
    %27 = arith.select %24, %22, %26 : vector<256x512xi1>, vector<256x512xf32>
    %28 = arith.truncf %27 : vector<256x512xf32> to vector<256x512xbf16>
    %c0_19 = arith.constant 0 : index
    %c0_20 = arith.constant 0 : index
    %29 = vector.load %arg8[%c0_19, %c0_20] : memref<512x256xbf16, #tpu.memory_space<vmem>>, vector<512x256xbf16>
    %cst_21 = arith.constant dense<0.000000e+00> : vector<256x256xf32>
    %30 = tpu.matmul %28, %29, %cst_21 {dimension_numbers = #tpu.dot_dimension_numbers<[1], [0], [0], [1], [0, 0, 1, 1], [], []>} : vector<256x512xbf16>, vector<512x256xbf16>, vector<256x256xf32> -> vector<256x256xf32>
    %c0_22 = arith.constant 0 : index
    %c0_23 = arith.constant 0 : index
    %31 = vector.load %arg9[%c0_22, %c0_23] : memref<1x256xf32, #tpu.memory_space<vmem>>, vector<1x256xf32>
    %32 = vector.broadcast %31 : vector<1x256xf32> to vector<256x256xf32>
    %33 = arith.addf %30, %32 : vector<256x256xf32>
    %cst_24 = arith.constant 0.000000e+00 : f32
    %34 = vector.broadcast %cst_24 : f32 to vector<256x256xf32>
    %35 = arith.cmpf oge, %33, %34 : vector<256x256xf32>
    %cst_25 = arith.constant 0.00999999977 : f32
    %36 = vector.broadcast %cst_25 : f32 to vector<256x256xf32>
    %37 = arith.mulf %36, %33 : vector<256x256xf32>
    %38 = arith.select %35, %33, %37 : vector<256x256xi1>, vector<256x256xf32>
    %39 = arith.truncf %38 : vector<256x256xf32> to vector<256x256xbf16>
    %c0_26 = arith.constant 0 : index
    %c0_27 = arith.constant 0 : index
    %40 = vector.load %arg10[%c0_26, %c0_27] : memref<256x256xbf16, #tpu.memory_space<vmem>>, vector<256x256xbf16>
    %cst_28 = arith.constant dense<0.000000e+00> : vector<256x256xf32>
    %41 = tpu.matmul %39, %40, %cst_28 {dimension_numbers = #tpu.dot_dimension_numbers<[1], [0], [0], [1], [0, 0, 1, 1], [], []>} : vector<256x256xbf16>, vector<256x256xbf16>, vector<256x256xf32> -> vector<256x256xf32>
    %c0_29 = arith.constant 0 : index
    %c0_30 = arith.constant 0 : index
    %42 = vector.load %arg11[%c0_29, %c0_30] : memref<1x256xf32, #tpu.memory_space<vmem>>, vector<1x256xf32>
    %43 = vector.broadcast %42 : vector<1x256xf32> to vector<256x256xf32>
    %44 = arith.addf %41, %43 : vector<256x256xf32>
    %cst_31 = arith.constant 5.000000e-01 : f32
    %45 = vector.broadcast %cst_31 : f32 to vector<256x256xf32>
    %46 = arith.mulf %45, %44 : vector<256x256xf32>
    %47 = math.tanh %46 : vector<256x256xf32>
    %cst_32 = arith.constant 5.000000e-01 : f32
    %48 = vector.broadcast %cst_32 : f32 to vector<256x256xf32>
    %49 = arith.mulf %48, %47 : vector<256x256xf32>
    %cst_33 = arith.constant 5.000000e-01 : f32
    %50 = vector.broadcast %cst_33 : f32 to vector<256x256xf32>
    %51 = arith.addf %49, %50 : vector<256x256xf32>
    %c0_34 = arith.constant 0 : index
    %c0_35 = arith.constant 0 : index
    %52 = vector.load %arg12[%c0_34, %c0_35] : memref<256x256xf32, #tpu.memory_space<vmem>>, vector<256x256xf32>
    tpu.vector_store %arg12[%c0_34, %c0_35], %51 {strides = array<i32>} : memref<256x256xf32, #tpu.memory_space<vmem>>, vector<256x256xf32>,
    return
  }
  func.func @transform_0(%arg0: i32) -> (i32, i32) {
    %c0_i32 = arith.constant 0 : i32
    %c0_i32_0 = arith.constant 0 : i32
    return %arg0, %c0_i32 : i32, i32
  }
  func.func @transform_1(%arg0: i32) -> (i32, i32) {
    %c0_i32 = arith.constant 0 : i32
    %c0_i32_0 = arith.constant 0 : i32
    return %arg0, %c0_i32 : i32, i32
  }
  func.func @transform_2(%arg0: i32) -> (i32, i32) {
    %c0_i32 = arith.constant 0 : i32
    %c0_i32_0 = arith.constant 0 : i32
    %c0_i32_1 = arith.constant 0 : i32
    return %c0_i32, %c0_i32_0 : i32, i32
  }
  func.func @transform_3(%arg0: i32) -> (i32, i32) {
    %c0_i32 = arith.constant 0 : i32
    %c0_i32_0 = arith.constant 0 : i32
    %c0_i32_1 = arith.constant 0 : i32
    return %c0_i32, %c0_i32_0 : i32, i32
  }
  func.func @transform_4(%arg0: i32) -> (i32, i32) {
    %c0_i32 = arith.constant 0 : i32
    %c0_i32_0 = arith.constant 0 : i32
    %c0_i32_1 = arith.constant 0 : i32
    return %c0_i32, %c0_i32_0 : i32, i32
  }
  func.func @transform_5(%arg0: i32) -> (i32, i32) {
    %c0_i32 = arith.constant 0 : i32
    %c0_i32_0 = arith.constant 0 : i32
    %c0_i32_1 = arith.constant 0 : i32
    return %c0_i32, %c0_i32_0 : i32, i32
  }
  func.func @transform_6(%arg0: i32) -> (i32, i32) {
    %c0_i32 = arith.constant 0 : i32
    %c0_i32_0 = arith.constant 0 : i32
    %c0_i32_1 = arith.constant 0 : i32
    return %c0_i32, %c0_i32_0 : i32, i32
  }
  func.func @transform_7(%arg0: i32) -> (i32, i32) {
    %c0_i32 = arith.constant 0 : i32
    %c0_i32_0 = arith.constant 0 : i32
    %c0_i32_1 = arith.constant 0 : i32
    return %c0_i32, %c0_i32_0 : i32, i32
  }
  func.func @transform_8(%arg0: i32) -> (i32, i32) {
    %c0_i32 = arith.constant 0 : i32
    %c0_i32_0 = arith.constant 0 : i32
    %c0_i32_1 = arith.constant 0 : i32
    return %c0_i32, %c0_i32_0 : i32, i32
  }
  func.func @transform_9(%arg0: i32) -> (i32, i32) {
    %c0_i32 = arith.constant 0 : i32
    %c0_i32_0 = arith.constant 0 : i32
    %c0_i32_1 = arith.constant 0 : i32
    return %c0_i32, %c0_i32_0 : i32, i32
  }
  func.func @transform_10(%arg0: i32) -> (i32, i32) {
    %c0_i32 = arith.constant 0 : i32
    %c0_i32_0 = arith.constant 0 : i32
    %c0_i32_1 = arith.constant 0 : i32
    return %c0_i32, %c0_i32_0 : i32, i32
  }
  func.func @transform_11(%arg0: i32) -> (i32, i32) {
    %c0_i32 = arith.constant 0 : i32
    %c0_i32_0 = arith.constant 0 : i32
    return %arg0, %c0_i32 : i32, i32
  }
}

</mosaic_0001>

<bundles_post_ra>
// kernel: tpu_custom_call.1
= control target key start
LH: loop header
LB: loop body
LE: loop exit
PB: predicated region body
PF: predicated region fallthrough
CT: control target
= control target key end

     0   :  { %s7277_s0 = inlined_call_operand.hbm [shape: f32[512,256], index: 0, kind: input, shape index: {}]   ;;  %s7278_s1 = inlined_call_operand.hbm [shape: f32[512,128], index: 1, kind: input, shape index: {}]   ;;  %s7279_s2 = inlined_call_operand.hbm [shape: bf16[256,256], index: 2, kind: input, shape index: {}]   ;;  %s7280_s3 = inlined_call_operand.hbm [shape: bf16[128,256], index: 3, kind: input, shape index: {}]   ;;  %s7281_s4 = inlined_call_operand.vmem [shape: f32[1,256], index: 4, kind: input, shape index: {}]   ;;  %s7282_s5 = inlined_call_operand.hbm [shape: bf16[256,512], index: 5, kind: input, shape index: {}]   ;;  %s7283_s6 = inlined_call_operand.vmem [shape: f32[1,512], index: 6, kind: input, shape index: {}]   ;;  %s7284_s7 = inlined_call_operand.hbm [shape: bf16[512,256], index: 7, kind: input, shape index: {}]   ;;  %s7285_s8 = inlined_call_operand.vmem [shape: f32[1,256], index: 8, kind: input, shape index: {}]   ;;  %s7286_s9 = inlined_call_operand.hbm [shape: bf16[256,256], index: 9, kind: input, shape index: {}]   ;;  %s7287_s10 = inlined_call_operand.vmem [shape: f32[1,256], index: 10, kind: input, shape index: {}]   ;;  %s7288_s11 = inlined_call_operand.hbm [shape: f32[512,256], index: 11, kind: output, shape index: {}]  }
   0x1   :  { %7314 = sst [smem:[#allocation34_spill]] %s7277_s0 }
   0x2   :  { %7315 = sst [smem:[#allocation35_spill]] %s7279_s2 }
   0x3   :  { %7316 = sst [smem:[#allocation36_spill]] %s7280_s3 }
   0x4   :  { %7317 = sst [smem:[#allocation37_spill]] %s7282_s5 }
   0x5   :  { %7318 = sst [smem:[#allocation38_spill]] %s7284_s7 }
   0x6   :  { %7319 = sst [smem:[#allocation39_spill]] %s7285_s8 }
   0x7   :  { %7320 = sst [smem:[#allocation40_spill]] %s7286_s9 }
   0x8   :  { %7321 = sst [smem:[#allocation41_spill]] %s7287_s10 }
   0x9   :  { %7322 = sst [smem:[#allocation42_spill]] %s7288_s11 }
   0xa   :  { %16 = vsyncpa [#allocation3], 0 }
   0xb   :  { %18 = vsyncpa [#allocation3 + $0x1], 0 }
   0xc   :  { %19 = vsyncpa [#allocation6], 0 }
   0xd   :  { %21 = vsyncpa [#allocation6 + $0x1], 0 }
   0xe   :  { %22 = vsyncpa [#allocation9], 0 }
   0xf   :  { %23 = vsyncpa [#allocation12], 0 }
  0x10   :  { %24 = vsyncpa [#allocation4], 0 }
  0x11   :  { %26 = vsyncpa [#allocation4 + $0x1], 0  ;;  %s6120_s17 = smov 0   ;;  %s6122_s18 = smov 0  }
  0x12   :  { %s6124_s19 = smov 0   ;;  %s6126_s20 = smov 0  }
  0x13 LB: > { %7323 = sst [smem:[#allocation21_spill]] %s6039_s19  ;;  %s6045_s21 = smov [#allocation7]   ;;  %s6043_s20 = sphi %s6126_s20, %s7383_s20   ;;  %s6039_s19 = sphi %s6124_s19, %s7380_s19   ;;  %s6035_s18 = sphi %s6122_s18, %s7382_s18   ;;  %s6031_s17 = sphi %s6120_s17, %s7381_s17  }
  0x14   : > { %s316_s22 = sshll.u32 %s6045_s21, 4  ;;  %s6141_s23 = sadd.s32 4294967295, %s6043_s20   ;;  %s6146_s22 = int_to_ptr.vmem [resolvable:$true] %s316_s22 }
  0x15   : > { %p4762_p0 = scmp.ge.s32.totalorder %s6043_s20, 1  ;;  %p7290_p1 = scmp.eq.s32.totalorder %s6141_s23, 0 }
  0x16   : > { %p304_p2 = scmp.lt.s32.totalorder %s6043_s20, 3  ;;  %s6046_s25 = smov [#allocation8]  }
  0x17   : > { %s329_s26 = sshll.u32 %s6046_s25, 4  ;;  %s6047_s28 = smov [#allocation11]   ;;  %s6161_s26 = int_to_ptr.vmem [resolvable:$true] %s329_s26 }
  0x18   : > { %p6148_p3 = pnand %p4762_p0, %p304_p2  ;;  %s361_s29 = sshll.u32 %s6047_s28, 4  ;;  %s6163_s29 = int_to_ptr.vmem [resolvable:$true] %s361_s29 }
  0x19   : > { %s7326_s2 = sld [smem:[#allocation35_spill]] }
  0x1a   : > { %s7324_s24 = scalar_select %p6148_p3, 1, 0 }
  0x1b   : > { %p5238_p5 = pneg %p6148_p3 }
  0x1d   : > { %p6157_p6 = pnand %p5238_p5, %p7290_p1 }
  0x1f   : > { %s5761_s13 = scalar_lea.hbm %s7326_s2, 4096  ;;  %p6173_p8 = pneg %p6157_p6 }
  0x20   : > { %p5762_p7 = scmp.ne.s32.totalorder %s7326_s2, %s5761_s13  ;;  %p5768_p11 = scmp.lt.u32.totalorder %s5761_s13, %s7326_s2 }
  0x22   : > { %p5764_p9 = pnand %p6173_p8, %p5762_p7 }
  0x24   : > { %p5765_p10 = pneg %p5764_p9 }
  0x26   : > { %p5770_p12 = pnand %p5768_p11, %p5765_p10 }
  0x28   : > { %5773 = shalt.err (!%p5770_p12)
}
  0x29   : > { %s5774_s28 = scalar_lea.vmem %s6146_s22, 4096  ;;  %p5782_p5 = scmp.lt.s32.totalorder %s6146_s22, %s6146_s22 }
  0x2a   : > { %p5775_p13 = scmp.ne.s32.totalorder %s6146_s22, %s5774_s28  ;;  %p5783_p4 = scmp.lt.s32.totalorder %s5774_s28, %s5774_s28 }
  0x2c   : > { %p5777_p0 = pnand %p5775_p13, %p6173_p8  ;;  %p5784_p7 = por %p5783_p4, %p5782_p5 }
  0x2e   : > { %p5778_p2 = pneg %p5777_p0 }
  0x30   : > { %p5785_p9 = pnand %p5784_p7, %p5778_p2 }
  0x32   : > { %5788 = shalt.err (!%p5785_p9)
}
  0x33   : > { %s7292_s30 = smov 128   ;;  %s7294_s12 = smov 8  }
  0x34   : > { %5241 = dma.hbm_to_vmem [thread:$0]  (!%p6157_p6), %s7326_s2, 4096, %s6146_s22, [#allocation6], %s7292_s30, %s7292_s30, %s7294_s12  }
  0x35   : > { %s7328_s3 = sld [smem:[#allocation36_spill]] }
  0x3b   : > { %s5789_s25 = scalar_lea.hbm %s7328_s3, 2048 }
  0x3c   : > { %p5790_p4 = scmp.ne.s32.totalorder %s7328_s3, %s5789_s25  ;;  %p5796_p12 = scmp.lt.u32.totalorder %s5789_s25, %s7328_s3 }
  0x3e   : > { %p5792_p10 = pnand %p5790_p4, %p6173_p8 }
  0x40   : > { %p5793_p11 = pneg %p5792_p10 }
  0x42   : > { %p5798_p13 = pnand %p5796_p12, %p5793_p11 }
  0x44   : > { %5801 = shalt.err (!%p5798_p13)
}
  0x45   : > { %s5802_s22 = scalar_lea.vmem %s6161_s26, 2048  ;;  %p5810_p7 = scmp.lt.s32.totalorder %s6161_s26, %s6161_s26 }
  0x46   : > { %p5803_p0 = scmp.ne.s32.totalorder %s6161_s26, %s5802_s22  ;;  %p5811_p9 = scmp.lt.s32.totalorder %s5802_s22, %s5802_s22 }
  0x48   : > { %p5805_p2 = pnand %p5803_p0, %p6173_p8  ;;  %p5812_p4 = por %p5811_p9, %p5810_p7 }
  0x4a   : > { %p5806_p5 = pneg %p5805_p2 }
  0x4c   : > { %p5813_p10 = pnand %p5812_p4, %p5806_p5 }
  0x4e   : > { %5816 = shalt.err (!%p5813_p10)
}
  0x4f   : > { %5244 = dma.hbm_to_vmem [thread:$0]  (!%p6157_p6), %s7328_s3, 2048, %s6161_s26, [#allocation9], %s7292_s30, %s7292_s30, %s7294_s12  }
  0x50   : > { %s7329_s7 = sld [smem:[#allocation38_spill]] }
  0x56   : > { %s5817_s14 = scalar_lea.hbm %s7329_s7, 8192 }
  0x57   : > { %p5818_p11 = scmp.ne.s32.totalorder %s7329_s7, %s5817_s14  ;;  %p5824_p0 = scmp.lt.u32.totalorder %s5817_s14, %s7329_s7 }
  0x59   : > { %p5820_p12 = pnand %p5818_p11, %p6173_p8 }
  0x5b   : > { %p5821_p13 = pneg %p5820_p12 }
  0x5d   : > { %p5826_p2 = pnand %p5824_p0, %p5821_p13 }
  0x5f   : > { %5829 = shalt.err (!%p5826_p2)
}
  0x60   : > { %s5830_s26 = scalar_lea.vmem %s6163_s29, 8192  ;;  %p5838_p4 = scmp.lt.s32.totalorder %s6163_s29, %s6163_s29 }
  0x61   : > { %p5831_p5 = scmp.ne.s32.totalorder %s6163_s29, %s5830_s26  ;;  %p5839_p10 = scmp.lt.s32.totalorder %s5830_s26, %s5830_s26 }
  0x63   : > { %p5833_p7 = pnand %p5831_p5, %p6173_p8  ;;  %p5840_p11 = por %p5839_p10, %p5838_p4 }
  0x65   : > { %p5834_p9 = pneg %p5833_p7 }
  0x67   : > { %p5841_p12 = pnand %p5840_p11, %p5834_p9 }
  0x69   : > { %5844 = shalt.err (!%p5841_p12)
}
  0x6a   : > { %5250 = dma.hbm_to_vmem [thread:$0]  (!%p6157_p6), %s7329_s7, 8192, %s6163_s29, [#allocation12], %s7292_s30, %s7292_s30, %s7294_s12  }
  0x6b   : > { %s6050_s10 = smov [#allocation10]   ;;  %s7330_s5 = sld [smem:[#allocation37_spill]] }
  0x6c   : > { %s345_s11 = sshll.u32 %s6050_s10, 4  ;;  %s346_s11 = int_to_ptr.vmem [resolvable:$true] %s345_s11 }
  0x71   : > { %s5845_s15 = scalar_lea.hbm %s7330_s5, 8192 }
  0x72   : > { %p5846_p13 = scmp.ne.s32.totalorder %s7330_s5, %s5845_s15  ;;  %p5852_p5 = scmp.lt.u32.totalorder %s5845_s15, %s7330_s5 }
  0x74   : > { %p5848_p0 = pnand %p5846_p13, %p6173_p8 }
  0x76   : > { %p5849_p2 = pneg %p5848_p0 }
  0x78   : > { %p5854_p7 = pnand %p5852_p5, %p5849_p2 }
  0x7a   : > { %5857 = shalt.err (!%p5854_p7)
}
  0x7b   : > { %s5858_s29 = scalar_lea.vmem %s346_s11, 8192  ;;  %p5866_p11 = scmp.lt.s32.totalorder %s346_s11, %s346_s11 }
  0x7c   : > { %p5859_p9 = scmp.ne.s32.totalorder %s346_s11, %s5858_s29  ;;  %p5867_p12 = scmp.lt.s32.totalorder %s5858_s29, %s5858_s29 }
  0x7e   : > { %p5861_p4 = pnand %p5859_p9, %p6173_p8  ;;  %p5868_p1 = por %p5867_p12, %p5866_p11 }
  0x80   : > { %p5862_p10 = pneg %p5861_p4 }
  0x82   : > { %p5869_p3 = pnand %p5868_p1, %p5862_p10 }
  0x84   : > { %5872 = shalt.err (!%p5869_p3)
}
  0x85   : > { %s7296_s22 = smov 256   ;;  %s7297_s8 = smov 16  }
  0x86   : > { %5247 = dma.hbm_to_vmem [thread:$0]  (!%p6157_p6), %s7330_s5, 8192, %s346_s11, [#allocation9], %s7296_s22, %s7296_s22, %s7297_s8  }
  0x87   : > { %s6053_s14 = smov [#allocation13]   ;;  %s7331_s9 = sld [smem:[#allocation40_spill]] }
  0x88   : > { %s377_s15 = sshll.u32 %s6053_s14, 4  ;;  %s378_s15 = int_to_ptr.vmem [resolvable:$true] %s377_s15 }
  0x8d   : > { %s5873_s28 = scalar_lea.hbm %s7331_s9, 4096 }
  0x8e   : > { %p5874_p1 = scmp.ne.s32.totalorder %s7331_s9, %s5873_s28  ;;  %p5880_p0 = scmp.lt.u32.totalorder %s5873_s28, %s7331_s9 }
  0x90   : > { %p5876_p3 = pnand %p5874_p1, %p6173_p8 }
  0x92   : > { %p5877_p13 = pneg %p5876_p3 }
  0x94   : > { %p5882_p2 = pnand %p5880_p0, %p5877_p13 }
  0x96   : > { %5885 = shalt.err (!%p5882_p2)
}
  0x97   : > { %s5886_s11 = scalar_lea.vmem %s378_s15, 4096  ;;  %p5894_p4 = scmp.lt.s32.totalorder %s378_s15, %s378_s15 }
  0x98   : > { %p5887_p5 = scmp.ne.s32.totalorder %s378_s15, %s5886_s11  ;;  %p5895_p10 = scmp.lt.s32.totalorder %s5886_s11, %s5886_s11 }
  0x9a   : > { %p5889_p7 = pnand %p5887_p5, %p6173_p8  ;;  %p5896_p11 = por %p5895_p10, %p5894_p4 }
  0x9c   : > { %p5890_p9 = pneg %p5889_p7 }
  0x9e   : > { %p5897_p12 = pnand %p5896_p11, %p5890_p9 }
  0xa0   : > { %5900 = shalt.err (!%p5897_p12)
}
  0xa1   : > { %s7332_s10 = smov 8   ;;  %s7333_s13 = smov 128  }
  0xa2   : > { %5253 = dma.hbm_to_vmem [thread:$0]  (!%p6157_p6), %s7331_s9, 4096, %s378_s15, [#allocation12], %s7333_s13, %s7333_s13, %s7332_s10  }
  0xa3   : > { %s4761_s27 = sadd.s32 4294967294, %s6043_s20   ;;  %s6293_s16 = sadd.s32 1, %s6043_s20  }
  0xa4   : > { %s39_s14 = sadd.s32 1, %s6039_s19  ;;  %s36_s21 = ssub.s32 %s6043_s20, %s6293_s16 }
  0xa5   : > { %p46_p8 = scmp.ne.s32.totalorder %s6039_s19, %s6035_s18  ;;  %p37_p1 = scmp.eq.s32.totalorder %s36_s21, 0 }
  0xa6   : > { %p47_p3 = scmp.eq.s32.totalorder %s6043_s20, 0  ;;  %p52_p13 = scmp.ne.s32.totalorder %s6035_s18, %s6031_s17 }
  0xa7   : > { %p291_p0 = scmp.eq.s32.totalorder %s6141_s23, 1  ;;  %p7335_p5 = scmp.eq.s32.totalorder %s6141_s23, 0 }
  0xa8   : > { %s6305_s25 = scalar_select %p37_p1, %s6039_s19, %s39_s14  }
  0xa9   : > { %p48_p2 = por %p47_p3, %p46_p8  ;;  %p6309_p7 = por %p7335_p5, %p52_p13 }
  0xaa   : > { %7334 = sst [smem:[#allocation22_spill]] %s6305_s25  ;;  %p6313_p6 = por %p291_p0, %p46_p8 }
  0xab   : > { %p297_p9 = scmp.eq.s32.totalorder %s4761_s27, 1  ;;  %p5270_p4 = scmp.lt.s32.totalorder %s6043_s20, 2 }
  0xac   : > { %s7337_s28 = scalar_select %p6313_p6, 1, 0 }
  0xad   : > { %s6319_s26 = sand.u32 1, %s6039_s19   ;;  %p6321_p10 = por %p297_p9, %p52_p13 }
  0xae   : > { %s4769_s11 = sshll.u32 %s6319_s26, 9  ;;  %s5000_s30 = sshll.u32 %s6043_s20, 13 }
  0xaf   : > { %s7338_s29 = scalar_select %p6321_p10, 1, 0 }
  0xb0   : > { %s7339_s0 = sld [smem:[#allocation34_spill]]  ;;  %s398_s27 = scalar_lea.vmem [#allocation2], %s4769_s11 }
  0xb1   : > { %s406_s22 = sshll.u32 %s398_s27, 4  ;;  %p6332_p11 = pnand %p5270_p4, %p48_p2  ;;  %s6336_s22 = int_to_ptr.vmem [resolvable:$true] %s406_s22 }
  0xb2   : > { %s395_s3 = scalar_lea.sflag [#allocation3], %s6319_s26 }
  0xb3   : > { %p5903_p8 = pneg %p6332_p11 }
  0xb6   : > { %s6330_s21 = scalar_lea.hbm %s7339_s0, %s5000_s30  ;;  %s5906_s12 = scalar_lea.hbm %s7339_s0, 16384 }
  0xb7   : > { %s5901_s5 = scalar_lea.hbm %s6330_s21, 8192  ;;  %p5907_p13 = scmp.lt.u32.totalorder %s6330_s21, %s7339_s0 }
  0xb8   : > { %p5902_p12 = scmp.ne.s32.totalorder %s6330_s21, %s5901_s5  ;;  %p5908_p0 = scmp.lt.u32.totalorder %s5906_s12, %s5901_s5 }
  0xb9   : > { %p5910_p5 = scmp.lt.u32.totalorder %s5901_s5, %s6330_s21 }
  0xba   : > { %p5904_p1 = pnand %p5903_p8, %p5902_p12  ;;  %p5909_p2 = por %p5908_p0, %p5907_p13 }
  0xbc   : > { %p5905_p3 = pneg %p5904_p1  ;;  %p5911_p9 = por %p5910_p5, %p5909_p2 }
  0xbe   : > { %p5912_p4 = pnand %p5911_p9, %p5905_p3 }
  0xc0   : > { %5915 = shalt.err (!%p5912_p4)
}
  0xc1   : > { %s5916_s2 = scalar_lea.vmem %s6336_s22, 8192  ;;  %s6054_s11 = smov [#allocation2]  }
  0xc2   : > { %p5917_p12 = scmp.ne.s32.totalorder %s6336_s22, %s5916_s2  ;;  %s5921_s30 = sshll.u32 %s6054_s11, 4  ;;  %s5922_s30 = int_to_ptr.vmem [resolvable:$false] %s5921_s30 }
  0xc3   : > { %s5923_s14 = scalar_lea.vmem %s5922_s30, 16384  ;;  %p5924_p6 = scmp.lt.s32.totalorder %s6336_s22, %s5922_s30 }
  0xc4   : > { %p5919_p1 = pnand %p5917_p12, %p5903_p8  ;;  %p5925_p13 = scmp.lt.s32.totalorder %s5923_s14, %s5916_s2 }
  0xc6   : > { %p5920_p10 = pneg %p5919_p1  ;;  %p5926_p0 = por %p5925_p13, %p5924_p6 }
  0xc8   : > { %p5927_p2 = pnand %p5926_p0, %p5920_p10 }
  0xca   : > { %5930 = shalt.err (!%p5927_p2)
}
  0xcb   : > { %s7341_s5 = smov 16   ;;  %s7342_s12 = smov 256  }
  0xcc   : > { %5257 = dma.hbm_to_vmem [thread:$0]  (!%p6332_p11), %s6330_s21, 8192, %s6336_s22, %s395_s3, %s7342_s12, %s7342_s12, %s7341_s5  }
  0xcd   : > { %s4773_s27 = sshll.u32 %s6319_s26, 8  ;;  %s5001_s11 = sshll.u32 %s6043_s20, 12 }
  0xce   : > { %s6375_s14 = scalar_lea.hbm %s7278_s1, %s5001_s11  ;;  %s420_s0 = scalar_lea.vmem [#allocation5], %s4773_s27 }
  0xcf   : > { %s427_s7 = sshll.u32 %s420_s0, 4  ;;  %s7343_s9 = sand.u32 1, %s6043_s20   ;;  %s6377_s7 = int_to_ptr.vmem [resolvable:$true] %s427_s7 }
  0xd0   : > { %s6381_s25 = scalar_lea.sflag [#allocation6], %s7343_s9  ;;  %s5931_s19 = scalar_lea.hbm %s6375_s14, 4096 }
  0xd1   : > { %p5932_p6 = scmp.ne.s32.totalorder %s6375_s14, %s5931_s19  ;;  %s5936_s26 = scalar_lea.hbm %s7278_s1, 8192 }
  0xd2   : > { %p5937_p5 = scmp.lt.u32.totalorder %s6375_s14, %s7278_s1  ;;  %p5938_p9 = scmp.lt.u32.totalorder %s5936_s26, %s5931_s19 }
  0xd3   : > { %p5934_p10 = pnand %p5932_p6, %p5903_p8  ;;  %p5940_p12 = scmp.lt.u32.totalorder %s5931_s19, %s6375_s14 }
  0xd4   : > { %p5939_p4 = por %p5938_p9, %p5937_p5 }
  0xd5   : > { %p5935_p3 = pneg %p5934_p10 }
  0xd6   : > { %p5941_p1 = por %p5940_p12, %p5939_p4 }
  0xd8   : > { %p5942_p13 = pnand %p5941_p1, %p5935_p3 }
  0xda   : > { %5945 = shalt.err (!%p5942_p13)
}
  0xdb   : > { %s5946_s0 = scalar_lea.vmem %s6377_s7, 4096  ;;  %s6055_s9 = smov [#allocation5]  }
  0xdc   : > { %p5947_p0 = scmp.ne.s32.totalorder %s6377_s7, %s5946_s0  ;;  %s5951_s12 = sshll.u32 %s6055_s9, 4  ;;  %s5952_s12 = int_to_ptr.vmem [resolvable:$false] %s5951_s12 }
  0xdd   : > { %s5953_s27 = scalar_lea.vmem %s5952_s12, 8192  ;;  %p5954_p10 = scmp.lt.s32.totalorder %s6377_s7, %s5952_s12 }
  0xde   : > { %p5949_p2 = pnand %p5947_p0, %p5903_p8  ;;  %p5955_p5 = scmp.lt.s32.totalorder %s5953_s27, %s5946_s0 }
  0xe0   : > { %p5950_p6 = pneg %p5949_p2  ;;  %p5956_p9 = por %p5955_p5, %p5954_p10 }
  0xe2   : > { %p5957_p4 = pnand %p5956_p9, %p5950_p6 }
  0xe4   : > { %5960 = shalt.err (!%p5957_p4)
}
  0xe5   : > { %5260 = dma.hbm_to_vmem [thread:$0]  (!%p6332_p11), %s6375_s14, 4096, %s6377_s7, %s6381_s25, %s7333_s13, %s7333_s13, %s7332_s10  }
  0xe6   : > { %p7344_p8 = scmp.ne.s32.totalorder %s7324_s24, 0 }
  0xe8   : > { %439 = sbr.rel (%p7344_p8) target bundleno = 1522 (0x5f2), region = 64 }
  0xef   : > { %s6413_s19 = sand.u32 1, %s6035_s18  }
  0xf0   : > { %s4777_s11 = sshll.u32 %s6413_s19, 9  ;;  %s442_s2 = scalar_lea.sflag [#allocation3], %s6413_s19 }
  0xf1   : > { %s6419_s8 = scalar_lea.vmem [#allocation2], %s4777_s11 }
  0xf2   : > { %6006 = dma.done.wait (%p6309_p7), %s442_s2, 8192  }
  0xf3   : > { %6008 = vsyncadd (%p6309_p7), %s442_s2, 4294959104  ;;  %s450_s7 = sand.u32 1, %s6141_s23   ;;  %s4778_s24 = sshll.u32 %s6413_s19, 8 }
  0xf4   : > { %s451_s10 = scalar_lea.sflag [#allocation6], %s450_s7  ;;  %s6427_s13 = scalar_lea.vmem [#allocation5], %s4778_s24 }
  0xf5   : > { %6010 = dma.done.wait (%p6309_p7), %s451_s10, 4096  }
  0xf6   : > { %6012 = vsyncadd (%p6309_p7), %s451_s10, 4294963200  ;;  %p7345_p11 = scmp.eq.s32.totalorder %s6141_s23, 0 }
  0xf8   : > { %6014 = dma.done.wait (%p7345_p11), [#allocation6], 4096   ;;  %p7346_p3 = pmov %p7345_p11 }
  0xfa   : > { %6016 = vsyncadd (%p7346_p3), [#allocation6], 4294963200  ;;  %p7347_p12 = pmov %p7346_p3 }
  0xfb   : > { %p7348_p1 = pmov %p7346_p3 }
  0xfc   : > { %6018 = dma.done.wait (%p7347_p12), [#allocation9], 10240  }
  0xfd   : > { %6020 = vsyncadd (%p7348_p1), [#allocation9], 4294957056  ;;  %p7349_p13 = pmov %p7348_p1 }
  0xfe   : > { %p7350_p0 = pmov %p7348_p1 }
  0xff   : > { %6022 = dma.done.wait (%p7349_p13), [#allocation12], 12288  }
 0x100   : > { %6024 = vsyncadd (%p7350_p0), [#allocation12], 4294955008  ;;  %v6056_v0 = vmov 0   ;;  %v5321_v1 = vld [vmem:[#allocation8 + $0x4] ss:$8 sps:$4 sm:$0xff]   ;;  %v652_v24 = vld [vmem:[%s6427_s13 + $0x10] sm:$0xff] }
 0x101   : > { %826 = vmatprep.mubr.bf16.mxu0 %v6056_v0  ;;  %906 = vmatprep.mubr.bf16.mxu1 %v6056_v0  ;;  %v5323_v2 = vld [vmem:[#allocation8] ss:$8 sps:$4 sm:$0xff]   ;;  %v5324_v3 = vld [vmem:[#allocation8 + $0x14] ss:$8 sps:$4 sm:$0xff]   ;;  %v5326_v4 = vld [vmem:[#allocation8 + $0x10] ss:$8 sps:$4 sm:$0xff]  }
 0x102   : > { %794 = vmatprep.subr.bf16.mxu0 %v5321_v1  ;;  %5004 = vmatprep.subr.bf16.mxu1 %v5321_v1  ;;  %v5327_v5 = vld [vmem:[#allocation8 + $0x24] ss:$8 sps:$4 sm:$0xff]   ;;  %v5329_v6 = vld [vmem:[#allocation8 + $0x20] ss:$8 sps:$4 sm:$0xff]   ;;  %v5330_v7 = vld [vmem:[#allocation8 + $0x34] ss:$8 sps:$4 sm:$0xff]  }
 0x103   : > { %795 = vmatpush1.bf16.msra.mxu0 %v5323_v2  ;;  %5012 = vmatpush1.bf16.msra.mxu1 %v5323_v2  ;;  %v5332_v8 = vld [vmem:[#allocation8 + $0x30] ss:$8 sps:$4 sm:$0xff]   ;;  %v5333_v9 = vld [vmem:[#allocation8 + $0x44] ss:$8 sps:$4 sm:$0xff]   ;;  %v5335_v10 = vld [vmem:[#allocation8 + $0x40] ss:$8 sps:$4 sm:$0xff]  }
 0x104   : > { %796 = vmatprep.subr.bf16.mxu0 %v5324_v3  ;;  %5005 = vmatprep.subr.bf16.mxu1 %v5324_v3  ;;  %v5336_v11 = vld [vmem:[#allocation8 + $0x54] ss:$8 sps:$4 sm:$0xff]   ;;  %v5338_v12 = vld [vmem:[#allocation8 + $0x50] ss:$8 sps:$4 sm:$0xff]   ;;  %v5339_v13 = vld [vmem:[#allocation8 + $0x64] ss:$8 sps:$4 sm:$0xff]  }
 0x105   : > { %v5341_v14 = vld [vmem:[#allocation8 + $0x60] ss:$8 sps:$4 sm:$0xff]   ;;  %v5342_v15 = vld [vmem:[#allocation8 + $0x74] ss:$8 sps:$4 sm:$0xff]   ;;  %v5344_v16 = vld [vmem:[#allocation8 + $0x70] ss:$8 sps:$4 sm:$0xff]  }
 0x106   : > { %v650_v17 = vld [vmem:[%s6427_s13] sm:$0xff]  ;;  %v651_v18 = vld [vmem:[%s6427_s13 + $0x8] sm:$0xff]  ;;  %v5350_v22 = vld [vmem:[#allocation7 + $0x14] ss:$8 sps:$4 sm:$0xff]   ;;  %s7373_s26 = sld [smem:[#allocation39_spill]]  ;;  %s7374_s0 = sld [smem:[#allocation41_spill]] }
 0x107   : > { %797 = vmatpush1.bf16.msra.mxu0 %v5326_v4  ;;  %5013 = vmatpush1.bf16.msra.mxu1 %v5326_v4  ;;  %v5347_v19 = vld [vmem:[#allocation7 + $0x4] ss:$8 sps:$4 sm:$0xff]   ;;  %v682_v20 = vpack.c.bf16 %v651_v18, %v650_v17  ;;  %v5345_v21 = vld [vmem:[#allocation7] ss:$8 sps:$4 sm:$0xff]   ;;  %v5348_v23 = vld [vmem:[#allocation7 + $0x10] ss:$8 sps:$4 sm:$0xff]  }
 0x108   : > { %798 = vmatprep.subr.bf16.mxu0 %v5327_v5  ;;  %5006 = vmatprep.subr.bf16.mxu1 %v5327_v5  ;;  %v653_v25 = vld [vmem:[%s6427_s13 + $0x18] sm:$0xff]  ;;  %v5353_v26 = vld [vmem:[#allocation7 + $0x24] ss:$8 sps:$4 sm:$0xff]   ;;  %v5351_v28 = vld [vmem:[#allocation7 + $0x20] ss:$8 sps:$4 sm:$0xff]   ;;  %s7107_s9 = scalar_lea.vmem [#allocation14], %s4777_s11 }
 0x109   : > { %v683_v27 = vpack.c.bf16 %v653_v25, %v652_v24  ;;  %v5356_v29 = vld [vmem:[#allocation7 + $0x34] ss:$8 sps:$4 sm:$0xff]   ;;  %v5354_v30 = vld [vmem:[#allocation7 + $0x30] ss:$8 sps:$4 sm:$0xff]   ;;  %v654_v31 = vld [vmem:[%s6427_s13 + $0x20] sm:$0xff]  ;;  %s5003_s12 = sshll.u32 %s6141_s23, 13 }
 0x10a   : > { %v655_v32 = vld [vmem:[%s6427_s13 + $0x28] sm:$0xff]  ;;  %v5362_v36 = vld [vmem:[#allocation7 + $0x54] ss:$8 sps:$4 sm:$0xff]   ;;  %v666_v37 = vld [vmem:[%s6427_s13 + $0x80] sm:$0xff]  ;;  %s4618_s27 = sshll.u32 %s7107_s9, 4  ;;  %s4604_s23 = scalar_lea.sflag [#allocation4], %s6413_s19  ;;  %s7230_s27 = int_to_ptr.vmem [resolvable:$true] %s4618_s27 }
 0x10b   : > { %799 = vmatpush1.bf16.msra.mxu0 %v5329_v6  ;;  %5014 = vmatpush1.bf16.msra.mxu1 %v5329_v6  ;;  %v5359_v33 = vld [vmem:[#allocation7 + $0x44] ss:$8 sps:$4 sm:$0xff]   ;;  %v684_v34 = vpack.c.bf16 %v655_v32, %v654_v31  ;;  %v5357_v35 = vld [vmem:[#allocation7 + $0x40] ss:$8 sps:$4 sm:$0xff]   ;;  %v5360_v40 = vld [vmem:[#allocation7 + $0x50] ss:$8 sps:$4 sm:$0xff]  }
 0x10c   : > { %800 = vmatprep.subr.bf16.mxu0 %v5330_v7  ;;  %5007 = vmatprep.subr.bf16.mxu1 %v5330_v7  ;;  %v667_v38 = vld [vmem:[%s6427_s13 + $0x88] sm:$0xff]  ;;  %v656_v41 = vld [vmem:[%s6427_s13 + $0x30] sm:$0xff]  ;;  %v657_v42 = vld [vmem:[%s6427_s13 + $0x38] sm:$0xff]  ;;  %s5961_s24 = scalar_lea.vmem %s7230_s27, 8192  ;;  %p7376_p2 = scmp.ne.s32.totalorder %s7337_s28, 0 }
 0x10d   : > { %v690_v39 = vpack.c.bf16 %v667_v38, %v666_v37  ;;  %v5365_v43 = vld [vmem:[#allocation7 + $0x64] ss:$8 sps:$4 sm:$0xff]   ;;  %v668_v44 = vld [vmem:[%s6427_s13 + $0x90] sm:$0xff]  ;;  %v669_v45 = vld [vmem:[%s6427_s13 + $0x98] sm:$0xff]  ;;  %v685_v46 = vpack.c.bf16 %v657_v42, %v656_v41  ;;  %p5962_p7 = scmp.ne.s32.totalorder %s7230_s27, %s5961_s24  ;;  %s6057_s10 = smov [#allocation14]  }
 0x10e   : > { %v5363_v47 = vld [vmem:[#allocation7 + $0x60] ss:$8 sps:$4 sm:$0xff]   ;;  %v5368_v48 = vld [vmem:[#allocation7 + $0x74] ss:$8 sps:$4 sm:$0xff]   ;;  %v691_v49 = vpack.c.bf16 %v669_v45, %v668_v44  ;;  %v5366_v50 = vld [vmem:[#allocation7 + $0x70] ss:$8 sps:$4 sm:$0xff]  }
 0x10f   : > { %801 = vmatpush1.bf16.msra.mxu0 %v5332_v8  ;;  %5015 = vmatpush1.bf16.msra.mxu1 %v5332_v8  ;;  %v658_v51 = vld [vmem:[%s6427_s13 + $0x40] sm:$0xff]  ;;  %v659_v52 = vld [vmem:[%s6427_s13 + $0x48] sm:$0xff]  ;;  %v5374_v58 = vld [vmem:[#allocation7 + $0x94] ss:$8 sps:$4 sm:$0xff]   ;;  %p5963_p6 = pnand %p5962_p7, %p7376_p2 }
 0x110   : > { %802 = vmatprep.subr.bf16.mxu0 %v5333_v9  ;;  %5008 = vmatprep.subr.bf16.mxu1 %v5333_v9  ;;  %v5371_v53 = vld [vmem:[#allocation7 + $0x84] ss:$8 sps:$4 sm:$0xff]   ;;  %v5369_v56 = vld [vmem:[#allocation7 + $0x80] ss:$8 sps:$4 sm:$0xff]   ;;  %v686_v57 = vpack.c.bf16 %v659_v52, %v658_v51  ;;  %v5372_v60 = vld [vmem:[#allocation7 + $0x90] ss:$8 sps:$4 sm:$0xff]  }
 0x111   : > { %v670_v54 = vld [vmem:[%s6427_s13 + $0xa0] sm:$0xff]  ;;  %v671_v55 = vld [vmem:[%s6427_s13 + $0xa8] sm:$0xff]  ;;  %v660_v61 = vld [vmem:[%s6427_s13 + $0x50] sm:$0xff]  ;;  %p5964_p10 = pneg %p5963_p6 }
 0x112   : > { %v692_v59 = vpack.c.bf16 %v671_v55, %v670_v54  ;;  %v661_v62 = vld [vmem:[%s6427_s13 + $0x58] sm:$0xff]  ;;  %v5377_v63 = vld [vmem:[#allocation7 + $0xa4] ss:$8 sps:$4 sm:$0xff]   ;;  %v672_v1 = vld [vmem:[%s6427_s13 + $0xb0] sm:$0xff] }
 0x113   : > { %803 = vmatpush1.bf16.msra.mxu0 %v5335_v10  ;;  %5016 = vmatpush1.bf16.msra.mxu1 %v5335_v10  ;;  %v673_v2 = vld [vmem:[%s6427_s13 + $0xb8] sm:$0xff]  ;;  %v5375_v3 = vld [vmem:[#allocation7 + $0xa0] ss:$8 sps:$4 sm:$0xff]   ;;  %v687_v4 = vpack.c.bf16 %v661_v62, %v660_v61  ;;  %v5383_v10 = vld [vmem:[#allocation7 + $0xc4] ss:$8 sps:$4 sm:$0xff]  }
 0x114   : > { %804 = vmatprep.subr.bf16.mxu0 %v5336_v11  ;;  %5009 = vmatprep.subr.bf16.mxu1 %v5336_v11  ;;  %v5380_v5 = vld [vmem:[#allocation7 + $0xb4] ss:$8 sps:$4 sm:$0xff]   ;;  %v693_v6 = vpack.c.bf16 %v673_v2, %v672_v1  ;;  %v5378_v7 = vld [vmem:[#allocation7 + $0xb0] ss:$8 sps:$4 sm:$0xff]   ;;  %v662_v8 = vld [vmem:[%s6427_s13 + $0x60] sm:$0xff] }
 0x115   : > { %v663_v9 = vld [vmem:[%s6427_s13 + $0x68] sm:$0xff]  ;;  %v674_v11 = vld [vmem:[%s6427_s13 + $0xc0] sm:$0xff]  ;;  %v5384_v17 = vld [vmem:[#allocation7 + $0xd0] ss:$8 sps:$4 sm:$0xff]  }
 0x116   : > { %v664_v18 = vld [vmem:[%s6427_s13 + $0x70] sm:$0xff]  ;;  %v677_v24 = vld [vmem:[%s6427_s13 + $0xd8] sm:$0xff]  ;;  %v5387_v25 = vld [vmem:[#allocation7 + $0xe0] ss:$8 sps:$4 sm:$0xff]  }
 0x117   : > { %805 = vmatpush1.bf16.msra.mxu0 %v5338_v12  ;;  %5017 = vmatpush1.bf16.msra.mxu1 %v5338_v12  ;;  %v675_v12 = vld [vmem:[%s6427_s13 + $0xc8] sm:$0xff]  ;;  %v5393_v31 = vld [vmem:[#allocation10] ss:$16 sps:$4 sm:$0xff]   ;;  %v5395_v32 = vld [vmem:[#allocation10 + $0x4] ss:$16 sps:$4 sm:$0xff]  }
 0x118   : > { %806 = vmatprep.subr.bf16.mxu0 %v5339_v13  ;;  %5010 = vmatprep.subr.bf16.mxu1 %v5339_v13  ;;  %v5381_v13 = vld [vmem:[#allocation7 + $0xc0] ss:$8 sps:$4 sm:$0xff]   ;;  %v529_v37 = vld [vmem:[%s6419_s8 + $0x38] sm:$0xff]  ;;  %v680_v51 = vld [vmem:[%s6427_s13 + $0xf0] sm:$0xff] }
 0x119   : > { %v678_v38 = vld [vmem:[%s6427_s13 + $0xe0] sm:$0xff]  ;;  %v681_v52 = vld [vmem:[%s6427_s13 + $0xf8] sm:$0xff]  ;;  %v535_v62 = vld [vmem:[%s6419_s8 + $0x68] sm:$0xff] }
 0x11a   : > { %v5396_v41 = vld [vmem:[#allocation10 + $0x20] ss:$16 sps:$4 sm:$0xff]   ;;  %v5407_v54 = vld [vmem:[#allocation10 + $0x84] ss:$16 sps:$4 sm:$0xff]  }
 0x11b   : > { %807 = vmatpush1.bf16.msra.mxu0 %v5341_v14  ;;  %5018 = vmatpush1.bf16.msra.mxu1 %v5341_v14  ;;  %v688_v14 = vpack.c.bf16 %v663_v9, %v662_v8  ;;  %v526_v45 = vld [vmem:[%s6419_s8 + $0x20] sm:$0xff]  ;;  %v539_v8 = vld [vmem:[%s6419_s8 + $0x88] sm:$0xff]  ;;  %v541_v9 = vld [vmem:[%s6419_s8 + $0x98] sm:$0xff] }
 0x11c   : > { %808 = vmatprep.subr.bf16.mxu0 %v5342_v15  ;;  %5011 = vmatprep.subr.bf16.mxu1 %v5342_v15  ;;  %v5386_v15 = vld [vmem:[#allocation7 + $0xd4] ss:$8 sps:$4 sm:$0xff]  }
 0x11d   : > { %v5410_v61 = vld [vmem:[#allocation10 + $0xa4] ss:$16 sps:$4 sm:$0xff]  }
 0x11e   : > { %v5413_v1 = vld [vmem:[#allocation10 + $0xc4] ss:$16 sps:$4 sm:$0xff]  }
 0x11f   : > { %809 = vmatpush1.bf16.msra.mxu0 %v5344_v16  ;;  %5019 = vmatpush1.bf16.msra.mxu1 %v5344_v16  ;;  %v694_v16 = vpack.c.bf16 %v675_v12, %v674_v11  ;;  %v5419_v11 = vld [vmem:[#allocation10 + $0x104] ss:$16 sps:$4 sm:$0xff]  }
 0x120   : > { %1147 = vmatprep.subr.bf16.mxu0 %v5347_v19  ;;  %v665_v19 = vld [vmem:[%s6427_s13 + $0x78] sm:$0xff]  ;;  %2046 = vmatprep.subr.bf16.mxu1 %v5395_v32 }
 0x122   : > { %827 = vmatmul.mubr.bf16.vlgmr.msra.gmra.mrb[0].mxu0 %v682_v20  ;;  %907 = vmatmul.mubr.bf16.vlgmr.msra.gmra.mrb[0].mxu1 %v690_v39  ;;  %v5389_v20 = vld [vmem:[#allocation7 + $0xe4] ss:$8 sps:$4 sm:$0xff]  }
 0x123   : > { %1148 = vmatpush1.bf16.msra.mxu0 %v5345_v21  ;;  %836 = vmatprep.mubr.bf16.mxu0 %v6056_v0  ;;  %v523_v21 = vld [vmem:[%s6419_s8 + $0x8] sm:$0xff] }
 0x124   : > { %1149 = vmatprep.subr.bf16.mxu0 %v5350_v22  ;;  %916 = vmatprep.mubr.bf16.mxu1 %v6056_v0  ;;  %v525_v22 = vld [vmem:[%s6419_s8 + $0x18] sm:$0xff]  ;;  %v679_v39 = vld [vmem:[%s6427_s13 + $0xe8] sm:$0xff] }
 0x125   : > { %2047 = vmatpush1.bf16.msra.mxu1 %v5393_v31  ;;  %v696_v44 = vpack.c.bf16 %v679_v39, %v678_v38  ;;  %v5426_v31 = vld [vmem:[#allocation10 + $0x160] ss:$16 sps:$4 sm:$0xff]   ;;  %v553_v38 = vld [vmem:[%s6419_s8 + $0xf8] sm:$0xff] }
 0x127   : > { %1150 = vmatpush1.bf16.msra.mxu0 %v5348_v23  ;;  %v676_v23 = vld [vmem:[%s6427_s13 + $0xd0] sm:$0xff]  ;;  %s5965_s13 = sshll.u32 %s6057_s10, 4  ;;  %s5966_s13 = int_to_ptr.vmem [resolvable:$false] %s5965_s13 }
 0x128   : > { %1151 = vmatprep.subr.bf16.mxu0 %v5353_v26  ;;  %v689_v26 = vpack.c.bf16 %v665_v19, %v664_v18  ;;  %v543_v18 = vld [vmem:[%s6419_s8 + $0xa8] sm:$0xff]  ;;  %v545_v19 = vld [vmem:[%s6419_s8 + $0xb8] sm:$0xff]  ;;  %s5967_s25 = scalar_lea.vmem %s5966_s13, 16384  ;;  %p5968_p5 = scmp.lt.s32.totalorder %s7230_s27, %s5966_s13 }
 0x129   : > { %p5969_p9 = scmp.lt.s32.totalorder %s5967_s25, %s5961_s24 }
 0x12a   : > { %837 = vmatmul.mubr.bf16.gmra.mrb[4].mxu0 %v683_v27  ;;  %917 = vmatmul.mubr.bf16.gmra.mrb[4].mxu1 %v691_v49  ;;  %v5392_v27 = vld [vmem:[#allocation7 + $0xf4] ss:$8 sps:$4 sm:$0xff]   ;;  %v5399_v49 = vld [vmem:[#allocation10 + $0x40] ss:$16 sps:$4 sm:$0xff]  }
 0x12b   : > { %1152 = vmatpush1.bf16.msra.mxu0 %v5351_v28  ;;  %846 = vmatprep.mubr.bf16.mxu0 %v6056_v0  ;;  %v587_v28 = vpack.c.bf16 %v525_v22, %v523_v21  ;;  %v5420_v21 = vld [vmem:[#allocation10 + $0x120] ss:$16 sps:$4 sm:$0xff]   ;;  %v597_v22 = vpack.c.bf16 %v545_v19, %v543_v18  ;;  %p5970_p4 = por %p5969_p9, %p5968_p5 }
 0x12c   : > { %1153 = vmatprep.subr.bf16.mxu0 %v5356_v29  ;;  %926 = vmatprep.mubr.bf16.mxu1 %v6056_v0  ;;  %v695_v29 = vpack.c.bf16 %v677_v24, %v676_v23  ;;  %v5425_v23 = vld [vmem:[#allocation10 + $0x144] ss:$16 sps:$4 sm:$0xff]   ;;  %v5423_v24 = vld [vmem:[#allocation10 + $0x140] ss:$16 sps:$4 sm:$0xff]  }
 0x12d   : > { %v574_v19 = vld [vmem:[%s6419_s8 + $0x1a0] sm:$0xff]  ;;  %p5971_p8 = pnand %p5970_p4, %p5964_p10 }
 0x12f   : > { %1154 = vmatpush1.bf16.msra.mxu0 %v5354_v30  ;;  %v5390_v30 = vld [vmem:[#allocation7 + $0xf0] ss:$8 sps:$4 sm:$0xff]  }
 0x130   : > { %1155 = vmatprep.subr.bf16.mxu0 %v5359_v33  ;;  %v522_v33 = vld [vmem:[%s6419_s8] sm:$0xff] }
 0x132   : > { %847 = vmatmul.mubr.bf16.gmra.mrb[8].mxu0 %v684_v34  ;;  %927 = vmatmul.mubr.bf16.gmra.mrb[8].mxu1 %v692_v59  ;;  %v524_v34 = vld [vmem:[%s6419_s8 + $0x10] sm:$0xff]  ;;  %v530_v59 = vld [vmem:[%s6419_s8 + $0x40] sm:$0xff] }
 0x133   : > { %1156 = vmatpush1.bf16.msra.mxu0 %v5357_v35  ;;  %856 = vmatprep.mubr.bf16.mxu0 %v6056_v0  ;;  %v5398_v35 = vld [vmem:[#allocation10 + $0x24] ss:$16 sps:$4 sm:$0xff]  }
 0x134   : > { %1157 = vmatprep.subr.bf16.mxu0 %v5362_v36  ;;  %936 = vmatprep.mubr.bf16.mxu1 %v6056_v0  ;;  %v527_v36 = vld [vmem:[%s6419_s8 + $0x28] sm:$0xff] }
 0x135   : > { %v589_v42 = vpack.c.bf16 %v529_v37, %v527_v36  ;;  %2048 = vmatprep.subr.bf16.mxu1 %v5398_v35  ;;  %v546_v35 = vld [vmem:[%s6419_s8 + $0xc0] sm:$0xff]  ;;  %v548_v36 = vld [vmem:[%s6419_s8 + $0xd0] sm:$0xff]  ;;  %v551_v37 = vld [vmem:[%s6419_s8 + $0xe8] sm:$0xff] }
 0x136   : > { %2049 = vmatpush1.bf16.msra.mxu1 %v5396_v41  ;;  %v598_v39 = vpack.c.bf16 %v548_v36, %v546_v35  ;;  %v550_v41 = vld [vmem:[%s6419_s8 + $0xe0] sm:$0xff] }
 0x137   : > { %1158 = vmatpush1.bf16.msra.mxu0 %v5360_v40  ;;  %v586_v40 = vpack.c.bf16 %v524_v34, %v522_v33  ;;  %v5431_v33 = vld [vmem:[#allocation10 + $0x184] ss:$16 sps:$4 sm:$0xff]   ;;  %v5429_v34 = vld [vmem:[#allocation10 + $0x180] ss:$16 sps:$4 sm:$0xff]  }
 0x138   : > { %1159 = vmatprep.subr.bf16.mxu0 %v5365_v43  ;;  %v5401_v43 = vld [vmem:[#allocation10 + $0x44] ss:$16 sps:$4 sm:$0xff]  }
 0x139   : > { %2050 = vmatprep.subr.bf16.mxu1 %v5401_v43  ;;  %v555_v43 = vld [vmem:[%s6419_s8 + $0x108] sm:$0xff] }
 0x13a   : > { %857 = vmatmul.mubr.bf16.gmra.mrb[12].mxu0 %v685_v46  ;;  %937 = vmatmul.mubr.bf16.gmra.mrb[12].mxu1 %v693_v6  ;;  %v528_v46 = vld [vmem:[%s6419_s8 + $0x30] sm:$0xff] }
 0x13b   : > { %1160 = vmatpush1.bf16.msra.mxu0 %v5363_v47  ;;  %866 = vmatprep.mubr.bf16.mxu0 %v6056_v0  ;;  %v531_v47 = vld [vmem:[%s6419_s8 + $0x48] sm:$0xff]  ;;  %v588_v55 = vpack.c.bf16 %v528_v46, %v526_v45  ;;  %v536_v6 = vld [vmem:[%s6419_s8 + $0x70] sm:$0xff] }
 0x13c   : > { %1161 = vmatprep.subr.bf16.mxu0 %v5368_v48  ;;  %946 = vmatprep.mubr.bf16.mxu1 %v6056_v0  ;;  %v533_v48 = vld [vmem:[%s6419_s8 + $0x58] sm:$0xff] }
 0x13d   : > { %2051 = vmatpush1.bf16.msra.mxu1 %v5399_v49  ;;  %v559_v49 = vld [vmem:[%s6419_s8 + $0x128] sm:$0xff] }
 0x13f   : > { %1162 = vmatpush1.bf16.msra.mxu0 %v5366_v50  ;;  %v5404_v50 = vld [vmem:[#allocation10 + $0x64] ss:$16 sps:$4 sm:$0xff]  }
 0x140   : > { %1163 = vmatprep.subr.bf16.mxu0 %v5371_v53  ;;  %v5402_v53 = vld [vmem:[#allocation10 + $0x60] ss:$16 sps:$4 sm:$0xff]   ;;  %2052 = vmatprep.subr.bf16.mxu1 %v5404_v50  ;;  %v561_v50 = vld [vmem:[%s6419_s8 + $0x138] sm:$0xff] }
 0x141   : > { %2053 = vmatpush1.bf16.msra.mxu1 %v5402_v53  ;;  %v558_v53 = vld [vmem:[%s6419_s8 + $0x120] sm:$0xff] }
 0x142   : > { %867 = vmatmul.mubr.bf16.gmra.mrb[16].mxu0 %v686_v57  ;;  %947 = vmatmul.mubr.bf16.gmra.mrb[16].mxu1 %v694_v16  ;;  %v697_v57 = vpack.c.bf16 %v681_v52, %v680_v51  ;;  %v540_v16 = vld [vmem:[%s6419_s8 + $0x90] sm:$0xff]  ;;  %v605_v52 = vpack.c.bf16 %v561_v50, %v559_v49 }
 0x143   : > { %1164 = vmatpush1.bf16.msra.mxu0 %v5369_v56  ;;  %876 = vmatprep.mubr.bf16.mxu0 %v6056_v0  ;;  %v591_v56 = vpack.c.bf16 %v533_v48, %v531_v47  ;;  %v554_v47 = vld [vmem:[%s6419_s8 + $0x100] sm:$0xff]  ;;  %v556_v48 = vld [vmem:[%s6419_s8 + $0x110] sm:$0xff] }
 0x144   : > { %1165 = vmatprep.subr.bf16.mxu0 %v5374_v58  ;;  %956 = vmatprep.mubr.bf16.mxu1 %v6056_v0  ;;  %v5405_v58 = vld [vmem:[#allocation10 + $0x80] ss:$16 sps:$4 sm:$0xff]   ;;  %v602_v51 = vpack.c.bf16 %v556_v48, %v554_v47 }
 0x145   : > { %2054 = vmatprep.subr.bf16.mxu1 %v5407_v54  ;;  %v560_v54 = vld [vmem:[%s6419_s8 + $0x130] sm:$0xff] }
 0x146   : > { %2055 = vmatpush1.bf16.msra.mxu1 %v5405_v58 }
 0x147   : > { %1166 = vmatpush1.bf16.msra.mxu0 %v5372_v60  ;;  %v532_v60 = vld [vmem:[%s6419_s8 + $0x50] sm:$0xff]  ;;  %2056 = vmatprep.subr.bf16.mxu1 %v5410_v61  ;;  %v567_v61 = vld [vmem:[%s6419_s8 + $0x168] sm:$0xff] }
 0x148   : > { %1167 = vmatprep.subr.bf16.mxu0 %v5377_v63  ;;  %v537_v63 = vld [vmem:[%s6419_s8 + $0x78] sm:$0xff]  ;;  %v590_v2 = vpack.c.bf16 %v532_v60, %v530_v59  ;;  %v562_v59 = vld [vmem:[%s6419_s8 + $0x140] sm:$0xff]  ;;  %v564_v60 = vld [vmem:[%s6419_s8 + $0x150] sm:$0xff] }
 0x14a   : > { %877 = vmatmul.mubr.bf16.gmra.mrb[20].mxu0 %v687_v4  ;;  %957 = vmatmul.mubr.bf16.gmra.mrb[20].mxu1 %v695_v29  ;;  %v5411_v4 = vld [vmem:[#allocation10 + $0xc0] ss:$16 sps:$4 sm:$0xff]   ;;  %v549_v29 = vld [vmem:[%s6419_s8 + $0xd8] sm:$0xff] }
 0x14b   : > { %1168 = vmatpush1.bf16.msra.mxu0 %v5375_v3  ;;  %886 = vmatprep.mubr.bf16.mxu0 %v6056_v0  ;;  %v593_v3 = vpack.c.bf16 %v537_v63, %v535_v62  ;;  %v569_v62 = vld [vmem:[%s6419_s8 + $0x178] sm:$0xff]  ;;  %v606_v63 = vpack.c.bf16 %v564_v60, %v562_v59 }
 0x14c   : > { %1169 = vmatprep.subr.bf16.mxu0 %v5380_v5  ;;  %966 = vmatprep.mubr.bf16.mxu1 %v6056_v0  ;;  %v534_v5 = vld [vmem:[%s6419_s8 + $0x60] sm:$0xff]  ;;  %v5483_v59 = vld [vmem:[#allocation11 + $0x10] ss:$8 sps:$4 sm:$0xff]   ;;  %v5485_v60 = vld [vmem:[#allocation11 + $0x14] ss:$8 sps:$4 sm:$0xff]  }
 0x14d   : > { %v592_v12 = vpack.c.bf16 %v536_v6, %v534_v5  ;;  %v573_v5 = vld [vmem:[%s6419_s8 + $0x198] sm:$0xff]  ;;  %v5432_v6 = vld [vmem:[#allocation10 + $0x1a0] ss:$16 sps:$4 sm:$0xff]  }
 0x14f   : > { %1170 = vmatpush1.bf16.msra.mxu0 %v5378_v7  ;;  %v5416_v7 = vld [vmem:[#allocation10 + $0xe4] ss:$16 sps:$4 sm:$0xff]  }
 0x150   : > { %1171 = vmatprep.subr.bf16.mxu0 %v5383_v10  ;;  %v5414_v10 = vld [vmem:[#allocation10 + $0xe0] ss:$16 sps:$4 sm:$0xff]  }
 0x152   : > { %887 = vmatmul.mubr.bf16.gmra.mrb[24].mxu0 %v688_v14  ;;  %967 = vmatmul.mubr.bf16.gmra.mrb[24].mxu1 %v696_v44  ;;  %v5417_v14 = vld [vmem:[#allocation10 + $0x100] ss:$16 sps:$4 sm:$0xff]   ;;  %v557_v44 = vld [vmem:[%s6419_s8 + $0x118] sm:$0xff] }
 0x153   : > { %1172 = vmatpush1.bf16.msra.mxu0 %v5381_v13  ;;  %896 = vmatprep.mubr.bf16.mxu0 %v6056_v0  ;;  %v595_v13 = vpack.c.bf16 %v541_v9, %v539_v8  ;;  %v603_v46 = vpack.c.bf16 %v557_v44, %v555_v43  ;;  %v5437_v9 = vld [vmem:[#allocation10 + $0x1c4] ss:$16 sps:$4 sm:$0xff]  }
 0x154   : > { %1173 = vmatprep.subr.bf16.mxu0 %v5386_v15  ;;  %976 = vmatprep.mubr.bf16.mxu1 %v6056_v0  ;;  %v5408_v0 = vld [vmem:[#allocation10 + $0xa0] ss:$16 sps:$4 sm:$0xff]  }
 0x155   : > { %2057 = vmatpush1.bf16.msra.mxu1 %v5408_v0  ;;  %v538_v15 = vld [vmem:[%s6419_s8 + $0x80] sm:$0xff]  ;;  %v609_v0 = vpack.c.bf16 %v569_v62, %v567_v61 }
 0x156   : > { %2058 = vmatprep.subr.bf16.mxu1 %v5413_v1  ;;  %v566_v1 = vld [vmem:[%s6419_s8 + $0x160] sm:$0xff] }
 0x157   : > { %1174 = vmatpush1.bf16.msra.mxu0 %v5384_v17  ;;  %v5422_v17 = vld [vmem:[#allocation10 + $0x124] ss:$16 sps:$4 sm:$0xff]   ;;  %v1340_v62 = vld [vmem:[%s7281_s4] sm:$0x3] }
 0x158   : > { %1175 = vmatprep.subr.bf16.mxu0 %v5389_v20  ;;  %v594_v20 = vpack.c.bf16 %v540_v16, %v538_v15  ;;  %v577_v15 = vld [vmem:[%s6419_s8 + $0x1b8] sm:$0xff]  ;;  %v5438_v16 = vld [vmem:[#allocation10 + $0x1e0] ss:$16 sps:$4 sm:$0xff]  }
 0x159   : > { %2059 = vmatpush1.bf16.msra.mxu1 %v5411_v4  ;;  %v571_v4 = vld [vmem:[%s6419_s8 + $0x188] sm:$0xff] }
 0x15a   : > { %897 = vmatmul.mubr.bf16.gmra.mrb[28].mxu0 %v689_v26  ;;  %977 = vmatmul.mubr.bf16.gmra.mrb[28].mxu1 %v697_v57  ;;  %v544_v26 = vld [vmem:[%s6419_s8 + $0xb0] sm:$0xff]  ;;  %v604_v57 = vpack.c.bf16 %v560_v54, %v558_v53  ;;  %v611_v8 = vpack.c.bf16 %v573_v5, %v571_v4  ;;  %v1342_v53 = vlaneseq }
 0x15b   : > { %1176 = vmatpush1.bf16.msra.mxu0 %v5387_v25  ;;  %1179 = vmatprep.mubr.bf16.mxu0 %v587_v28  ;;  %v542_v25 = vld [vmem:[%s6419_s8 + $0xa0] sm:$0xff]  ;;  %v547_v28 = vld [vmem:[%s6419_s8 + $0xc8] sm:$0xff] }
 0x15c   : > { %1177 = vmatprep.subr.bf16.mxu0 %v5392_v27  ;;  %2060 = vmatprep.subr.bf16.mxu1 %v5416_v7  ;;  %v5428_v27 = vld [vmem:[#allocation10 + $0x164] ss:$16 sps:$4 sm:$0xff]   ;;  %v599_v32 = vpack.c.bf16 %v549_v29, %v547_v28  ;;  %v583_v28 = vld [vmem:[%s6419_s8 + $0x1e8] sm:$0xff]  ;;  %v585_v29 = vld [vmem:[%s6419_s8 + $0x1f8] sm:$0xff] }
 0x15d   : > { %2061 = vmatpush1.bf16.msra.mxu1 %v5414_v10  ;;  %v5435_v10 = vld [vmem:[#allocation10 + $0x1c0] ss:$16 sps:$4 sm:$0xff]  }
 0x15e   : > { %2062 = vmatprep.subr.bf16.mxu1 %v5419_v11  ;;  %v570_v11 = vld [vmem:[%s6419_s8 + $0x180] sm:$0xff] }
 0x15f   : > { %1178 = vmatpush1.bf16.msra.mxu0 %v5390_v30  ;;  %v596_v30 = vpack.c.bf16 %v544_v26, %v542_v25  ;;  %v578_v26 = vld [vmem:[%s6419_s8 + $0x1c0] sm:$0xff] }
 0x161   : > { %2063 = vmatpush1.bf16.msra.mxu1 %v5417_v14  ;;  %v575_v14 = vld [vmem:[%s6419_s8 + $0x1a8] sm:$0xff] }
 0x162   : > { %1180 = vmatmul.mubr.bf16.vlgmr.msra.gmra.mrb[0].mxu0 %v586_v40  ;;  %2064 = vmatprep.subr.bf16.mxu1 %v5422_v17  ;;  %v601_v40 = vpack.c.bf16 %v553_v38, %v551_v37  ;;  %v613_v18 = vpack.c.bf16 %v577_v15, %v575_v14 }
 0x163   : > { %1189 = vmatprep.mubr.bf16.mxu0 %v589_v42  ;;  %v552_v42 = vld [vmem:[%s6419_s8 + $0xf0] sm:$0xff] }
 0x164   : > { %v600_v45 = vpack.c.bf16 %v552_v42, %v550_v41 }
 0x165   : > { %2065 = vmatpush1.bf16.msra.mxu1 %v5420_v21  ;;  %v5443_v21 = vld [vmem:[#allocation10 + $0xc] ss:$16 sps:$4 sm:$0xff]  }
 0x166   : > { %2066 = vmatprep.subr.bf16.mxu1 %v5425_v23  ;;  %v581_v23 = vld [vmem:[%s6419_s8 + $0x1d8] sm:$0xff] }
 0x169   : > { %2067 = vmatpush1.bf16.msra.mxu1 %v5423_v24 }
 0x16a   : > { %1190 = vmatmul.mubr.bf16.gmra.mrb[4].mxu0 %v588_v55  ;;  %2068 = vmatprep.subr.bf16.mxu1 %v5428_v27  ;;  %v563_v55 = vld [vmem:[%s6419_s8 + $0x148] sm:$0xff]  ;;  %v580_v27 = vld [vmem:[%s6419_s8 + $0x1d0] sm:$0xff] }
 0x16b   : > { %1199 = vmatprep.mubr.bf16.mxu0 %v591_v56  ;;  %v565_v56 = vld [vmem:[%s6419_s8 + $0x158] sm:$0xff] }
 0x16c   : > { %v607_v58 = vpack.c.bf16 %v565_v56, %v563_v55 }
 0x16d   : > { %2069 = vmatpush1.bf16.msra.mxu1 %v5426_v31  ;;  %v617_v31 = vpack.c.bf16 %v585_v29, %v583_v28 }
 0x16e   : > { %2070 = vmatprep.subr.bf16.mxu1 %v5431_v33  ;;  %v584_v33 = vld [vmem:[%s6419_s8 + $0x1f0] sm:$0xff] }
 0x171   : > { %2071 = vmatpush1.bf16.msra.mxu1 %v5429_v34 }
 0x172   : > { %1200 = vmatmul.mubr.bf16.gmra.mrb[8].mxu0 %v590_v2  ;;  %v568_v2 = vld [vmem:[%s6419_s8 + $0x170] sm:$0xff] }
 0x173   : > { %1209 = vmatprep.mubr.bf16.mxu0 %v593_v3  ;;  %v5434_v3 = vld [vmem:[#allocation10 + $0x1a4] ss:$16 sps:$4 sm:$0xff]   ;;  %v608_v7 = vpack.c.bf16 %v568_v2, %v566_v1 }
 0x174   : > { %2072 = vmatprep.subr.bf16.mxu1 %v5434_v3 }
 0x175   : > { %2073 = vmatpush1.bf16.msra.mxu1 %v5432_v6 }
 0x176   : > { %2074 = vmatprep.subr.bf16.mxu1 %v5437_v9 }
 0x179   : > { %2075 = vmatpush1.bf16.msra.mxu1 %v5435_v10 }
 0x17a   : > { %1210 = vmatmul.mubr.bf16.gmra.mrb[12].mxu0 %v592_v12  ;;  %v572_v12 = vld [vmem:[%s6419_s8 + $0x190] sm:$0xff] }
 0x17b   : > { %1219 = vmatprep.mubr.bf16.mxu0 %v595_v13  ;;  %v5440_v13 = vld [vmem:[#allocation10 + $0x1e4] ss:$16 sps:$4 sm:$0xff]   ;;  %v610_v17 = vpack.c.bf16 %v572_v12, %v570_v11 }
 0x17c   : > { %2076 = vmatprep.subr.bf16.mxu1 %v5440_v13 }
 0x17d   : > { %2077 = vmatpush1.bf16.msra.mxu1 %v5438_v16 }
 0x17e   : > { %2239 = vmatprep.subr.bf16.mxu1 %v5443_v21 }
 0x182   : > { %1220 = vmatmul.mubr.bf16.gmra.mrb[16].mxu0 %v594_v20  ;;  %v576_v20 = vld [vmem:[%s6419_s8 + $0x1b0] sm:$0xff] }
 0x183   : > { %1229 = vmatprep.mubr.bf16.mxu0 %v597_v22  ;;  %v579_v22 = vld [vmem:[%s6419_s8 + $0x1c8] sm:$0xff]  ;;  %v612_v24 = vpack.c.bf16 %v576_v20, %v574_v19 }
 0x184   : > { %v615_v25 = vpack.c.bf16 %v581_v23, %v579_v22  ;;  %v5495_v23 = vld [vmem:[#allocation11 + $0x30] ss:$8 sps:$4 sm:$0xff]  }
 0x18a   : > { %1230 = vmatmul.mubr.bf16.gmra.mrb[20].mxu0 %v596_v30  ;;  %v614_v30 = vpack.c.bf16 %v580_v27, %v578_v26 }
 0x18b   : > { %1239 = vmatprep.mubr.bf16.mxu0 %v599_v32  ;;  %v582_v32 = vld [vmem:[%s6419_s8 + $0x1e0] sm:$0xff]  ;;  %s7375_s8 = sld [smem:[#allocation42_spill]] }
 0x18c   : > { %v616_v34 = vpack.c.bf16 %v584_v33, %v582_v32  ;;  %v5503_v32 = vld [vmem:[#allocation11 + $0x44] ss:$8 sps:$4 sm:$0xff]  }
 0x191   : > { %s7228_s7 = scalar_lea.hbm %s7375_s8, %s5003_s12 }
 0x192   : > { %1240 = vmatmul.mubr.bf16.gmra.mrb[24].mxu0 %v598_v39 }
 0x193   : > { %1249 = vmatprep.mubr.bf16.mxu0 %v601_v40 }
 0x19a   : > { %1250 = vmatmul.mubr.bf16.gmra.mrb[28].mxu0 %v600_v45 }
 0x19b   : > { %1259 = vmatprep.mubr.bf16.mxu0 %v603_v46 }
 0x1a2   : > { %1260 = vmatmul.mubr.bf16.gmra.mrb[32].mxu0 %v602_v51  ;;  %v5477_v51 = vld [vmem:[#allocation11] ss:$8 sps:$4 sm:$0xff]  }
 0x1a3   : > { %1269 = vmatprep.mubr.bf16.mxu0 %v605_v52  ;;  %v5479_v52 = vld [vmem:[#allocation11 + $0x4] ss:$8 sps:$4 sm:$0xff]  }
 0x1a4   : > { %3276 = vmatprep.subr.bf16.mxu0 %v5479_v52  ;;  %v5441_v52 = vld [vmem:[#allocation10 + $0x8] ss:$16 sps:$4 sm:$0xff]  }
 0x1a5   : > { %3277 = vmatpush1.bf16.msra.mxu0 %v5477_v51 }
 0x1a6   : > { %3278 = vmatprep.subr.bf16.mxu0 %v5485_v60 }
 0x1a9   : > { %3279 = vmatpush1.bf16.msra.mxu0 %v5483_v59 }
 0x1aa   : > { %1270 = vmatmul.mubr.bf16.gmra.mrb[36].mxu0 %v604_v57  ;;  %v6595_v57 = vshrl.u32 %v1342_v53, 7  ;;  %v5501_v53 = vld [vmem:[#allocation11 + $0x40] ss:$8 sps:$4 sm:$0xff]  }
 0x1ab   : > { %1279 = vmatprep.mubr.bf16.mxu0 %v607_v58 }
 0x1ac   : > { %7351 = vst [vmem:[#allocation23_spill] sm:$0xff] %v6595_v57  ;;  %v6600_v61 = vsub.s32 0, %v6595_v57 }
 0x1ae   : > { %7352 = vst [vmem:[#allocation24_spill] sm:$0xff] %v6600_v61  ;;  %v6615_v3 = vrot.slane %v1340_v62, %v6600_v61 }
 0x1b2   : > { %1280 = vmatmul.mubr.bf16.gmra.mrb[40].mxu0 %v606_v63  ;;  %v6606_v63 = vsub.s32 1, %v6595_v57 }
 0x1b3   : > { %1289 = vmatprep.mubr.bf16.mxu0 %v609_v0 }
 0x1b4   : > { %7353 = vst [vmem:[#allocation25_spill] sm:$0xff] %v6606_v63  ;;  %v6620_v5 = vrot.slane %v1340_v62, %v6606_v63  ;;  %v5446_v62 = vld [vmem:[#allocation10 + $0x2c] ss:$16 sps:$4 sm:$0xff]  }
 0x1ba   : > { %1290 = vmatmul.mubr.bf16.gmra.mrb[44].mxu0 %v608_v7  ;;  %v5489_v7 = vld [vmem:[#allocation11 + $0x20] ss:$8 sps:$4 sm:$0xff]  }
 0x1bb   : > { %1299 = vmatprep.mubr.bf16.mxu0 %v611_v8  ;;  %v5491_v8 = vld [vmem:[#allocation11 + $0x24] ss:$8 sps:$4 sm:$0xff]  }
 0x1bc   : > { %3280 = vmatprep.subr.bf16.mxu0 %v5491_v8 }
 0x1bd   : > { %3281 = vmatpush1.bf16.msra.mxu0 %v5489_v7 }
 0x1c2   : > { %1300 = vmatmul.mubr.bf16.gmra.mrb[48].mxu0 %v610_v17 }
 0x1c3   : > { %1309 = vmatprep.mubr.bf16.mxu0 %v613_v18 }
 0x1ca   : > { %1310 = vmatmul.mubr.bf16.gmra.mrb[52].mxu0 %v612_v24 }
 0x1cb   : > { %1319 = vmatprep.mubr.bf16.mxu0 %v615_v25  ;;  %v5497_v25 = vld [vmem:[#allocation11 + $0x34] ss:$8 sps:$4 sm:$0xff]  }
 0x1cc   : > { %3282 = vmatprep.subr.bf16.mxu0 %v5497_v25  ;;  %v5504_v25 = vld [vmem:[#allocation11 + $0x50] ss:$8 sps:$4 sm:$0xff]  }
 0x1cd   : > { %3283 = vmatpush1.bf16.msra.mxu0 %v5495_v23 }
 0x1ce   : > { %3284 = vmatprep.subr.bf16.mxu0 %v5503_v32 }
 0x1d1   : > { %3285 = vmatpush1.bf16.msra.mxu0 %v5501_v53  ;;  %v5447_v53 = vld [vmem:[#allocation10 + $0x48] ss:$16 sps:$4 sm:$0xff]  }
 0x1d2   : > { %1320 = vmatmul.mubr.bf16.gmra.mrb[56].mxu0 %v614_v30 }
 0x1d3   : > { %1329 = vmatprep.mubr.bf16.mxu0 %v617_v31 }
 0x1da   : > { %1330 = vmatmul.mubr.bf16.gmra.mrb[60].mxu0 %v616_v34 }
 0x1f5   : > { %v6557_v35 = vpop.f32.mrb[0].mxu1 }
 0x1f6   : > { %v6559_v36 = vpop.f32.mrb[1].mxu1 }
 0x1f7   : > { %v6561_v37 = vpop.f32.mrb[2].mxu1 }
 0x1f8   : > { %v6563_v38 = vpop.f32.mrb[3].mxu1 }
 0x1fd   : > { %v6565_v39 = vpop.f32.mrb[4].mxu1 }
 0x1fe   : > { %v6567_v40 = vpop.f32.mrb[5].mxu1 }
 0x1ff   : > { %v6569_v41 = vpop.f32.mrb[6].mxu1 }
 0x200   : > { %v6571_v42 = vpop.f32.mrb[7].mxu1 }
 0x205   : > { %v6573_v43 = vpop.f32.mrb[8].mxu1 }
 0x206   : > { %v6575_v44 = vpop.f32.mrb[9].mxu1 }
 0x207   : > { %v6577_v45 = vpop.f32.mrb[10].mxu1 }
 0x208   : > { %v6579_v46 = vpop.f32.mrb[11].mxu1 }
 0x20d   : > { %v6581_v47 = vpop.f32.mrb[12].mxu1 }
 0x20e   : > { %v6583_v48 = vpop.f32.mrb[13].mxu1 }
 0x20f   : > { %v6585_v49 = vpop.f32.mrb[14].mxu1 }
 0x210   : > { %v6587_v50 = vpop.f32.mrb[15].mxu1 }
 0x215   : > { %v6589_v54 = vpop.f32.mrb[16].mxu1 }
 0x216   : > { %v6591_v55 = vpop.f32.mrb[17].mxu1 }
 0x217   : > { %v6593_v56 = vpop.f32.mrb[18].mxu1 }
 0x218   : > { %v6597_v58 = vpop.f32.mrb[19].mxu1 }
 0x21d   : > { %v6608_v0 = vpop.f32.mrb[20].mxu1 }
 0x21e   : > { %v6610_v1 = vpop.f32.mrb[21].mxu1 }
 0x21f   : > { %v6612_v2 = vpop.f32.mrb[22].mxu1 }
 0x220   : > { %v6617_v4 = vpop.f32.mrb[23].mxu1 }
 0x225   : > { %v6624_v13 = vpop.f32.mrb[24].mxu1 }
 0x226   : > { %v6627_v17 = vpop.f32.mrb[25].mxu1 }
 0x227   : > { %v6630_v20 = vpop.f32.mrb[26].mxu1 }
 0x228   : > { %v6632_v22 = vpop.f32.mrb[27].mxu1 }
 0x235   : > { %v1181_v6 = vpop.f32.mrb[0].mxu0 }
 0x236   : > { %v1352_v9 = vadd.f32 %v6615_v3, %v1181_v6  ;;  %v1183_v10 = vpop.f32.mrb[1].mxu0  ;;  %v6640_v6 = vpop.f32.mrb[28].mxu1 }
 0x237   : > { %v1353_v11 = vadd.f32 %v6620_v5, %v1183_v10  ;;  %v1185_v12 = vpop.f32.mrb[2].mxu0  ;;  %v6644_v10 = vpop.f32.mrb[29].mxu1 }
 0x238   : > { %v1480_v14 = vmul.f32 0.01, %v1352_v9  ;;  %v1354_v15 = vadd.f32 %v6615_v3, %v1185_v12  ;;  %v1187_v16 = vpop.f32.mrb[3].mxu0  ;;  %vm1416_vm0 = vcmp.ge.f32.partialorder %v1352_v9, 0.0 }
 0x239   : > { %vm1417_vm1 = vcmp.ge.f32.partialorder %v1353_v11, 0.0  ;;  %v1481_v18 = vmul.f32 0.01, %v1353_v11  ;;  %v1355_v19 = vadd.f32 %v6620_v5, %v1187_v16 }
 0x23a   : > { %vm1418_vm2 = vcmp.ge.f32.partialorder %v1354_v15, 0.0  ;;  %v1482_v21 = vmul.f32 0.01, %v1354_v15  ;;  %v1544_v26 = vsel %vm1416_vm0, %v1352_v9, %v1480_v14  ;;  %v5444_v14 = vld [vmem:[#allocation10 + $0x28] ss:$16 sps:$4 sm:$0xff]  }
 0x23b   : > { %vm1419_vm3 = vcmp.ge.f32.partialorder %v1355_v19, 0.0  ;;  %v1483_v24 = vmul.f32 0.01, %v1355_v19  ;;  %v1545_v30 = vsel %vm1417_vm1, %v1353_v11, %v1481_v18 }
 0x23c   : > { %v1546_v27 = vsel %vm1418_vm2, %v1354_v15, %v1482_v21  ;;  %v6648_v15 = vpop.f32.mrb[30].mxu1  ;;  %v5449_v21 = vld [vmem:[#allocation10 + $0x4c] ss:$16 sps:$4 sm:$0xff]  }
 0x23d   : > { %v6634_v28 = vpack.c.bf16 %v1546_v27, %v1544_v26  ;;  %v1191_v29 = vpop.f32.mrb[4].mxu0  ;;  %v1547_v31 = vsel %vm1419_vm3, %v1355_v19, %v1483_v24  ;;  %v6650_v18 = vpop.f32.mrb[31].mxu1  ;;  %v5506_v26 = vld [vmem:[#allocation11 + $0x54] ss:$8 sps:$4 sm:$0xff]  }
 0x23e   : > { %v1356_v33 = vadd.f32 %v6615_v3, %v1191_v29  ;;  %v1193_v34 = vpop.f32.mrb[5].mxu0  ;;  %v6637_v51 = vpack.c.bf16 %v1547_v31, %v1545_v30  ;;  %3286 = vmatprep.subr.bf16.mxu0 %v5506_v26 }
 0x23f   : > { %v1357_v59 = vadd.f32 %v6620_v5, %v1193_v34  ;;  %v1195_v60 = vpop.f32.mrb[6].mxu0  ;;  %3287 = vmatpush1.bf16.msra.mxu0 %v5504_v25  ;;  %v5509_v25 = vld [vmem:[#allocation11 + $0x64] ss:$8 sps:$4 sm:$0xff]  }
 0x240   : > { %v1484_v7 = vmul.f32 0.01, %v1356_v33  ;;  %v1358_v8 = vadd.f32 %v6615_v3, %v1195_v60  ;;  %v1197_v9 = vpop.f32.mrb[7].mxu0  ;;  %2078 = vmatprep.mubr.bf16.mxu1 %v6637_v51  ;;  %vm1420_vm4 = vcmp.ge.f32.partialorder %v1356_v33, 0.0  ;;  %3288 = vmatprep.subr.bf16.mxu0 %v5509_v25 }
 0x241   : > { %v1485_v11 = vmul.f32 0.01, %v1357_v59  ;;  %v1359_v12 = vadd.f32 %v6620_v5, %v1197_v9  ;;  %2079 = vmatmul.mubr.bf16.vlgmr.msra.gmra.mrb[32].mxu1 %v6634_v28  ;;  %vm1421_vm5 = vcmp.ge.f32.partialorder %v1357_v59, 0.0 }
 0x242   : > { %vm1422_vm6 = vcmp.ge.f32.partialorder %v1358_v8, 0.0  ;;  %v1486_v16 = vmul.f32 0.01, %v1358_v8  ;;  %2240 = vmatpush1.bf16.msra.mxu1 %v5441_v52  ;;  %v1548_v23 = vsel %vm1420_vm4, %v1356_v33, %v1484_v7  ;;  %v5452_v33 = vld [vmem:[#allocation10 + $0x6c] ss:$16 sps:$4 sm:$0xff]  }
 0x243   : > { %vm1423_vm7 = vcmp.ge.f32.partialorder %v1359_v12, 0.0  ;;  %v1487_v19 = vmul.f32 0.01, %v1359_v12  ;;  %2241 = vmatprep.subr.bf16.mxu1 %v5446_v62  ;;  %v1549_v29 = vsel %vm1421_vm5, %v1357_v59, %v1485_v11 }
 0x244   : > { %v1550_v24 = vsel %vm1422_vm6, %v1358_v8, %v1486_v16 }
 0x245   : > { %v1201_v27 = vpop.f32.mrb[8].mxu0  ;;  %v1551_v30 = vsel %vm1423_vm7, %v1359_v12, %v1487_v19  ;;  %v6653_v31 = vpack.c.bf16 %v1550_v24, %v1548_v23  ;;  %v5455_v19 = vld [vmem:[#allocation10 + $0x8c] ss:$16 sps:$4 sm:$0xff]   ;;  %v5507_v24 = vld [vmem:[#allocation11 + $0x60] ss:$8 sps:$4 sm:$0xff]  }
 0x246   : > { %v1360_v32 = vadd.f32 %v6615_v3, %v1201_v27  ;;  %v1203_v34 = vpop.f32.mrb[9].mxu0  ;;  %v6656_v52 = vpack.c.bf16 %v1551_v30, %v1549_v29  ;;  %2242 = vmatpush1.bf16.msra.mxu1 %v5444_v14  ;;  %v5450_v14 = vld [vmem:[#allocation10 + $0x68] ss:$16 sps:$4 sm:$0xff]   ;;  %3289 = vmatpush1.bf16.msra.mxu0 %v5507_v24  ;;  %v5512_v24 = vld [vmem:[#allocation11 + $0x74] ss:$8 sps:$4 sm:$0xff]  }
 0x247   : > { %v1361_v60 = vadd.f32 %v6620_v5, %v1203_v34  ;;  %v1205_v62 = vpop.f32.mrb[10].mxu0  ;;  %2243 = vmatprep.subr.bf16.mxu1 %v5449_v21  ;;  %3290 = vmatprep.subr.bf16.mxu0 %v5512_v24 }
 0x248   : > { %v1488_v7 = vmul.f32 0.01, %v1360_v32  ;;  %v1362_v59 = vadd.f32 %v6615_v3, %v1205_v62  ;;  %v1207_v8 = vpop.f32.mrb[11].mxu0  ;;  %2088 = vmatprep.mubr.bf16.mxu1 %v6656_v52  ;;  %vm1424_vm8 = vcmp.ge.f32.partialorder %v1360_v32, 0.0 }
 0x249   : > { %v1489_v9 = vmul.f32 0.01, %v1361_v60  ;;  %v1363_v11 = vadd.f32 %v6620_v5, %v1207_v8  ;;  %2089 = vmatmul.mubr.bf16.gmra.mrb[36].mxu1 %v6653_v31  ;;  %vm1425_vm9 = vcmp.ge.f32.partialorder %v1361_v60, 0.0 }
 0x24a   : > { %vm1426_vm10 = vcmp.ge.f32.partialorder %v1362_v59, 0.0  ;;  %v1490_v12 = vmul.f32 0.01, %v1362_v59  ;;  %2244 = vmatpush1.bf16.msra.mxu1 %v5447_v53  ;;  %v1552_v21 = vsel %vm1424_vm8, %v1360_v32, %v1488_v7  ;;  %v5453_v53 = vld [vmem:[#allocation10 + $0x88] ss:$16 sps:$4 sm:$0xff]  }
 0x24b   : > { %vm1427_vm11 = vcmp.ge.f32.partialorder %v1363_v11, 0.0  ;;  %v1491_v16 = vmul.f32 0.01, %v1363_v11  ;;  %2245 = vmatprep.subr.bf16.mxu1 %v5452_v33  ;;  %v1553_v27 = vsel %vm1425_vm9, %v1361_v60, %v1489_v9  ;;  %v5458_v32 = vld [vmem:[#allocation10 + $0xac] ss:$16 sps:$4 sm:$0xff]  }
 0x24c   : > { %v1554_v23 = vsel %vm1426_vm10, %v1362_v59, %v1490_v12 }
 0x24d   : > { %v1211_v26 = vpop.f32.mrb[12].mxu0  ;;  %v1555_v29 = vsel %vm1427_vm11, %v1363_v11, %v1491_v16  ;;  %v6663_v30 = vpack.c.bf16 %v1554_v23, %v1552_v21  ;;  %v5510_v23 = vld [vmem:[#allocation11 + $0x70] ss:$8 sps:$4 sm:$0xff]  }
 0x24e   : > { %v1364_v34 = vadd.f32 %v6615_v3, %v1211_v26  ;;  %v1213_v62 = vpop.f32.mrb[13].mxu0  ;;  %v6666_v8 = vpack.c.bf16 %v1555_v29, %v1553_v27  ;;  %2246 = vmatpush1.bf16.msra.mxu1 %v5450_v14  ;;  %v5456_v14 = vld [vmem:[#allocation10 + $0xa8] ss:$16 sps:$4 sm:$0xff]   ;;  %3291 = vmatpush1.bf16.msra.mxu0 %v5510_v23  ;;  %v5515_v23 = vld [vmem:[#allocation11 + $0x84] ss:$8 sps:$4 sm:$0xff]  }
 0x24f   : > { %v1365_v33 = vadd.f32 %v6620_v5, %v1213_v62  ;;  %v1215_v57 = vpop.f32.mrb[14].mxu0  ;;  %2247 = vmatprep.subr.bf16.mxu1 %v5455_v19  ;;  %v5461_v19 = vld [vmem:[#allocation10 + $0xcc] ss:$16 sps:$4 sm:$0xff]   ;;  %3292 = vmatprep.subr.bf16.mxu0 %v5515_v23 }
 0x250   : > { %v1492_v7 = vmul.f32 0.01, %v1364_v34  ;;  %v1366_v60 = vadd.f32 %v6615_v3, %v1215_v57  ;;  %v1217_v59 = vpop.f32.mrb[15].mxu0  ;;  %2098 = vmatprep.mubr.bf16.mxu1 %v6666_v8  ;;  %vm1428_vm12 = vcmp.ge.f32.partialorder %v1364_v34, 0.0 }
 0x251   : > { %v1493_v9 = vmul.f32 0.01, %v1365_v33  ;;  %v1367_v11 = vadd.f32 %v6620_v5, %v1217_v59  ;;  %2099 = vmatmul.mubr.bf16.gmra.mrb[40].mxu1 %v6663_v30  ;;  %vm1429_vm13 = vcmp.ge.f32.partialorder %v1365_v33, 0.0 }
 0x252   : > { %vm1430_vm14 = vcmp.ge.f32.partialorder %v1366_v60, 0.0  ;;  %v1494_v12 = vmul.f32 0.01, %v1366_v60  ;;  %2248 = vmatpush1.bf16.msra.mxu1 %v5453_v53  ;;  %v1556_v21 = vsel %vm1428_vm12, %v1364_v34, %v1492_v7  ;;  %v5459_v53 = vld [vmem:[#allocation10 + $0xc8] ss:$16 sps:$4 sm:$0xff]  }
 0x253   : > { %vm1431_vm15 = vcmp.ge.f32.partialorder %v1367_v11, 0.0  ;;  %v1495_v16 = vmul.f32 0.01, %v1367_v11  ;;  %2249 = vmatprep.subr.bf16.mxu1 %v5458_v32  ;;  %v1557_v26 = vsel %vm1429_vm13, %v1365_v33, %v1493_v9  ;;  %v5464_v34 = vld [vmem:[#allocation10 + $0xec] ss:$16 sps:$4 sm:$0xff]  }
 0x254   : > { %v1558_v57 = vsel %vm1430_vm14, %v1366_v60, %v1494_v12 }
 0x255   : > { %v1221_v25 = vpop.f32.mrb[16].mxu0  ;;  %v1559_v27 = vsel %vm1431_vm15, %v1367_v11, %v1495_v16  ;;  %v6673_v29 = vpack.c.bf16 %v1558_v57, %v1556_v21  ;;  %v5513_v57 = vld [vmem:[#allocation11 + $0x80] ss:$8 sps:$4 sm:$0xff]  }
 0x256   : > { %v1368_v62 = vadd.f32 %v6615_v3, %v1221_v25  ;;  %v1223_v59 = vpop.f32.mrb[17].mxu0  ;;  %v6676_v63 = vpack.c.bf16 %v1559_v27, %v1557_v26  ;;  %2250 = vmatpush1.bf16.msra.mxu1 %v5456_v14  ;;  %v5462_v14 = vld [vmem:[#allocation10 + $0xe8] ss:$16 sps:$4 sm:$0xff]   ;;  %3293 = vmatpush1.bf16.msra.mxu0 %v5513_v57  ;;  %v5518_v57 = vld [vmem:[#allocation11 + $0x94] ss:$8 sps:$4 sm:$0xff]  }
 0x257   : > { %7354 = vst [vmem:[#allocation26_spill] sm:$0xff] %v6673_v29  ;;  %v1369_v32 = vadd.f32 %v6620_v5, %v1223_v59  ;;  %v1225_v61 = vpop.f32.mrb[18].mxu0  ;;  %2251 = vmatprep.subr.bf16.mxu1 %v5461_v19  ;;  %v5467_v19 = vld [vmem:[#allocation10 + $0x10c] ss:$16 sps:$4 sm:$0xff]   ;;  %3294 = vmatprep.subr.bf16.mxu0 %v5518_v57 }
 0x258   : > { %7355 = vst [vmem:[#allocation27_spill] sm:$0xff] %v6676_v63  ;;  %v1496_v7 = vmul.f32 0.01, %v1368_v62  ;;  %v1370_v33 = vadd.f32 %v6615_v3, %v1225_v61  ;;  %v1227_v60 = vpop.f32.mrb[19].mxu0  ;;  %2108 = vmatprep.mubr.bf16.mxu1 %v6676_v63  ;;  %vm1432_vm0 = vcmp.ge.f32.partialorder %v1368_v62, 0.0 }
 0x259   : > { %v1497_v9 = vmul.f32 0.01, %v1369_v32  ;;  %v1371_v11 = vadd.f32 %v6620_v5, %v1227_v60  ;;  %2109 = vmatmul.mubr.bf16.gmra.mrb[44].mxu1 %v6673_v29  ;;  %vm1433_vm1 = vcmp.ge.f32.partialorder %v1369_v32, 0.0 }
 0x25a   : > { %vm1434_vm2 = vcmp.ge.f32.partialorder %v1370_v33, 0.0  ;;  %v1498_v12 = vmul.f32 0.01, %v1370_v33  ;;  %2252 = vmatpush1.bf16.msra.mxu1 %v5459_v53  ;;  %v1560_v21 = vsel %vm1432_vm0, %v1368_v62, %v1496_v7  ;;  %v5465_v53 = vld [vmem:[#allocation10 + $0x108] ss:$16 sps:$4 sm:$0xff]  }
 0x25b   : > { %vm1435_vm3 = vcmp.ge.f32.partialorder %v1371_v11, 0.0  ;;  %v1499_v16 = vmul.f32 0.01, %v1371_v11  ;;  %2253 = vmatprep.subr.bf16.mxu1 %v5464_v34  ;;  %v1561_v25 = vsel %vm1433_vm1, %v1369_v32, %v1497_v9  ;;  %v5470_v62 = vld [vmem:[#allocation10 + $0x12c] ss:$16 sps:$4 sm:$0xff]  }
 0x25c   : > { %v1562_v61 = vsel %vm1434_vm2, %v1370_v33, %v1498_v12 }
 0x25d   : > { %v1231_v24 = vpop.f32.mrb[20].mxu0  ;;  %v1563_v26 = vsel %vm1435_vm3, %v1371_v11, %v1499_v16  ;;  %v6683_v27 = vpack.c.bf16 %v1562_v61, %v1560_v21  ;;  %v5516_v61 = vld [vmem:[#allocation11 + $0x90] ss:$8 sps:$4 sm:$0xff]  }
 0x25e   : > { %v1372_v59 = vadd.f32 %v6615_v3, %v1231_v24  ;;  %v1233_v60 = vpop.f32.mrb[21].mxu0  ;;  %v6686_v29 = vpack.c.bf16 %v1563_v26, %v1561_v25  ;;  %2254 = vmatpush1.bf16.msra.mxu1 %v5462_v14  ;;  %v5468_v14 = vld [vmem:[#allocation10 + $0x128] ss:$16 sps:$4 sm:$0xff]   ;;  %3295 = vmatpush1.bf16.msra.mxu0 %v5516_v61  ;;  %v5521_v61 = vld [vmem:[#allocation11 + $0xa4] ss:$8 sps:$4 sm:$0xff]  }
 0x25f   : > { %7356 = vst [vmem:[#allocation28_spill] sm:$0xff] %v6683_v27  ;;  %v1373_v34 = vadd.f32 %v6620_v5, %v1233_v60  ;;  %v1235_v63 = vpop.f32.mrb[22].mxu0  ;;  %2255 = vmatprep.subr.bf16.mxu1 %v5467_v19  ;;  %v5473_v19 = vld [vmem:[#allocation10 + $0x14c] ss:$16 sps:$4 sm:$0xff]   ;;  %3296 = vmatprep.subr.bf16.mxu0 %v5521_v61 }
 0x260   : > { %7357 = vst [vmem:[#allocation29_spill] sm:$0xff] %v6686_v29  ;;  %v1500_v7 = vmul.f32 0.01, %v1372_v59  ;;  %v1374_v32 = vadd.f32 %v6615_v3, %v1235_v63  ;;  %v1237_v33 = vpop.f32.mrb[23].mxu0  ;;  %2118 = vmatprep.mubr.bf16.mxu1 %v6686_v29  ;;  %vm1436_vm4 = vcmp.ge.f32.partialorder %v1372_v59, 0.0 }
 0x261   : > { %v1501_v9 = vmul.f32 0.01, %v1373_v34  ;;  %v1375_v11 = vadd.f32 %v6620_v5, %v1237_v33  ;;  %2119 = vmatmul.mubr.bf16.gmra.mrb[48].mxu1 %v6683_v27  ;;  %vm1437_vm5 = vcmp.ge.f32.partialorder %v1373_v34, 0.0 }
 0x262   : > { %vm1438_vm6 = vcmp.ge.f32.partialorder %v1374_v32, 0.0  ;;  %v1502_v12 = vmul.f32 0.01, %v1374_v32  ;;  %2256 = vmatpush1.bf16.msra.mxu1 %v5465_v53  ;;  %v1564_v21 = vsel %vm1436_vm4, %v1372_v59, %v1500_v7  ;;  %v5471_v53 = vld [vmem:[#allocation10 + $0x148] ss:$16 sps:$4 sm:$0xff]  }
 0x263   : > { %vm1439_vm7 = vcmp.ge.f32.partialorder %v1375_v11, 0.0  ;;  %v1503_v16 = vmul.f32 0.01, %v1375_v11  ;;  %2257 = vmatprep.subr.bf16.mxu1 %v5470_v62  ;;  %v1565_v24 = vsel %vm1437_vm5, %v1373_v34, %v1501_v9  ;;  %v5476_v59 = vld [vmem:[#allocation10 + $0x16c] ss:$16 sps:$4 sm:$0xff]  }
 0x264   : > { %v1566_v63 = vsel %vm1438_vm6, %v1374_v32, %v1502_v12 }
 0x265   : > { %v1241_v23 = vpop.f32.mrb[24].mxu0  ;;  %v1567_v25 = vsel %vm1439_vm7, %v1375_v11, %v1503_v16  ;;  %v6693_v26 = vpack.c.bf16 %v1566_v63, %v1564_v21  ;;  %v5519_v63 = vld [vmem:[#allocation11 + $0xa0] ss:$8 sps:$4 sm:$0xff]  }
 0x266   : > { %v1376_v60 = vadd.f32 %v6615_v3, %v1241_v23  ;;  %v1243_v33 = vpop.f32.mrb[25].mxu0  ;;  %v6696_v27 = vpack.c.bf16 %v1567_v25, %v1565_v24  ;;  %2258 = vmatpush1.bf16.msra.mxu1 %v5468_v14  ;;  %v5474_v14 = vld [vmem:[#allocation10 + $0x168] ss:$16 sps:$4 sm:$0xff]   ;;  %3297 = vmatpush1.bf16.msra.mxu0 %v5519_v63  ;;  %v5524_v63 = vld [vmem:[#allocation11 + $0xb4] ss:$8 sps:$4 sm:$0xff]  }
 0x267   : > { %7358 = vst [vmem:[#allocation30_spill] sm:$0xff] %v6693_v26  ;;  %v1377_v62 = vadd.f32 %v6620_v5, %v1243_v33  ;;  %v1245_v29 = vpop.f32.mrb[26].mxu0  ;;  %2259 = vmatprep.subr.bf16.mxu1 %v5473_v19  ;;  %v5482_v19 = vld [vmem:[#allocation10 + $0x18c] ss:$16 sps:$4 sm:$0xff]   ;;  %3298 = vmatprep.subr.bf16.mxu0 %v5524_v63 }
 0x268   : > { %7359 = vst [vmem:[#allocation31_spill] sm:$0xff] %v6696_v27  ;;  %v1504_v7 = vmul.f32 0.01, %v1376_v60  ;;  %v1378_v34 = vadd.f32 %v6615_v3, %v1245_v29  ;;  %v1247_v32 = vpop.f32.mrb[27].mxu0  ;;  %2128 = vmatprep.mubr.bf16.mxu1 %v6696_v27  ;;  %vm1440_vm8 = vcmp.ge.f32.partialorder %v1376_v60, 0.0 }
 0x269   : > { %v1505_v9 = vmul.f32 0.01, %v1377_v62  ;;  %v1379_v11 = vadd.f32 %v6620_v5, %v1247_v32  ;;  %2129 = vmatmul.mubr.bf16.gmra.mrb[52].mxu1 %v6693_v26  ;;  %vm1441_vm9 = vcmp.ge.f32.partialorder %v1377_v62, 0.0 }
 0x26a   : > { %vm1442_vm10 = vcmp.ge.f32.partialorder %v1378_v34, 0.0  ;;  %v1506_v12 = vmul.f32 0.01, %v1378_v34  ;;  %2260 = vmatpush1.bf16.msra.mxu1 %v5471_v53  ;;  %v1568_v21 = vsel %vm1440_vm8, %v1376_v60, %v1504_v7  ;;  %v5480_v53 = vld [vmem:[#allocation10 + $0x188] ss:$16 sps:$4 sm:$0xff]  }
 0x26b   : > { %vm1443_vm11 = vcmp.ge.f32.partialorder %v1379_v11, 0.0  ;;  %v1507_v16 = vmul.f32 0.01, %v1379_v11  ;;  %2261 = vmatprep.subr.bf16.mxu1 %v5476_v59  ;;  %v1569_v23 = vsel %vm1441_vm9, %v1377_v62, %v1505_v9  ;;  %v5488_v60 = vld [vmem:[#allocation10 + $0x1ac] ss:$16 sps:$4 sm:$0xff]  }
 0x26c   : > { %v1570_v29 = vsel %vm1442_vm10, %v1378_v34, %v1506_v12 }
 0x26d   : > { %v1251_v57 = vpop.f32.mrb[28].mxu0  ;;  %v1571_v24 = vsel %vm1443_vm11, %v1379_v11, %v1507_v16  ;;  %v6703_v25 = vpack.c.bf16 %v1570_v29, %v1568_v21  ;;  %v5522_v29 = vld [vmem:[#allocation11 + $0xb0] ss:$8 sps:$4 sm:$0xff]  }
 0x26e   : > { %v1380_v33 = vadd.f32 %v6615_v3, %v1251_v57  ;;  %v1253_v32 = vpop.f32.mrb[29].mxu0  ;;  %v6706_v26 = vpack.c.bf16 %v1571_v24, %v1569_v23  ;;  %2262 = vmatpush1.bf16.msra.mxu1 %v5474_v14  ;;  %v5486_v14 = vld [vmem:[#allocation10 + $0x1a8] ss:$16 sps:$4 sm:$0xff]   ;;  %3299 = vmatpush1.bf16.msra.mxu0 %v5522_v29 }
 0x26f   : > { %7360 = vst [vmem:[#allocation32_spill] sm:$0xff] %v6703_v25  ;;  %v1381_v59 = vadd.f32 %v6620_v5, %v1253_v32  ;;  %v1255_v27 = vpop.f32.mrb[30].mxu0  ;;  %2263 = vmatprep.subr.bf16.mxu1 %v5482_v19  ;;  %v5494_v19 = vld [vmem:[#allocation10 + $0x1cc] ss:$16 sps:$4 sm:$0xff]  }
 0x270   : > { %7361 = vst [vmem:[#allocation33_spill] sm:$0xff] %v6706_v26  ;;  %v1508_v7 = vmul.f32 0.01, %v1380_v33  ;;  %v1382_v62 = vadd.f32 %v6615_v3, %v1255_v27  ;;  %v1257_v34 = vpop.f32.mrb[31].mxu0  ;;  %2138 = vmatprep.mubr.bf16.mxu1 %v6706_v26  ;;  %vm1444_vm12 = vcmp.ge.f32.partialorder %v1380_v33, 0.0 }
 0x271   : > { %v1509_v9 = vmul.f32 0.01, %v1381_v59  ;;  %v1383_v11 = vadd.f32 %v6620_v5, %v1257_v34  ;;  %2139 = vmatmul.mubr.bf16.gmra.mrb[56].mxu1 %v6703_v25  ;;  %vm1445_vm13 = vcmp.ge.f32.partialorder %v1381_v59, 0.0 }
 0x272   : > { %vm1446_vm14 = vcmp.ge.f32.partialorder %v1382_v62, 0.0  ;;  %v1510_v12 = vmul.f32 0.01, %v1382_v62  ;;  %2264 = vmatpush1.bf16.msra.mxu1 %v5480_v53  ;;  %v1572_v21 = vsel %vm1444_vm12, %v1380_v33, %v1508_v7  ;;  %v5492_v53 = vld [vmem:[#allocation10 + $0x1c8] ss:$16 sps:$4 sm:$0xff]  }
 0x273   : > { %vm1447_vm15 = vcmp.ge.f32.partialorder %v1383_v11, 0.0  ;;  %v1511_v16 = vmul.f32 0.01, %v1383_v11  ;;  %2265 = vmatprep.subr.bf16.mxu1 %v5488_v60  ;;  %v1573_v57 = vsel %vm1445_vm13, %v1381_v59, %v1509_v9  ;;  %v5500_v33 = vld [vmem:[#allocation10 + $0x1ec] ss:$16 sps:$4 sm:$0xff]  }
 0x274   : > { %v1574_v27 = vsel %vm1446_vm14, %v1382_v62, %v1510_v12  ;;  %v5498_v12 = vld [vmem:[#allocation10 + $0x1e8] ss:$16 sps:$4 sm:$0xff]  }
 0x275   : > { %v1261_v61 = vpop.f32.mrb[32].mxu0  ;;  %v1575_v23 = vsel %vm1447_vm15, %v1383_v11, %v1511_v16  ;;  %v6713_v24 = vpack.c.bf16 %v1574_v27, %v1572_v21 }
 0x276   : > { %v1262_v32 = vadd.f32 %v1261_v61, %v6557_v35  ;;  %v1263_v34 = vpop.f32.mrb[33].mxu0  ;;  %v6716_v25 = vpack.c.bf16 %v1575_v23, %v1573_v57  ;;  %2266 = vmatpush1.bf16.msra.mxu1 %v5486_v14 }
 0x277   : > { %v1264_v60 = vadd.f32 %v1263_v34, %v6559_v36  ;;  %v1265_v26 = vpop.f32.mrb[34].mxu0  ;;  %2267 = vmatprep.subr.bf16.mxu1 %v5494_v19 }
 0x278   : > { %v1384_v7 = vadd.f32 %v6615_v3, %v1262_v32  ;;  %v1266_v59 = vadd.f32 %v1265_v26, %v6561_v37  ;;  %v1267_v62 = vpop.f32.mrb[35].mxu0  ;;  %2148 = vmatprep.mubr.bf16.mxu1 %v6716_v25  ;;  %v5525_v26 = vld [vmem:[#allocation11 + $0xc0] ss:$8 sps:$4 sm:$0xff]  }
 0x279   : > { %v1385_v35 = vadd.f32 %v6620_v5, %v1264_v60  ;;  %v1268_v9 = vadd.f32 %v1267_v62, %v6563_v38  ;;  %2149 = vmatmul.mubr.bf16.gmra.mrb[60].mxu1 %v6713_v24  ;;  %v5527_v38 = vld [vmem:[#allocation11 + $0xc4] ss:$8 sps:$4 sm:$0xff]  }
 0x27a   : > { %v1512_v11 = vmul.f32 0.01, %v1384_v7  ;;  %v1386_v36 = vadd.f32 %v6615_v3, %v1266_v59  ;;  %2268 = vmatpush1.bf16.msra.mxu1 %v5492_v53  ;;  %vm1448_vm0 = vcmp.ge.f32.partialorder %v1384_v7, 0.0  ;;  %3300 = vmatprep.subr.bf16.mxu0 %v5527_v38 }
 0x27b   : > { %v1513_v14 = vmul.f32 0.01, %v1385_v35  ;;  %v1387_v16 = vadd.f32 %v6620_v5, %v1268_v9  ;;  %2269 = vmatprep.subr.bf16.mxu1 %v5500_v33  ;;  %vm1449_vm1 = vcmp.ge.f32.partialorder %v1385_v35, 0.0  ;;  %3301 = vmatpush1.bf16.msra.mxu0 %v5525_v26 }
 0x27c   : > { %vm1450_vm2 = vcmp.ge.f32.partialorder %v1386_v36, 0.0  ;;  %v1514_v37 = vmul.f32 0.01, %v1386_v36  ;;  %v1576_v63 = vsel %vm1448_vm0, %v1384_v7, %v1512_v11 }
 0x27d   : > { %vm1451_vm3 = vcmp.ge.f32.partialorder %v1387_v16, 0.0  ;;  %v1515_v19 = vmul.f32 0.01, %v1387_v16  ;;  %v1271_v21 = vpop.f32.mrb[36].mxu0  ;;  %v1577_v32 = vsel %vm1449_vm1, %v1385_v35, %v1513_v14 }
 0x27e   : > { %v1272_v27 = vadd.f32 %v1271_v21, %v6565_v39  ;;  %v1273_v29 = vpop.f32.mrb[37].mxu0  ;;  %v1578_v61 = vsel %vm1450_vm2, %v1386_v36, %v1514_v37  ;;  %2270 = vmatpush1.bf16.msra.mxu1 %v5498_v12  ;;  %v5528_v36 = vld [vmem:[#allocation11 + $0xd0] ss:$8 sps:$4 sm:$0xff]  }
 0x27f   : > { %v1274_v57 = vadd.f32 %v1273_v29, %v6567_v40  ;;  %v1275_v23 = vpop.f32.mrb[38].mxu0  ;;  %v1579_v34 = vsel %vm1451_vm3, %v1387_v16, %v1515_v19  ;;  %v6729_v53 = vpack.c.bf16 %v1578_v61, %v1576_v63  ;;  %v5530_v16 = vld [vmem:[#allocation11 + $0xd4] ss:$8 sps:$4 sm:$0xff]  }
 0x280   : > { %v1388_v60 = vadd.f32 %v6615_v3, %v1272_v27  ;;  %v1276_v33 = vadd.f32 %v1275_v23, %v6569_v41  ;;  %v1277_v59 = vpop.f32.mrb[39].mxu0  ;;  %v6733_v62 = vpack.c.bf16 %v1579_v34, %v1577_v32  ;;  %3302 = vmatprep.subr.bf16.mxu0 %v5530_v16 }
 0x281   : > { %v1389_v39 = vadd.f32 %v6620_v5, %v1274_v57  ;;  %v1278_v7 = vadd.f32 %v1277_v59, %v6571_v42  ;;  %3303 = vmatpush1.bf16.msra.mxu0 %v5528_v36 }
 0x282   : > { %v1516_v9 = vmul.f32 0.01, %v1388_v60  ;;  %v1390_v40 = vadd.f32 %v6615_v3, %v1276_v33  ;;  %2158 = vmatprep.mubr.bf16.mxu1 %v6733_v62  ;;  %vm1452_vm4 = vcmp.ge.f32.partialorder %v1388_v60, 0.0 }
 0x283   : > { %v1517_v35 = vmul.f32 0.01, %v1389_v39  ;;  %v1391_v11 = vadd.f32 %v6620_v5, %v1278_v7  ;;  %2159 = vmatmul.mubr.bf16.gmra.mrb[64].mxu1 %v6729_v53  ;;  %vm1453_vm5 = vcmp.ge.f32.partialorder %v1389_v39, 0.0 }
 0x284   : > { %vm1454_vm6 = vcmp.ge.f32.partialorder %v1390_v40, 0.0  ;;  %v1518_v41 = vmul.f32 0.01, %v1390_v40  ;;  %v1580_v26 = vsel %vm1452_vm4, %v1388_v60, %v1516_v9 }
 0x285   : > { %vm1455_vm7 = vcmp.ge.f32.partialorder %v1391_v11, 0.0  ;;  %v1519_v12 = vmul.f32 0.01, %v1391_v11  ;;  %v1281_v14 = vpop.f32.mrb[40].mxu0  ;;  %v1581_v27 = vsel %vm1453_vm5, %v1389_v39, %v1517_v35  ;;  %v5531_v39 = vld [vmem:[#allocation11 + $0xe0] ss:$8 sps:$4 sm:$0xff]  }
 0x286   : > { %v1282_v42 = vadd.f32 %v1281_v14, %v6573_v43  ;;  %v1283_v37 = vpop.f32.mrb[41].mxu0  ;;  %v1582_v19 = vsel %vm1454_vm6, %v1390_v40, %v1518_v41  ;;  %v5533_v40 = vld [vmem:[#allocation11 + $0xe4] ss:$8 sps:$4 sm:$0xff]  }
 0x287   : > { %v1284_v21 = vadd.f32 %v1283_v37, %v6575_v44  ;;  %v1285_v38 = vpop.f32.mrb[42].mxu0  ;;  %v1583_v29 = vsel %vm1455_vm7, %v1391_v11, %v1519_v12  ;;  %v6743_v63 = vpack.c.bf16 %v1582_v19, %v1580_v26  ;;  %3304 = vmatprep.subr.bf16.mxu0 %v5533_v40 }
 0x288   : > { %v1392_v61 = vadd.f32 %v6615_v3, %v1282_v42  ;;  %v1286_v57 = vadd.f32 %v1285_v38, %v6577_v45  ;;  %v1287_v23 = vpop.f32.mrb[43].mxu0  ;;  %v6747_v32 = vpack.c.bf16 %v1583_v29, %v1581_v27  ;;  %3305 = vmatpush1.bf16.msra.mxu0 %v5531_v39 }
 0x289   : > { %v1393_v43 = vadd.f32 %v6620_v5, %v1284_v21  ;;  %v1288_v34 = vadd.f32 %v1287_v23, %v6579_v46 }
 0x28a   : > { %v1520_v60 = vmul.f32 0.01, %v1392_v61  ;;  %v1394_v44 = vadd.f32 %v6615_v3, %v1286_v57  ;;  %2168 = vmatprep.mubr.bf16.mxu1 %v6747_v32  ;;  %vm1456_vm8 = vcmp.ge.f32.partialorder %v1392_v61, 0.0 }
 0x28b   : > { %v1521_v33 = vmul.f32 0.01, %v1393_v43  ;;  %v1395_v59 = vadd.f32 %v6620_v5, %v1288_v34  ;;  %2169 = vmatmul.mubr.bf16.gmra.mrb[68].mxu1 %v6743_v63  ;;  %vm1457_vm9 = vcmp.ge.f32.partialorder %v1393_v43, 0.0 }
 0x28c   : > { %vm1458_vm10 = vcmp.ge.f32.partialorder %v1394_v44, 0.0  ;;  %v1522_v45 = vmul.f32 0.01, %v1394_v44  ;;  %v1584_v11 = vsel %vm1456_vm8, %v1392_v61, %v1520_v60 }
 0x28d   : > { %vm1459_vm11 = vcmp.ge.f32.partialorder %v1395_v59, 0.0  ;;  %v1523_v7 = vmul.f32 0.01, %v1395_v59  ;;  %v1291_v9 = vpop.f32.mrb[44].mxu0  ;;  %v1585_v14 = vsel %vm1457_vm9, %v1393_v43, %v1521_v33 }
 0x28e   : > { %v1292_v46 = vadd.f32 %v1291_v9, %v6581_v47  ;;  %v1293_v35 = vpop.f32.mrb[45].mxu0  ;;  %v1586_v41 = vsel %vm1458_vm10, %v1394_v44, %v1522_v45 }
 0x28f   : > { %v1294_v36 = vadd.f32 %v1293_v35, %v6583_v48  ;;  %v1295_v12 = vpop.f32.mrb[46].mxu0  ;;  %v1587_v16 = vsel %vm1459_vm11, %v1395_v59, %v1523_v7  ;;  %v6757_v42 = vpack.c.bf16 %v1586_v41, %v1584_v11 }
 0x290   : > { %v1396_v37 = vadd.f32 %v6615_v3, %v1292_v46  ;;  %v1296_v26 = vadd.f32 %v1295_v12, %v6585_v49  ;;  %v1297_v19 = vpop.f32.mrb[47].mxu0  ;;  %v6761_v21 = vpack.c.bf16 %v1587_v16, %v1585_v14 }
 0x291   : > { %v1397_v47 = vadd.f32 %v6620_v5, %v1294_v36  ;;  %v1298_v38 = vadd.f32 %v1297_v19, %v6587_v50 }
 0x292   : > { %v1524_v27 = vmul.f32 0.01, %v1396_v37  ;;  %v1398_v48 = vadd.f32 %v6615_v3, %v1296_v26  ;;  %2178 = vmatprep.mubr.bf16.mxu1 %v6761_v21  ;;  %vm1460_vm12 = vcmp.ge.f32.partialorder %v1396_v37, 0.0 }
 0x293   : > { %v1525_v29 = vmul.f32 0.01, %v1397_v47  ;;  %v1399_v61 = vadd.f32 %v6620_v5, %v1298_v38  ;;  %2179 = vmatmul.mubr.bf16.gmra.mrb[72].mxu1 %v6757_v42  ;;  %vm1461_vm13 = vcmp.ge.f32.partialorder %v1397_v47, 0.0 }
 0x294   : > { %vm1462_vm14 = vcmp.ge.f32.partialorder %v1398_v48, 0.0  ;;  %v1526_v49 = vmul.f32 0.01, %v1398_v48  ;;  %v1588_v34 = vsel %vm1460_vm12, %v1396_v37, %v1524_v27 }
 0x295   : > { %vm1463_vm15 = vcmp.ge.f32.partialorder %v1399_v61, 0.0  ;;  %v1527_v57 = vmul.f32 0.01, %v1399_v61  ;;  %v1301_v23 = vpop.f32.mrb[48].mxu0  ;;  %v1589_v59 = vsel %vm1461_vm13, %v1397_v47, %v1525_v29 }
 0x296   : > { %v1302_v43 = vadd.f32 %v1301_v23, %v6589_v54  ;;  %v1303_v50 = vpop.f32.mrb[49].mxu0  ;;  %v1590_v60 = vsel %vm1462_vm14, %v1398_v48, %v1526_v49 }
 0x297   : > { %v1304_v44 = vadd.f32 %v1303_v50, %v6591_v55  ;;  %v1305_v33 = vpop.f32.mrb[50].mxu0  ;;  %v1591_v45 = vsel %vm1463_vm15, %v1399_v61, %v1527_v57  ;;  %v6771_v39 = vpack.c.bf16 %v1590_v60, %v1588_v34  ;;  %v5536_v55 = vld [vmem:[#allocation11 + $0xf4] ss:$8 sps:$4 sm:$0xff]  }
 0x298   : > { %v1400_v7 = vadd.f32 %v6615_v3, %v1302_v43  ;;  %v1306_v9 = vadd.f32 %v1305_v33, %v6593_v56  ;;  %v1307_v40 = vpop.f32.mrb[51].mxu0  ;;  %v6775_v46 = vpack.c.bf16 %v1591_v45, %v1589_v59  ;;  %v5534_v56 = vld [vmem:[#allocation11 + $0xf0] ss:$8 sps:$4 sm:$0xff]   ;;  %3306 = vmatprep.subr.bf16.mxu0 %v5536_v55  ;;  %v5539_v33 = vld [vmem:[#allocation11 + $0x104] ss:$8 sps:$4 sm:$0xff]  }
 0x299   : > { %v1401_v35 = vadd.f32 %v6620_v5, %v1304_v44  ;;  %v1308_v54 = vadd.f32 %v1307_v40, %v6597_v58  ;;  %3307 = vmatpush1.bf16.msra.mxu0 %v5534_v56 }
 0x29a   : > { %v1528_v11 = vmul.f32 0.01, %v1400_v7  ;;  %v1402_v41 = vadd.f32 %v6615_v3, %v1306_v9  ;;  %2188 = vmatprep.mubr.bf16.mxu1 %v6775_v46  ;;  %vm1464_vm0 = vcmp.ge.f32.partialorder %v1400_v7, 0.0  ;;  %3469 = vmatprep.subr.bf16.mxu0 %v5539_v33 }
 0x29b   : > { %v1529_v36 = vmul.f32 0.01, %v1401_v35  ;;  %v1403_v12 = vadd.f32 %v6620_v5, %v1308_v54  ;;  %2189 = vmatmul.mubr.bf16.gmra.mrb[76].mxu1 %v6771_v39  ;;  %vm1465_vm1 = vcmp.ge.f32.partialorder %v1401_v35, 0.0 }
 0x29c   : > { %vm1466_vm2 = vcmp.ge.f32.partialorder %v1402_v41, 0.0  ;;  %v1530_v14 = vmul.f32 0.01, %v1402_v41  ;;  %v1592_v19 = vsel %vm1464_vm0, %v1400_v7, %v1528_v11 }
 0x29d   : > { %vm1467_vm3 = vcmp.ge.f32.partialorder %v1403_v12, 0.0  ;;  %v1531_v16 = vmul.f32 0.01, %v1403_v12  ;;  %v1311_v58 = vpop.f32.mrb[52].mxu0  ;;  %v1593_v48 = vsel %vm1465_vm1, %v1401_v35, %v1529_v36 }
 0x29e   : > { %v1312_v37 = vadd.f32 %v1311_v58, %v6608_v0  ;;  %v1313_v26 = vpop.f32.mrb[53].mxu0  ;;  %v1594_v47 = vsel %vm1466_vm2, %v1402_v41, %v1530_v14 }
 0x29f   : > { %v1314_v38 = vadd.f32 %v1313_v26, %v6610_v1  ;;  %v1315_v27 = vpop.f32.mrb[54].mxu0  ;;  %v1595_v29 = vsel %vm1467_vm3, %v1403_v12, %v1531_v16  ;;  %v6785_v61 = vpack.c.bf16 %v1594_v47, %v1592_v19 }
 0x2a0   : > { %v1404_v49 = vadd.f32 %v6615_v3, %v1312_v37  ;;  %v1316_v57 = vadd.f32 %v1315_v27, %v6612_v2  ;;  %v1317_v23 = vpop.f32.mrb[55].mxu0  ;;  %v6789_v43 = vpack.c.bf16 %v1595_v29, %v1593_v48 }
 0x2a1   : > { %v1405_v50 = vadd.f32 %v6620_v5, %v1314_v38  ;;  %v1318_v0 = vadd.f32 %v1317_v23, %v6617_v4 }
 0x2a2   : > { %v1532_v34 = vmul.f32 0.01, %v1404_v49  ;;  %v1406_v60 = vadd.f32 %v6615_v3, %v1316_v57  ;;  %2198 = vmatprep.mubr.bf16.mxu1 %v6789_v43  ;;  %vm1468_vm4 = vcmp.ge.f32.partialorder %v1404_v49, 0.0 }
 0x2a3   : > { %v1533_v1 = vmul.f32 0.01, %v1405_v50  ;;  %v1407_v44 = vadd.f32 %v6620_v5, %v1318_v0  ;;  %2199 = vmatmul.mubr.bf16.gmra.mrb[80].mxu1 %v6785_v61  ;;  %vm1469_vm5 = vcmp.ge.f32.partialorder %v1405_v50, 0.0 }
 0x2a4   : > { %vm1470_vm6 = vcmp.ge.f32.partialorder %v1406_v60, 0.0  ;;  %v1534_v2 = vmul.f32 0.01, %v1406_v60  ;;  %v1596_v9 = vsel %vm1468_vm4, %v1404_v49, %v1532_v34 }
 0x2a5   : > { %vm1471_vm7 = vcmp.ge.f32.partialorder %v1407_v44, 0.0  ;;  %v1535_v59 = vmul.f32 0.01, %v1407_v44  ;;  %v1321_v45 = vpop.f32.mrb[56].mxu0  ;;  %v1597_v11 = vsel %vm1469_vm5, %v1405_v50, %v1533_v1 }
 0x2a6   : > { %v1322_v4 = vadd.f32 %v1321_v45, %v6624_v13  ;;  %v1323_v7 = vpop.f32.mrb[57].mxu0  ;;  %v1598_v40 = vsel %vm1470_vm6, %v1406_v60, %v1534_v2 }
 0x2a7   : > { %v1324_v35 = vadd.f32 %v1323_v7, %v6627_v17  ;;  %v1325_v54 = vpop.f32.mrb[58].mxu0  ;;  %v1599_v41 = vsel %vm1471_vm7, %v1407_v44, %v1535_v59  ;;  %v6799_v55 = vpack.c.bf16 %v1598_v40, %v1596_v9 }
 0x2a8   : > { %v1408_v36 = vadd.f32 %v6615_v3, %v1322_v4  ;;  %v1326_v12 = vadd.f32 %v1325_v54, %v6630_v20  ;;  %v1327_v56 = vpop.f32.mrb[59].mxu0  ;;  %v6803_v14 = vpack.c.bf16 %v1599_v41, %v1597_v11  ;;  %v7364_v54 = vld [vmem:[#allocation29_spill] sm:$0xff]  ;;  %v7365_v11 = vld [vmem:[#allocation28_spill] sm:$0xff]  ;;  %v7366_v41 = vld [vmem:[#allocation31_spill] sm:$0xff] }
 0x2a9   : > { %v1409_v16 = vadd.f32 %v6620_v5, %v1324_v35  ;;  %v1328_v13 = vadd.f32 %v1327_v56, %v6632_v22  ;;  %v7363_v35 = vld [vmem:[#allocation26_spill] sm:$0xff] }
 0x2aa   : > { %v1536_v58 = vmul.f32 0.01, %v1408_v36  ;;  %v1410_v37 = vadd.f32 %v6615_v3, %v1326_v12  ;;  %2208 = vmatprep.mubr.bf16.mxu1 %v6803_v14  ;;  %vm1472_vm8 = vcmp.ge.f32.partialorder %v1408_v36, 0.0 }
 0x2ab   : > { %v1537_v17 = vmul.f32 0.01, %v1409_v16  ;;  %v1411_v26 = vadd.f32 %v6620_v5, %v1328_v13  ;;  %2209 = vmatmul.mubr.bf16.gmra.mrb[84].mxu1 %v6799_v55  ;;  %vm1473_vm9 = vcmp.ge.f32.partialorder %v1409_v16, 0.0 }
 0x2ac   : > { %vm1474_vm10 = vcmp.ge.f32.partialorder %v1410_v37, 0.0  ;;  %v1538_v20 = vmul.f32 0.01, %v1410_v37  ;;  %v1600_v27 = vsel %vm1472_vm8, %v1408_v36, %v1536_v58 }
 0x2ad   : > { %vm1475_vm11 = vcmp.ge.f32.partialorder %v1411_v26, 0.0  ;;  %v1539_v19 = vmul.f32 0.01, %v1411_v26  ;;  %v1331_v47 = vpop.f32.mrb[60].mxu0  ;;  %v1601_v57 = vsel %vm1473_vm9, %v1409_v16, %v1537_v17 }
 0x2ae   : > { %v1332_v38 = vadd.f32 %v1331_v47, %v6640_v6  ;;  %v1333_v22 = vpop.f32.mrb[61].mxu0  ;;  %v1602_v48 = vsel %vm1474_vm10, %v1410_v37, %v1538_v20 }
 0x2af   : > { %v1334_v29 = vadd.f32 %v1333_v22, %v6644_v10  ;;  %v1335_v49 = vpop.f32.mrb[62].mxu0  ;;  %v1603_v23 = vsel %vm1475_vm11, %v1411_v26, %v1539_v19  ;;  %v6813_v50 = vpack.c.bf16 %v1602_v48, %v1600_v27  ;;  %v5537_v27 = vld [vmem:[#allocation11 + $0x100] ss:$8 sps:$4 sm:$0xff]  }
 0x2b0   : > { %v1412_v0 = vadd.f32 %v6615_v3, %v1332_v38  ;;  %v1336_v34 = vadd.f32 %v1335_v49, %v6648_v15  ;;  %v1337_v60 = vpop.f32.mrb[63].mxu0  ;;  %v6817_v1 = vpack.c.bf16 %v1603_v23, %v1601_v57  ;;  %v5542_v49 = vld [vmem:[#allocation11 + $0x114] ss:$8 sps:$4 sm:$0xff]  }
 0x2b1   : > { %v1413_v44 = vadd.f32 %v6620_v5, %v1334_v29  ;;  %v1338_v6 = vadd.f32 %v1337_v60, %v6650_v18  ;;  %v5540_v60 = vld [vmem:[#allocation11 + $0x110] ss:$8 sps:$4 sm:$0xff]  }
 0x2b2   : > { %v1540_v33 = vmul.f32 0.01, %v1412_v0  ;;  %v1414_v2 = vadd.f32 %v6615_v3, %v1336_v34  ;;  %2218 = vmatprep.mubr.bf16.mxu1 %v6817_v1  ;;  %vm1476_vm12 = vcmp.ge.f32.partialorder %v1412_v0, 0.0 }
 0x2b3   : > { %v1541_v10 = vmul.f32 0.01, %v1413_v44  ;;  %v1415_v59 = vadd.f32 %v6620_v5, %v1338_v6  ;;  %2219 = vmatmul.mubr.bf16.gmra.mrb[88].mxu1 %v6813_v50  ;;  %vm1477_vm13 = vcmp.ge.f32.partialorder %v1413_v44, 0.0  ;;  %v7362_v5 = vld [vmem:[#allocation27_spill] sm:$0xff] }
 0x2b4   : > { %vm1478_vm14 = vcmp.ge.f32.partialorder %v1414_v2, 0.0  ;;  %v1542_v15 = vmul.f32 0.01, %v1414_v2  ;;  %v1604_v4 = vsel %vm1476_vm12, %v1412_v0, %v1540_v33  ;;  %v5545_v6 = vld [vmem:[#allocation11 + $0x124] ss:$8 sps:$4 sm:$0xff]  }
 0x2b5   : > { %vm1479_vm15 = vcmp.ge.f32.partialorder %v1415_v59, 0.0  ;;  %v1543_v45 = vmul.f32 0.01, %v1415_v59  ;;  %v1605_v9 = vsel %vm1477_vm13, %v1413_v44, %v1541_v10 }
 0x2b6   : > { %v1606_v7 = vsel %vm1478_vm14, %v1414_v2, %v1542_v15 }
 0x2b7   : > { %v1607_v18 = vsel %vm1479_vm15, %v1415_v59, %v1543_v45  ;;  %v6825_v40 = vpack.c.bf16 %v1606_v7, %v1604_v4 }
 0x2b8   : > { %v6827_v3 = vpack.c.bf16 %v1607_v18, %v1605_v9  ;;  %v5543_v18 = vld [vmem:[#allocation11 + $0x120] ss:$8 sps:$4 sm:$0xff]  }
 0x2ba   : > { %2228 = vmatprep.mubr.bf16.mxu1 %v6827_v3 }
 0x2bb   : > { %2229 = vmatmul.mubr.bf16.gmra.mrb[92].mxu1 %v6825_v40 }
 0x2bc   : > { %2271 = vmatprep.mubr.bf16.mxu1 %v6637_v51  ;;  %v7367_v51 = vld [vmem:[#allocation30_spill] sm:$0xff] }
 0x2c3   : > { %2272 = vmatmul.mubr.bf16.vlgmr.msra.gmra.mrb[96].mxu1 %v6634_v28  ;;  %v7368_v28 = vld [vmem:[#allocation33_spill] sm:$0xff] }
 0x2c4   : > { %2281 = vmatprep.mubr.bf16.mxu1 %v6656_v52  ;;  %v7369_v52 = vld [vmem:[#allocation32_spill] sm:$0xff] }
 0x2cb   : > { %2282 = vmatmul.mubr.bf16.gmra.mrb[100].mxu1 %v6653_v31  ;;  %v6855_v31 = vld [vmem:[%s7283_s6] sm:$0xf] }
 0x2cc   : > { %2291 = vmatprep.mubr.bf16.mxu1 %v6666_v8 }
 0x2d3   : > { %2292 = vmatmul.mubr.bf16.gmra.mrb[104].mxu1 %v6663_v30  ;;  %v7370_v30 = vld [vmem:[#allocation24_spill] sm:$0xff] }
 0x2d4   : > { %2301 = vmatprep.mubr.bf16.mxu1 %v7362_v5  ;;  %v6859_v8 = vrot.slane %v6855_v31, %v7370_v30 }
 0x2db   : > { %2302 = vmatmul.mubr.bf16.gmra.mrb[108].mxu1 %v7363_v35 }
 0x2dc   : > { %2311 = vmatprep.mubr.bf16.mxu1 %v7364_v54  ;;  %v5548_v54 = vld [vmem:[#allocation11 + $0x134] ss:$8 sps:$4 sm:$0xff]  }
 0x2e3   : > { %2312 = vmatmul.mubr.bf16.gmra.mrb[112].mxu1 %v7365_v11 }
 0x2e4   : > { %2321 = vmatprep.mubr.bf16.mxu1 %v7366_v41 }
 0x2eb   : > { %2322 = vmatmul.mubr.bf16.gmra.mrb[116].mxu1 %v7367_v51 }
 0x2ec   : > { %2331 = vmatprep.mubr.bf16.mxu1 %v7368_v28 }
 0x2f3   : > { %2332 = vmatmul.mubr.bf16.gmra.mrb[120].mxu1 %v7369_v52  ;;  %v5546_v52 = vld [vmem:[#allocation11 + $0x130] ss:$8 sps:$4 sm:$0xff]  }
 0x2f4   : > { %2341 = vmatprep.mubr.bf16.mxu1 %v6716_v25  ;;  %v7371_v25 = vld [vmem:[#allocation25_spill] sm:$0xff] }
 0x2fb   : > { %2342 = vmatmul.mubr.bf16.gmra.mrb[124].mxu1 %v6713_v24  ;;  %v6863_v24 = vrot.slane %v6855_v31, %v7371_v25 }
 0x2fc   : > { %2351 = vmatprep.mubr.bf16.mxu1 %v6733_v62 }
 0x303   : > { %2352 = vmatmul.mubr.bf16.gmra.mrb[128].mxu1 %v6729_v53 }
 0x304   : > { %2361 = vmatprep.mubr.bf16.mxu1 %v6747_v32 }
 0x30b   : > { %2362 = vmatmul.mubr.bf16.gmra.mrb[132].mxu1 %v6743_v63 }
 0x30c   : > { %2371 = vmatprep.mubr.bf16.mxu1 %v6761_v21 }
 0x313   : > { %2372 = vmatmul.mubr.bf16.gmra.mrb[136].mxu1 %v6757_v42 }
 0x314   : > { %v2080_v53 = vpop.f32.mrb[32].mxu1  ;;  %2381 = vmatprep.mubr.bf16.mxu1 %v6775_v46 }
 0x315   : > { %v2081_v62 = vadd.f32 %v2080_v53, %v6859_v8  ;;  %v2082_v63 = vpop.f32.mrb[33].mxu1 }
 0x316   : > { %v2083_v32 = vadd.f32 %v2082_v63, %v6863_v24  ;;  %v2084_v21 = vpop.f32.mrb[34].mxu1 }
 0x317   : > { %v2560_v36 = vmul.f32 0.01, %v2081_v62  ;;  %v2085_v12 = vadd.f32 %v2084_v21, %v6859_v8  ;;  %v2086_v56 = vpop.f32.mrb[35].mxu1  ;;  %vm2432_vm0 = vcmp.ge.f32.partialorder %v2081_v62, 0.0 }
 0x318   : > { %v2561_v16 = vmul.f32 0.01, %v2083_v32  ;;  %v2087_v13 = vadd.f32 %v2086_v56, %v6863_v24  ;;  %vm2433_vm1 = vcmp.ge.f32.partialorder %v2083_v32, 0.0 }
 0x319   : > { %vm2436_vm2 = vcmp.ge.f32.partialorder %v2085_v12, 0.0  ;;  %v2564_v42 = vmul.f32 0.01, %v2085_v12  ;;  %v2688_v46 = vsel %vm2432_vm0, %v2081_v62, %v2560_v36  ;;  %v5551_v62 = vld [vmem:[#allocation11 + $0x144] ss:$8 sps:$4 sm:$0xff]  }
 0x31a   : > { %vm2437_vm3 = vcmp.ge.f32.partialorder %v2087_v13, 0.0  ;;  %v2565_v58 = vmul.f32 0.01, %v2087_v13  ;;  %v2689_v20 = vsel %vm2433_vm1, %v2083_v32, %v2561_v16 }
 0x31b   : > { %v2692_v37 = vsel %vm2436_vm2, %v2085_v12, %v2564_v42  ;;  %2382 = vmatmul.mubr.bf16.gmra.mrb[140].mxu1 %v6771_v39 }
 0x31c   : > { %v2816_v17 = vpack.c.bf16 %v2692_v37, %v2688_v46  ;;  %v2090_v26 = vpop.f32.mrb[36].mxu1  ;;  %2391 = vmatprep.mubr.bf16.mxu1 %v6789_v43  ;;  %v2693_v19 = vsel %vm2437_vm3, %v2087_v13, %v2565_v58  ;;  %v5549_v58 = vld [vmem:[#allocation11 + $0x140] ss:$8 sps:$4 sm:$0xff]  }
 0x31d   : > { %v2091_v47 = vadd.f32 %v2090_v26, %v6859_v8  ;;  %v2092_v38 = vpop.f32.mrb[37].mxu1  ;;  %v2817_v22 = vpack.c.bf16 %v2693_v19, %v2689_v20 }
 0x31e   : > { %v2093_v48 = vadd.f32 %v2092_v38, %v6863_v24  ;;  %v2094_v29 = vpop.f32.mrb[38].mxu1  ;;  %v5552_v38 = vld [vmem:[#allocation11 + $0x150] ss:$8 sps:$4 sm:$0xff]  }
 0x31f   : > { %v2568_v57 = vmul.f32 0.01, %v2091_v47  ;;  %v2095_v23 = vadd.f32 %v2094_v29, %v6859_v8  ;;  %v2096_v0 = vpop.f32.mrb[39].mxu1  ;;  %3308 = vmatprep.mubr.bf16.mxu0 %v2817_v22  ;;  %vm2440_vm4 = vcmp.ge.f32.partialorder %v2091_v47, 0.0 }
 0x320   : > { %v2569_v39 = vmul.f32 0.01, %v2093_v48  ;;  %v2097_v43 = vadd.f32 %v2096_v0, %v6863_v24  ;;  %3309 = vmatmul.mubr.bf16.vlgmr.msra.gmra.mrb[64].mxu0 %v2816_v17  ;;  %vm2441_vm5 = vcmp.ge.f32.partialorder %v2093_v48, 0.0  ;;  %v5554_v17 = vld [vmem:[#allocation11 + $0x154] ss:$8 sps:$4 sm:$0xff]  }
 0x321   : > { %vm2444_vm6 = vcmp.ge.f32.partialorder %v2095_v23, 0.0  ;;  %v2572_v34 = vmul.f32 0.01, %v2095_v23  ;;  %3470 = vmatpush1.bf16.msra.mxu0 %v5537_v27  ;;  %v2696_v33 = vsel %vm2440_vm4, %v2091_v47, %v2568_v57  ;;  %v5557_v27 = vld [vmem:[#allocation11 + $0x164] ss:$8 sps:$4 sm:$0xff]  }
 0x322   : > { %vm2445_vm7 = vcmp.ge.f32.partialorder %v2097_v43, 0.0  ;;  %v2573_v44 = vmul.f32 0.01, %v2097_v43  ;;  %3471 = vmatprep.subr.bf16.mxu0 %v5542_v49  ;;  %v2697_v59 = vsel %vm2441_vm5, %v2093_v48, %v2569_v39 }
 0x323   : > { %2392 = vmatmul.mubr.bf16.gmra.mrb[144].mxu1 %v6785_v61  ;;  %v2700_v2 = vsel %vm2444_vm6, %v2095_v23, %v2572_v34 }
 0x324   : > { %v2100_v10 = vpop.f32.mrb[40].mxu1  ;;  %2401 = vmatprep.mubr.bf16.mxu1 %v6803_v14  ;;  %v2701_v15 = vsel %vm2445_vm7, %v2097_v43, %v2573_v44  ;;  %v2820_v45 = vpack.c.bf16 %v2700_v2, %v2696_v33  ;;  %v5560_v33 = vld [vmem:[#allocation11 + $0x174] ss:$8 sps:$4 sm:$0xff]  }
 0x325   : > { %v2101_v4 = vadd.f32 %v2100_v10, %v6859_v8  ;;  %v2102_v7 = vpop.f32.mrb[41].mxu1  ;;  %v2821_v9 = vpack.c.bf16 %v2701_v15, %v2697_v59  ;;  %3472 = vmatpush1.bf16.msra.mxu0 %v5540_v60  ;;  %v5555_v60 = vld [vmem:[#allocation11 + $0x160] ss:$8 sps:$4 sm:$0xff]  }
 0x326   : > { %v2103_v5 = vadd.f32 %v2102_v7, %v6863_v24  ;;  %v2104_v35 = vpop.f32.mrb[42].mxu1  ;;  %3473 = vmatprep.subr.bf16.mxu0 %v5545_v6  ;;  %v5563_v7 = vld [vmem:[#allocation11 + $0x184] ss:$8 sps:$4 sm:$0xff]  }
 0x327   : > { %v2576_v61 = vmul.f32 0.01, %v2101_v4  ;;  %v2105_v11 = vadd.f32 %v2104_v35, %v6859_v8  ;;  %v2106_v41 = vpop.f32.mrb[43].mxu1  ;;  %3318 = vmatprep.mubr.bf16.mxu0 %v2821_v9  ;;  %vm2448_vm8 = vcmp.ge.f32.partialorder %v2101_v4, 0.0 }
 0x328   : > { %v2577_v14 = vmul.f32 0.01, %v2103_v5  ;;  %v2107_v51 = vadd.f32 %v2106_v41, %v6863_v24  ;;  %3319 = vmatmul.mubr.bf16.gmra.mrb[68].mxu0 %v2820_v45  ;;  %vm2449_vm9 = vcmp.ge.f32.partialorder %v2103_v5, 0.0  ;;  %v5558_v45 = vld [vmem:[#allocation11 + $0x170] ss:$8 sps:$4 sm:$0xff]  }
 0x329   : > { %vm2452_vm10 = vcmp.ge.f32.partialorder %v2105_v11, 0.0  ;;  %v2580_v28 = vmul.f32 0.01, %v2105_v11  ;;  %3474 = vmatpush1.bf16.msra.mxu0 %v5543_v18  ;;  %v2704_v63 = vsel %vm2448_vm8, %v2101_v4, %v2576_v61 }
 0x32a   : > { %vm2453_vm11 = vcmp.ge.f32.partialorder %v2107_v51, 0.0  ;;  %v2581_v53 = vmul.f32 0.01, %v2107_v51  ;;  %3475 = vmatprep.subr.bf16.mxu0 %v5548_v54  ;;  %v2705_v36 = vsel %vm2449_vm9, %v2103_v5, %v2577_v14 }
 0x32b   : > { %2402 = vmatmul.mubr.bf16.gmra.mrb[148].mxu1 %v6799_v55  ;;  %v2708_v32 = vsel %vm2452_vm10, %v2105_v11, %v2580_v28 }
 0x32c   : > { %v2110_v21 = vpop.f32.mrb[44].mxu1  ;;  %2411 = vmatprep.mubr.bf16.mxu1 %v6817_v1  ;;  %v2709_v12 = vsel %vm2453_vm11, %v2107_v51, %v2581_v53  ;;  %v2824_v56 = vpack.c.bf16 %v2708_v32, %v2704_v63  ;;  %v5561_v51 = vld [vmem:[#allocation11 + $0x180] ss:$8 sps:$4 sm:$0xff]   ;;  %v5566_v53 = vld [vmem:[#allocation11 + $0x194] ss:$8 sps:$4 sm:$0xff]  }
 0x32d   : > { %v2111_v16 = vadd.f32 %v2110_v21, %v6859_v8  ;;  %v2112_v13 = vpop.f32.mrb[45].mxu1  ;;  %v2825_v42 = vpack.c.bf16 %v2709_v12, %v2705_v36  ;;  %3476 = vmatpush1.bf16.msra.mxu0 %v5546_v52  ;;  %v5564_v12 = vld [vmem:[#allocation11 + $0x190] ss:$8 sps:$4 sm:$0xff]  }
 0x32e   : > { %v2113_v46 = vadd.f32 %v2112_v13, %v6863_v24  ;;  %v2114_v37 = vpop.f32.mrb[46].mxu1  ;;  %3477 = vmatprep.subr.bf16.mxu0 %v5551_v62 }
 0x32f   : > { %v2584_v55 = vmul.f32 0.01, %v2111_v16  ;;  %v2115_v26 = vadd.f32 %v2114_v37, %v6859_v8  ;;  %v2116_v20 = vpop.f32.mrb[47].mxu1  ;;  %3328 = vmatprep.mubr.bf16.mxu0 %v2825_v42  ;;  %vm2456_vm12 = vcmp.ge.f32.partialorder %v2111_v16, 0.0 }
 0x330   : > { %v2585_v1 = vmul.f32 0.01, %v2113_v46  ;;  %v2117_v19 = vadd.f32 %v2116_v20, %v6863_v24  ;;  %3329 = vmatmul.mubr.bf16.gmra.mrb[72].mxu0 %v2824_v56  ;;  %vm2457_vm13 = vcmp.ge.f32.partialorder %v2113_v46, 0.0 }
 0x331   : > { %vm2460_vm14 = vcmp.ge.f32.partialorder %v2115_v26, 0.0  ;;  %v2588_v47 = vmul.f32 0.01, %v2115_v26  ;;  %3478 = vmatpush1.bf16.msra.mxu0 %v5549_v58  ;;  %v2712_v48 = vsel %vm2456_vm12, %v2111_v16, %v2584_v55  ;;  %v5569_v16 = vld [vmem:[#allocation11 + $0x1a4] ss:$8 sps:$4 sm:$0xff]  }
 0x332   : > { %vm2461_vm15 = vcmp.ge.f32.partialorder %v2117_v19, 0.0  ;;  %v2589_v22 = vmul.f32 0.01, %v2117_v19  ;;  %3479 = vmatprep.subr.bf16.mxu0 %v5554_v17  ;;  %v2713_v57 = vsel %vm2457_vm13, %v2113_v46, %v2585_v1  ;;  %v5567_v1 = vld [vmem:[#allocation11 + $0x1a0] ss:$8 sps:$4 sm:$0xff]  }
 0x333   : > { %2412 = vmatmul.mubr.bf16.gmra.mrb[152].mxu1 %v6813_v50  ;;  %v2716_v29 = vsel %vm2460_vm14, %v2115_v26, %v2588_v47 }
 0x334   : > { %v2120_v49 = vpop.f32.mrb[48].mxu1  ;;  %2421 = vmatprep.mubr.bf16.mxu1 %v6827_v3  ;;  %v2717_v23 = vsel %vm2461_vm15, %v2117_v19, %v2589_v22  ;;  %v2828_v0 = vpack.c.bf16 %v2716_v29, %v2712_v48 }
 0x335   : > { %v2121_v39 = vadd.f32 %v2120_v49, %v6859_v8  ;;  %v2122_v43 = vpop.f32.mrb[49].mxu1  ;;  %v2829_v34 = vpack.c.bf16 %v2717_v23, %v2713_v57  ;;  %3480 = vmatpush1.bf16.msra.mxu0 %v5552_v38  ;;  %v5572_v38 = vld [vmem:[#allocation11 + $0x1b4] ss:$8 sps:$4 sm:$0xff]   ;;  %v5570_v23 = vld [vmem:[#allocation11 + $0x1b0] ss:$8 sps:$4 sm:$0xff]  }
 0x336   : > { %v2123_v44 = vadd.f32 %v2122_v43, %v6863_v24  ;;  %v2124_v6 = vpop.f32.mrb[50].mxu1  ;;  %3481 = vmatprep.subr.bf16.mxu0 %v5557_v27 }
 0x337   : > { %v2592_v50 = vmul.f32 0.01, %v2121_v39  ;;  %v2125_v2 = vadd.f32 %v2124_v6, %v6859_v8  ;;  %v2126_v10 = vpop.f32.mrb[51].mxu1  ;;  %3338 = vmatprep.mubr.bf16.mxu0 %v2829_v34  ;;  %vm2464_vm0 = vcmp.ge.f32.partialorder %v2121_v39, 0.0 }
 0x338   : > { %v2593_v3 = vmul.f32 0.01, %v2123_v44  ;;  %v2127_v59 = vadd.f32 %v2126_v10, %v6863_v24  ;;  %3339 = vmatmul.mubr.bf16.gmra.mrb[76].mxu0 %v2828_v0  ;;  %vm2465_vm1 = vcmp.ge.f32.partialorder %v2123_v44, 0.0 }
 0x339   : > { %vm2468_vm2 = vcmp.ge.f32.partialorder %v2125_v2, 0.0  ;;  %v2596_v15 = vmul.f32 0.01, %v2125_v2  ;;  %3482 = vmatpush1.bf16.msra.mxu0 %v5555_v60  ;;  %v2720_v9 = vsel %vm2464_vm0, %v2121_v39, %v2592_v50  ;;  %v5575_v39 = vld [vmem:[#allocation11 + $0x1c4] ss:$8 sps:$4 sm:$0xff]  }
 0x33a   : > { %vm2469_vm3 = vcmp.ge.f32.partialorder %v2127_v59, 0.0  ;;  %v2597_v4 = vmul.f32 0.01, %v2127_v59  ;;  %3483 = vmatprep.subr.bf16.mxu0 %v5560_v33  ;;  %v2721_v35 = vsel %vm2465_vm1, %v2123_v44, %v2593_v3  ;;  %v5573_v3 = vld [vmem:[#allocation11 + $0x1c0] ss:$8 sps:$4 sm:$0xff]  }
 0x33b   : > { %2422 = vmatmul.mubr.bf16.gmra.mrb[156].mxu1 %v6825_v40  ;;  %v2724_v18 = vsel %vm2468_vm2, %v2125_v2, %v2596_v15 }
 0x33c   : > { %v2130_v5 = vpop.f32.mrb[52].mxu1  ;;  %v2725_v54 = vsel %vm2469_vm3, %v2127_v59, %v2597_v4  ;;  %v2832_v61 = vpack.c.bf16 %v2724_v18, %v2720_v9 }
 0x33d   : > { %v2131_v11 = vadd.f32 %v2130_v5, %v6859_v8  ;;  %v2132_v41 = vpop.f32.mrb[53].mxu1  ;;  %v2833_v14 = vpack.c.bf16 %v2725_v54, %v2721_v35  ;;  %3484 = vmatpush1.bf16.msra.mxu0 %v5558_v45  ;;  %v5578_v45 = vld [vmem:[#allocation11 + $0x1d4] ss:$8 sps:$4 sm:$0xff]   ;;  %v5576_v54 = vld [vmem:[#allocation11 + $0x1d0] ss:$8 sps:$4 sm:$0xff]  }
 0x33e   : > { %v2133_v28 = vadd.f32 %v2132_v41, %v6863_v24  ;;  %v2134_v52 = vpop.f32.mrb[54].mxu1  ;;  %3485 = vmatprep.subr.bf16.mxu0 %v5563_v7 }
 0x33f   : > { %v2600_v62 = vmul.f32 0.01, %v2131_v11  ;;  %v2135_v40 = vadd.f32 %v2134_v52, %v6859_v8  ;;  %v2136_v63 = vpop.f32.mrb[55].mxu1  ;;  %3348 = vmatprep.mubr.bf16.mxu0 %v2833_v14  ;;  %vm2472_vm4 = vcmp.ge.f32.partialorder %v2131_v11, 0.0 }
 0x340   : > { %v2601_v32 = vmul.f32 0.01, %v2133_v28  ;;  %v2137_v21 = vadd.f32 %v2136_v63, %v6863_v24  ;;  %3349 = vmatmul.mubr.bf16.gmra.mrb[80].mxu0 %v2832_v61  ;;  %vm2473_vm5 = vcmp.ge.f32.partialorder %v2133_v28, 0.0  ;;  %v5584_v63 = vld [vmem:[#allocation11 + $0x1f4] ss:$8 sps:$4 sm:$0xff]  }
 0x341   : > { %vm2476_vm6 = vcmp.ge.f32.partialorder %v2135_v40, 0.0  ;;  %v2604_v36 = vmul.f32 0.01, %v2135_v40  ;;  %3486 = vmatpush1.bf16.msra.mxu0 %v5561_v51  ;;  %v2728_v13 = vsel %vm2472_vm4, %v2131_v11, %v2600_v62  ;;  %v5581_v11 = vld [vmem:[#allocation11 + $0x1e4] ss:$8 sps:$4 sm:$0xff]  }
 0x342   : > { %vm2477_vm7 = vcmp.ge.f32.partialorder %v2137_v21, 0.0  ;;  %v2605_v56 = vmul.f32 0.01, %v2137_v21  ;;  %3487 = vmatprep.subr.bf16.mxu0 %v5566_v53  ;;  %v2729_v46 = vsel %vm2473_vm5, %v2133_v28, %v2601_v32  ;;  %v5579_v62 = vld [vmem:[#allocation11 + $0x1e0] ss:$8 sps:$4 sm:$0xff]  }
 0x343   : > { %v2732_v42 = vsel %vm2476_vm6, %v2135_v40, %v2604_v36 }
 0x344   : > { %v2140_v58 = vpop.f32.mrb[56].mxu1  ;;  %v2733_v37 = vsel %vm2477_vm7, %v2137_v21, %v2605_v56  ;;  %v2836_v17 = vpack.c.bf16 %v2732_v42, %v2728_v13  ;;  %v5582_v42 = vld [vmem:[#allocation11 + $0x1f0] ss:$8 sps:$4 sm:$0xff]  }
 0x345   : > { %v2141_v55 = vadd.f32 %v2140_v58, %v6859_v8  ;;  %v2142_v26 = vpop.f32.mrb[57].mxu1  ;;  %v2837_v20 = vpack.c.bf16 %v2733_v37, %v2729_v46  ;;  %3488 = vmatpush1.bf16.msra.mxu0 %v5564_v12 }
 0x346   : > { %v2143_v19 = vadd.f32 %v2142_v26, %v6863_v24  ;;  %v2144_v47 = vpop.f32.mrb[58].mxu1  ;;  %3489 = vmatprep.subr.bf16.mxu0 %v5569_v16 }
 0x347   : > { %v2608_v22 = vmul.f32 0.01, %v2141_v55  ;;  %v2145_v27 = vadd.f32 %v2144_v47, %v6859_v8  ;;  %v2146_v48 = vpop.f32.mrb[59].mxu1  ;;  %3358 = vmatprep.mubr.bf16.mxu0 %v2837_v20  ;;  %vm2480_vm8 = vcmp.ge.f32.partialorder %v2141_v55, 0.0 }
 0x348   : > { %v2609_v29 = vmul.f32 0.01, %v2143_v19  ;;  %v2147_v49 = vadd.f32 %v2146_v48, %v6863_v24  ;;  %3359 = vmatmul.mubr.bf16.gmra.mrb[84].mxu0 %v2836_v17  ;;  %vm2481_vm9 = vcmp.ge.f32.partialorder %v2143_v19, 0.0 }
 0x349   : > { %vm2484_vm10 = vcmp.ge.f32.partialorder %v2145_v27, 0.0  ;;  %v2612_v57 = vmul.f32 0.01, %v2145_v27  ;;  %3490 = vmatpush1.bf16.msra.mxu0 %v5567_v1  ;;  %v2736_v43 = vsel %vm2480_vm8, %v2141_v55, %v2608_v22 }
 0x34a   : > { %vm2485_vm11 = vcmp.ge.f32.partialorder %v2147_v49, 0.0  ;;  %v2613_v0 = vmul.f32 0.01, %v2147_v49  ;;  %3491 = vmatprep.subr.bf16.mxu0 %v5572_v38  ;;  %v2737_v44 = vsel %vm2481_vm9, %v2143_v19, %v2609_v29 }
 0x34b   : > { %v2740_v34 = vsel %vm2484_vm10, %v2145_v27, %v2612_v57 }
 0x34c   : > { %v2150_v60 = vpop.f32.mrb[60].mxu1  ;;  %v2741_v6 = vsel %vm2485_vm11, %v2147_v49, %v2613_v0  ;;  %v2840_v33 = vpack.c.bf16 %v2740_v34, %v2736_v43 }
 0x34d   : > { %v2151_v50 = vadd.f32 %v2150_v60, %v6859_v8  ;;  %v2152_v2 = vpop.f32.mrb[61].mxu1  ;;  %v2841_v10 = vpack.c.bf16 %v2741_v6, %v2737_v44  ;;  %3492 = vmatpush1.bf16.msra.mxu0 %v5570_v23 }
 0x34e   : > { %v2153_v59 = vadd.f32 %v2152_v2, %v6863_v24  ;;  %v2154_v15 = vpop.f32.mrb[62].mxu1  ;;  %3493 = vmatprep.subr.bf16.mxu0 %v5575_v39 }
 0x34f   : > { %v2616_v4 = vmul.f32 0.01, %v2151_v50  ;;  %v2155_v7 = vadd.f32 %v2154_v15, %v6859_v8  ;;  %v2156_v9 = vpop.f32.mrb[63].mxu1  ;;  %3368 = vmatprep.mubr.bf16.mxu0 %v2841_v10  ;;  %vm2488_vm12 = vcmp.ge.f32.partialorder %v2151_v50, 0.0 }
 0x350   : > { %v2617_v18 = vmul.f32 0.01, %v2153_v59  ;;  %v2157_v5 = vadd.f32 %v2156_v9, %v6863_v24  ;;  %3369 = vmatmul.mubr.bf16.gmra.mrb[88].mxu0 %v2840_v33  ;;  %vm2489_vm13 = vcmp.ge.f32.partialorder %v2153_v59, 0.0 }
 0x351   : > { %vm2492_vm14 = vcmp.ge.f32.partialorder %v2155_v7, 0.0  ;;  %v2620_v35 = vmul.f32 0.01, %v2155_v7  ;;  %3494 = vmatpush1.bf16.msra.mxu0 %v5573_v3  ;;  %v2744_v41 = vsel %vm2488_vm12, %v2151_v50, %v2616_v4 }
 0x352   : > { %vm2493_vm15 = vcmp.ge.f32.partialorder %v2157_v5, 0.0  ;;  %v2621_v61 = vmul.f32 0.01, %v2157_v5  ;;  %3495 = vmatprep.subr.bf16.mxu0 %v5578_v45  ;;  %v2745_v51 = vsel %vm2489_vm13, %v2153_v59, %v2617_v18 }
 0x353   : > { %v2748_v14 = vsel %vm2492_vm14, %v2155_v7, %v2620_v35 }
 0x354   : > { %v2749_v28 = vsel %vm2493_vm15, %v2157_v5, %v2621_v61  ;;  %v2844_v52 = vpack.c.bf16 %v2748_v14, %v2744_v41 }
 0x355   : > { %v2845_v53 = vpack.c.bf16 %v2749_v28, %v2745_v51  ;;  %3496 = vmatpush1.bf16.msra.mxu0 %v5576_v54 }
 0x356   : > { %v2160_v40 = vpop.f32.mrb[64].mxu1  ;;  %3497 = vmatprep.subr.bf16.mxu0 %v5581_v11 }
 0x357   : > { %v2161_v32 = vadd.f32 %v2160_v40, %v6859_v8  ;;  %v2162_v21 = vpop.f32.mrb[65].mxu1  ;;  %3378 = vmatprep.mubr.bf16.mxu0 %v2845_v53 }
 0x358   : > { %v2163_v36 = vadd.f32 %v2162_v21, %v6863_v24  ;;  %v2164_v12 = vpop.f32.mrb[66].mxu1  ;;  %3379 = vmatmul.mubr.bf16.gmra.mrb[92].mxu0 %v2844_v52 }
 0x359   : > { %v2624_v56 = vmul.f32 0.01, %v2161_v32  ;;  %v2165_v16 = vadd.f32 %v2164_v12, %v6859_v8  ;;  %v2166_v13 = vpop.f32.mrb[67].mxu1  ;;  %3498 = vmatpush1.bf16.msra.mxu0 %v5579_v62  ;;  %vm2496_vm0 = vcmp.ge.f32.partialorder %v2161_v32, 0.0 }
 0x35a   : > { %v2625_v58 = vmul.f32 0.01, %v2163_v36  ;;  %v2167_v46 = vadd.f32 %v2166_v13, %v6863_v24  ;;  %3499 = vmatprep.subr.bf16.mxu0 %v5584_v63  ;;  %vm2497_vm1 = vcmp.ge.f32.partialorder %v2163_v36, 0.0 }
 0x35b   : > { %vm2500_vm2 = vcmp.ge.f32.partialorder %v2165_v16, 0.0  ;;  %v2628_v37 = vmul.f32 0.01, %v2165_v16  ;;  %v2752_v55 = vsel %vm2496_vm0, %v2161_v32, %v2624_v56 }
 0x35c   : > { %vm2501_vm3 = vcmp.ge.f32.partialorder %v2167_v46, 0.0  ;;  %v2629_v17 = vmul.f32 0.01, %v2167_v46  ;;  %v2753_v1 = vsel %vm2497_vm1, %v2163_v36, %v2625_v58 }
 0x35d   : > { %v2756_v26 = vsel %vm2500_vm2, %v2165_v16, %v2628_v37  ;;  %3500 = vmatpush1.bf16.msra.mxu0 %v5582_v42 }
 0x35e   : > { %v2170_v20 = vpop.f32.mrb[68].mxu1  ;;  %v2757_v19 = vsel %vm2501_vm3, %v2167_v46, %v2629_v17  ;;  %v2848_v47 = vpack.c.bf16 %v2756_v26, %v2752_v55 }
 0x35f   : > { %v2171_v38 = vadd.f32 %v2170_v20, %v6859_v8  ;;  %v2172_v22 = vpop.f32.mrb[69].mxu1  ;;  %v2849_v27 = vpack.c.bf16 %v2757_v19, %v2753_v1 }
 0x360   : > { %v2173_v48 = vadd.f32 %v2172_v22, %v6863_v24  ;;  %v2174_v29 = vpop.f32.mrb[70].mxu1 }
 0x361   : > { %v2632_v49 = vmul.f32 0.01, %v2171_v38  ;;  %v2175_v57 = vadd.f32 %v2174_v29, %v6859_v8  ;;  %v2176_v23 = vpop.f32.mrb[71].mxu1  ;;  %3388 = vmatprep.mubr.bf16.mxu0 %v2849_v27  ;;  %vm2504_vm4 = vcmp.ge.f32.partialorder %v2171_v38, 0.0 }
 0x362   : > { %v2633_v0 = vmul.f32 0.01, %v2173_v48  ;;  %v2177_v39 = vadd.f32 %v2176_v23, %v6863_v24  ;;  %3389 = vmatmul.mubr.bf16.gmra.mrb[96].mxu0 %v2848_v47  ;;  %vm2505_vm5 = vcmp.ge.f32.partialorder %v2173_v48, 0.0 }
 0x363   : > { %vm2508_vm6 = vcmp.ge.f32.partialorder %v2175_v57, 0.0  ;;  %v2636_v43 = vmul.f32 0.01, %v2175_v57  ;;  %v2760_v60 = vsel %vm2504_vm4, %v2171_v38, %v2632_v49 }
 0x364   : > { %vm2509_vm7 = vcmp.ge.f32.partialorder %v2177_v39, 0.0  ;;  %v2637_v34 = vmul.f32 0.01, %v2177_v39  ;;  %v2761_v33 = vsel %vm2505_vm5, %v2173_v48, %v2633_v0 }
 0x365   : > { %v2764_v44 = vsel %vm2508_vm6, %v2175_v57, %v2636_v43 }
 0x366   : > { %v2180_v6 = vpop.f32.mrb[72].mxu1  ;;  %v2765_v50 = vsel %vm2509_vm7, %v2177_v39, %v2637_v34  ;;  %v2852_v2 = vpack.c.bf16 %v2764_v44, %v2760_v60 }
 0x367   : > { %v2181_v10 = vadd.f32 %v2180_v6, %v6859_v8  ;;  %v2182_v3 = vpop.f32.mrb[73].mxu1  ;;  %v2853_v59 = vpack.c.bf16 %v2765_v50, %v2761_v33 }
 0x368   : > { %v2183_v15 = vadd.f32 %v2182_v3, %v6863_v24  ;;  %v2184_v45 = vpop.f32.mrb[74].mxu1 }
 0x369   : > { %v2640_v4 = vmul.f32 0.01, %v2181_v10  ;;  %v2185_v7 = vadd.f32 %v2184_v45, %v6859_v8  ;;  %v2186_v9 = vpop.f32.mrb[75].mxu1  ;;  %3398 = vmatprep.mubr.bf16.mxu0 %v2853_v59  ;;  %vm2512_vm8 = vcmp.ge.f32.partialorder %v2181_v10, 0.0 }
 0x36a   : > { %v2641_v18 = vmul.f32 0.01, %v2183_v15  ;;  %v2187_v5 = vadd.f32 %v2186_v9, %v6863_v24  ;;  %3399 = vmatmul.mubr.bf16.gmra.mrb[100].mxu0 %v2852_v2  ;;  %vm2513_vm9 = vcmp.ge.f32.partialorder %v2183_v15, 0.0  ;;  %v5585_v9 = vld [vmem:[#allocation13] ss:$8 sps:$4 sm:$0xff]  }
 0x36b   : > { %vm2516_vm10 = vcmp.ge.f32.partialorder %v2185_v7, 0.0  ;;  %v2644_v35 = vmul.f32 0.01, %v2185_v7  ;;  %v2768_v61 = vsel %vm2512_vm8, %v2181_v10, %v2640_v4 }
 0x36c   : > { %vm2517_vm11 = vcmp.ge.f32.partialorder %v2187_v5, 0.0  ;;  %v2645_v54 = vmul.f32 0.01, %v2187_v5  ;;  %v2769_v14 = vsel %vm2513_vm9, %v2183_v15, %v2641_v18 }
 0x36d   : > { %v2772_v11 = vsel %vm2516_vm10, %v2185_v7, %v2644_v35  ;;  %v5587_v35 = vld [vmem:[#allocation13 + $0x4] ss:$8 sps:$4 sm:$0xff]  }
 0x36e   : > { %v2190_v41 = vpop.f32.mrb[76].mxu1  ;;  %v2773_v51 = vsel %vm2517_vm11, %v2187_v5, %v2645_v54  ;;  %v2856_v28 = vpack.c.bf16 %v2772_v11, %v2768_v61  ;;  %4090 = vmatprep.subr.bf16.mxu1 %v5587_v35 }
 0x36f   : > { %v2191_v52 = vadd.f32 %v2190_v41, %v6859_v8  ;;  %v2192_v53 = vpop.f32.mrb[77].mxu1  ;;  %v2857_v62 = vpack.c.bf16 %v2773_v51, %v2769_v14  ;;  %4091 = vmatpush1.bf16.msra.mxu1 %v5585_v9 }
 0x370   : > { %v2193_v40 = vadd.f32 %v2192_v53, %v6863_v24  ;;  %v2194_v63 = vpop.f32.mrb[78].mxu1 }
 0x371   : > { %v2648_v32 = vmul.f32 0.01, %v2191_v52  ;;  %v2195_v21 = vadd.f32 %v2194_v63, %v6859_v8  ;;  %v2196_v36 = vpop.f32.mrb[79].mxu1  ;;  %3408 = vmatprep.mubr.bf16.mxu0 %v2857_v62  ;;  %vm2520_vm12 = vcmp.ge.f32.partialorder %v2191_v52, 0.0 }
 0x372   : > { %v2649_v12 = vmul.f32 0.01, %v2193_v40  ;;  %v2197_v56 = vadd.f32 %v2196_v36, %v6863_v24  ;;  %3409 = vmatmul.mubr.bf16.gmra.mrb[104].mxu0 %v2856_v28  ;;  %vm2521_vm13 = vcmp.ge.f32.partialorder %v2193_v40, 0.0 }
 0x373   : > { %vm2524_vm14 = vcmp.ge.f32.partialorder %v2195_v21, 0.0  ;;  %v2652_v16 = vmul.f32 0.01, %v2195_v21  ;;  %v2776_v42 = vsel %vm2520_vm12, %v2191_v52, %v2648_v32 }
 0x374   : > { %vm2525_vm15 = vcmp.ge.f32.partialorder %v2197_v56, 0.0  ;;  %v2653_v13 = vmul.f32 0.01, %v2197_v56  ;;  %v2777_v37 = vsel %vm2521_vm13, %v2193_v40, %v2649_v12 }
 0x375   : > { %v2780_v58 = vsel %vm2524_vm14, %v2195_v21, %v2652_v16 }
 0x376   : > { %v2200_v46 = vpop.f32.mrb[80].mxu1  ;;  %v2781_v17 = vsel %vm2525_vm15, %v2197_v56, %v2653_v13  ;;  %v2860_v55 = vpack.c.bf16 %v2780_v58, %v2776_v42  ;;  %v5588_v56 = vld [vmem:[#allocation13 + $0x10] ss:$8 sps:$4 sm:$0xff]   ;;  %v5590_v42 = vld [vmem:[#allocation13 + $0x14] ss:$8 sps:$4 sm:$0xff]  }
 0x377   : > { %v2201_v26 = vadd.f32 %v2200_v46, %v6859_v8  ;;  %v2202_v20 = vpop.f32.mrb[81].mxu1  ;;  %v2861_v1 = vpack.c.bf16 %v2781_v17, %v2777_v37  ;;  %4092 = vmatprep.subr.bf16.mxu1 %v5590_v42 }
 0x378   : > { %v2203_v19 = vadd.f32 %v2202_v20, %v6863_v24  ;;  %v2204_v47 = vpop.f32.mrb[82].mxu1  ;;  %4093 = vmatpush1.bf16.msra.mxu1 %v5588_v56 }
 0x379   : > { %v2656_v38 = vmul.f32 0.01, %v2201_v26  ;;  %v2205_v22 = vadd.f32 %v2204_v47, %v6859_v8  ;;  %v2206_v27 = vpop.f32.mrb[83].mxu1  ;;  %3418 = vmatprep.mubr.bf16.mxu0 %v2861_v1  ;;  %vm2528_vm0 = vcmp.ge.f32.partialorder %v2201_v26, 0.0  ;;  %v7372_v1 = vld [vmem:[#allocation23_spill] sm:$0xff] }
 0x37a   : > { %v2657_v48 = vmul.f32 0.01, %v2203_v19  ;;  %v2207_v29 = vadd.f32 %v2206_v27, %v6863_v24  ;;  %3419 = vmatmul.mubr.bf16.gmra.mrb[108].mxu0 %v2860_v55  ;;  %vm2529_vm1 = vcmp.ge.f32.partialorder %v2203_v19, 0.0 }
 0x37b   : > { %vm2532_vm2 = vcmp.ge.f32.partialorder %v2205_v22, 0.0  ;;  %v2660_v49 = vmul.f32 0.01, %v2205_v22  ;;  %v2784_v23 = vsel %vm2528_vm0, %v2201_v26, %v2656_v38 }
 0x37c   : > { %vm2533_vm3 = vcmp.ge.f32.partialorder %v2207_v29, 0.0  ;;  %v2661_v57 = vmul.f32 0.01, %v2207_v29  ;;  %v2785_v43 = vsel %vm2529_vm1, %v2203_v19, %v2657_v48  ;;  %v1716_v19 = vsub.s32 2, %v7372_v1 }
 0x37d   : > { %v2788_v0 = vsel %vm2532_vm2, %v2205_v22, %v2660_v49  ;;  %v1720_v22 = vsub.s32 3, %v7372_v1 }
 0x37e   : > { %v2210_v39 = vpop.f32.mrb[84].mxu1  ;;  %v2789_v34 = vsel %vm2533_vm3, %v2207_v29, %v2661_v57  ;;  %v2864_v60 = vpack.c.bf16 %v2788_v0, %v2784_v23  ;;  %v6943_v0 = vrot.slane %v6855_v31, %v1716_v19 }
 0x37f   : > { %v2211_v44 = vadd.f32 %v2210_v39, %v6859_v8  ;;  %v2212_v6 = vpop.f32.mrb[85].mxu1  ;;  %v2865_v33 = vpack.c.bf16 %v2789_v34, %v2785_v43  ;;  %v6946_v43 = vrot.slane %v6855_v31, %v1720_v22  ;;  %v5591_v34 = vld [vmem:[#allocation13 + $0x20] ss:$8 sps:$4 sm:$0xff]   ;;  %v5608_v22 = vld [vmem:[#allocation13 + $0x74] ss:$8 sps:$4 sm:$0xff]  }
 0x380   : > { %v2213_v50 = vadd.f32 %v2212_v6, %v6863_v24  ;;  %v2214_v2 = vpop.f32.mrb[86].mxu1 }
 0x381   : > { %v2664_v10 = vmul.f32 0.01, %v2211_v44  ;;  %v2215_v3 = vadd.f32 %v2214_v2, %v6859_v8  ;;  %v2216_v59 = vpop.f32.mrb[87].mxu1  ;;  %3428 = vmatprep.mubr.bf16.mxu0 %v2865_v33  ;;  %vm2536_vm4 = vcmp.ge.f32.partialorder %v2211_v44, 0.0 }
 0x382   : > { %v2665_v15 = vmul.f32 0.01, %v2213_v50  ;;  %v2217_v45 = vadd.f32 %v2216_v59, %v6863_v24  ;;  %3429 = vmatmul.mubr.bf16.gmra.mrb[112].mxu0 %v2864_v60  ;;  %vm2537_vm5 = vcmp.ge.f32.partialorder %v2213_v50, 0.0 }
 0x383   : > { %vm2540_vm6 = vcmp.ge.f32.partialorder %v2215_v3, 0.0  ;;  %v2668_v4 = vmul.f32 0.01, %v2215_v3  ;;  %v2792_v18 = vsel %vm2536_vm4, %v2211_v44, %v2664_v10  ;;  %v5593_v44 = vld [vmem:[#allocation13 + $0x24] ss:$8 sps:$4 sm:$0xff]  }
 0x384   : > { %vm2541_vm7 = vcmp.ge.f32.partialorder %v2217_v45, 0.0  ;;  %v2669_v7 = vmul.f32 0.01, %v2217_v45  ;;  %v2793_v61 = vsel %vm2537_vm5, %v2213_v50, %v2665_v15  ;;  %4094 = vmatprep.subr.bf16.mxu1 %v5593_v44 }
 0x385   : > { %v2796_v5 = vsel %vm2540_vm6, %v2215_v3, %v2668_v4  ;;  %4095 = vmatpush1.bf16.msra.mxu1 %v5591_v34 }
 0x386   : > { %v2220_v54 = vpop.f32.mrb[88].mxu1  ;;  %v2797_v11 = vsel %vm2541_vm7, %v2217_v45, %v2669_v7  ;;  %v2868_v41 = vpack.c.bf16 %v2796_v5, %v2792_v18  ;;  %v5594_v7 = vld [vmem:[#allocation13 + $0x30] ss:$8 sps:$4 sm:$0xff]   ;;  %v5596_v5 = vld [vmem:[#allocation13 + $0x34] ss:$8 sps:$4 sm:$0xff]  }
 0x387   : > { %v2221_v14 = vadd.f32 %v2220_v54, %v6859_v8  ;;  %v2222_v51 = vpop.f32.mrb[89].mxu1  ;;  %v2869_v28 = vpack.c.bf16 %v2797_v11, %v2793_v61  ;;  %4096 = vmatprep.subr.bf16.mxu1 %v5596_v5  ;;  %v5599_v61 = vld [vmem:[#allocation13 + $0x44] ss:$8 sps:$4 sm:$0xff]  }
 0x388   : > { %v2223_v52 = vadd.f32 %v2222_v51, %v6863_v24  ;;  %v2224_v53 = vpop.f32.mrb[90].mxu1 }
 0x389   : > { %v2672_v62 = vmul.f32 0.01, %v2221_v14  ;;  %v2225_v40 = vadd.f32 %v2224_v53, %v6859_v8  ;;  %v2226_v63 = vpop.f32.mrb[91].mxu1  ;;  %3438 = vmatprep.mubr.bf16.mxu0 %v2869_v28  ;;  %vm2544_vm8 = vcmp.ge.f32.partialorder %v2221_v14, 0.0  ;;  %4097 = vmatpush1.bf16.msra.mxu1 %v5594_v7 }
 0x38a   : > { %v2673_v32 = vmul.f32 0.01, %v2223_v52  ;;  %v2227_v21 = vadd.f32 %v2226_v63, %v6863_v24  ;;  %3439 = vmatmul.mubr.bf16.gmra.mrb[116].mxu0 %v2868_v41  ;;  %vm2545_vm9 = vcmp.ge.f32.partialorder %v2223_v52, 0.0  ;;  %4098 = vmatprep.subr.bf16.mxu1 %v5599_v61 }
 0x38b   : > { %vm2548_vm10 = vcmp.ge.f32.partialorder %v2225_v40, 0.0  ;;  %v2676_v36 = vmul.f32 0.01, %v2225_v40  ;;  %v2800_v16 = vsel %vm2544_vm8, %v2221_v14, %v2672_v62  ;;  %v5597_v14 = vld [vmem:[#allocation13 + $0x40] ss:$8 sps:$4 sm:$0xff]  }
 0x38c   : > { %vm2549_vm11 = vcmp.ge.f32.partialorder %v2227_v21, 0.0  ;;  %v2677_v12 = vmul.f32 0.01, %v2227_v21  ;;  %v2801_v46 = vsel %vm2545_vm9, %v2223_v52, %v2673_v32  ;;  %v5602_v62 = vld [vmem:[#allocation13 + $0x54] ss:$8 sps:$4 sm:$0xff]  }
 0x38d   : > { %v2804_v13 = vsel %vm2548_vm10, %v2225_v40, %v2676_v36  ;;  %4099 = vmatpush1.bf16.msra.mxu1 %v5597_v14 }
 0x38e   : > { %v2230_v58 = vpop.f32.mrb[92].mxu1  ;;  %v2805_v37 = vsel %vm2549_vm11, %v2227_v21, %v2677_v12  ;;  %v2872_v17 = vpack.c.bf16 %v2804_v13, %v2800_v16  ;;  %v5600_v13 = vld [vmem:[#allocation13 + $0x50] ss:$8 sps:$4 sm:$0xff]   ;;  %4100 = vmatprep.subr.bf16.mxu1 %v5602_v62 }
 0x38f   : > { %v2231_v55 = vadd.f32 %v2230_v58, %v6859_v8  ;;  %v2232_v26 = vpop.f32.mrb[93].mxu1  ;;  %v2873_v20 = vpack.c.bf16 %v2805_v37, %v2801_v46  ;;  %v5605_v46 = vld [vmem:[#allocation13 + $0x64] ss:$8 sps:$4 sm:$0xff]  }
 0x390   : > { %v2233_v47 = vadd.f32 %v2232_v26, %v6863_v24  ;;  %v2234_v38 = vpop.f32.mrb[94].mxu1 }
 0x391   : > { %v2680_v27 = vmul.f32 0.01, %v2231_v55  ;;  %v2235_v48 = vadd.f32 %v2234_v38, %v6859_v8  ;;  %v2236_v29 = vpop.f32.mrb[95].mxu1  ;;  %3448 = vmatprep.mubr.bf16.mxu0 %v2873_v20  ;;  %vm2552_vm12 = vcmp.ge.f32.partialorder %v2231_v55, 0.0  ;;  %4101 = vmatpush1.bf16.msra.mxu1 %v5600_v13  ;;  %v5603_v20 = vld [vmem:[#allocation13 + $0x60] ss:$8 sps:$4 sm:$0xff]  }
 0x392   : > { %v2681_v49 = vmul.f32 0.01, %v2233_v47  ;;  %v2237_v57 = vadd.f32 %v2236_v29, %v6863_v24  ;;  %3449 = vmatmul.mubr.bf16.gmra.mrb[120].mxu0 %v2872_v17  ;;  %vm2553_vm13 = vcmp.ge.f32.partialorder %v2233_v47, 0.0  ;;  %4102 = vmatprep.subr.bf16.mxu1 %v5605_v46 }
 0x393   : > { %vm2556_vm14 = vcmp.ge.f32.partialorder %v2235_v48, 0.0  ;;  %v2684_v23 = vmul.f32 0.01, %v2235_v48  ;;  %v2808_v8 = vsel %vm2552_vm12, %v2231_v55, %v2680_v27 }
 0x394   : > { %vm2557_vm15 = vcmp.ge.f32.partialorder %v2237_v57, 0.0  ;;  %v2685_v39 = vmul.f32 0.01, %v2237_v57  ;;  %v2809_v33 = vsel %vm2553_vm13, %v2233_v47, %v2681_v49 }
 0x395   : > { %v2812_v60 = vsel %vm2556_vm14, %v2235_v48, %v2684_v23  ;;  %4103 = vmatpush1.bf16.msra.mxu1 %v5603_v20 }
 0x396   : > { %v2273_v6 = vpop.f32.mrb[96].mxu1  ;;  %v2813_v50 = vsel %vm2557_vm15, %v2237_v57, %v2685_v39  ;;  %v2876_v24 = vpack.c.bf16 %v2812_v60, %v2808_v8  ;;  %v5606_v8 = vld [vmem:[#allocation13 + $0x70] ss:$8 sps:$4 sm:$0xff]   ;;  %4104 = vmatprep.subr.bf16.mxu1 %v5608_v22 }
 0x397   : > { %v2274_v2 = vadd.f32 %v2273_v6, %v6943_v0  ;;  %v2275_v10 = vpop.f32.mrb[97].mxu1  ;;  %v2877_v3 = vpack.c.bf16 %v2813_v50, %v2809_v33  ;;  %v5611_v6 = vld [vmem:[#allocation13 + $0x84] ss:$8 sps:$4 sm:$0xff]  }
 0x398   : > { %v2276_v59 = vadd.f32 %v2275_v10, %v6946_v43  ;;  %v2277_v15 = vpop.f32.mrb[98].mxu1  ;;  %v5609_v10 = vld [vmem:[#allocation13 + $0x80] ss:$8 sps:$4 sm:$0xff]  }
 0x399   : > { %v2562_v45 = vmul.f32 0.01, %v2274_v2  ;;  %v2278_v31 = vadd.f32 %v2277_v15, %v6943_v0  ;;  %v2279_v4 = vpop.f32.mrb[99].mxu1  ;;  %3458 = vmatprep.mubr.bf16.mxu0 %v2877_v3  ;;  %vm2434_vm0 = vcmp.ge.f32.partialorder %v2274_v2, 0.0  ;;  %4105 = vmatpush1.bf16.msra.mxu1 %v5606_v8 }
 0x39a   : > { %v2563_v9 = vmul.f32 0.01, %v2276_v59  ;;  %v2280_v18 = vadd.f32 %v2279_v4, %v6946_v43  ;;  %3459 = vmatmul.mubr.bf16.gmra.mrb[124].mxu0 %v2876_v24  ;;  %vm2435_vm1 = vcmp.ge.f32.partialorder %v2276_v59, 0.0  ;;  %4106 = vmatprep.subr.bf16.mxu1 %v5611_v6 }
 0x39b   : > { %vm2438_vm2 = vcmp.ge.f32.partialorder %v2278_v31, 0.0  ;;  %v2566_v35 = vmul.f32 0.01, %v2278_v31  ;;  %v2690_v11 = vsel %vm2434_vm0, %v2274_v2, %v2562_v45 }
 0x39c   : > { %vm2439_vm3 = vcmp.ge.f32.partialorder %v2280_v18, 0.0  ;;  %v2567_v54 = vmul.f32 0.01, %v2280_v18  ;;  %v2691_v52 = vsel %vm2435_vm1, %v2276_v59, %v2563_v9 }
 0x39d   : > { %v2694_v41 = vsel %vm2438_vm2, %v2278_v31, %v2566_v35  ;;  %v5614_v31 = vld [vmem:[#allocation13 + $0x94] ss:$8 sps:$4 sm:$0xff]   ;;  %4107 = vmatpush1.bf16.msra.mxu1 %v5609_v10 }
 0x39e   : > { %v2818_v51 = vpack.c.bf16 %v2694_v41, %v2690_v11  ;;  %v2283_v28 = vpop.f32.mrb[100].mxu1  ;;  %v2695_v53 = vsel %vm2439_vm3, %v2280_v18, %v2567_v54  ;;  %v5612_v11 = vld [vmem:[#allocation13 + $0x90] ss:$8 sps:$4 sm:$0xff]   ;;  %4108 = vmatprep.subr.bf16.mxu1 %v5614_v31 }
 0x39f   : > { %v2284_v40 = vadd.f32 %v2283_v28, %v6943_v0  ;;  %v2285_v63 = vpop.f32.mrb[101].mxu1  ;;  %v2819_v32 = vpack.c.bf16 %v2695_v53, %v2691_v52 }
 0x3a0   : > { %v2286_v21 = vadd.f32 %v2285_v63, %v6946_v43  ;;  %v2287_v36 = vpop.f32.mrb[102].mxu1 }
 0x3a1   : > { %v2570_v12 = vmul.f32 0.01, %v2284_v40  ;;  %v2288_v56 = vadd.f32 %v2287_v36, %v6943_v0  ;;  %v2289_v16 = vpop.f32.mrb[103].mxu1  ;;  %3501 = vmatprep.mubr.bf16.mxu0 %v2819_v32  ;;  %vm2442_vm4 = vcmp.ge.f32.partialorder %v2284_v40, 0.0  ;;  %4109 = vmatpush1.bf16.msra.mxu1 %v5612_v11 }
 0x3a2   : > { %v2571_v42 = vmul.f32 0.01, %v2286_v21  ;;  %v2290_v58 = vadd.f32 %v2289_v16, %v6946_v43  ;;  %3502 = vmatmul.mubr.bf16.vlgmr.msra.gmra.mrb[64].mxu0 %v2818_v51  ;;  %vm2443_vm5 = vcmp.ge.f32.partialorder %v2286_v21, 0.0  ;;  %v5617_v51 = vld [vmem:[#allocation13 + $0xa4] ss:$8 sps:$4 sm:$0xff]  }
 0x3a3   : > { %vm2446_vm6 = vcmp.ge.f32.partialorder %v2288_v56, 0.0  ;;  %v2574_v37 = vmul.f32 0.01, %v2288_v56  ;;  %v2698_v55 = vsel %vm2442_vm4, %v2284_v40, %v2570_v12  ;;  %v5615_v40 = vld [vmem:[#allocation13 + $0xa0] ss:$8 sps:$4 sm:$0xff]   ;;  %4110 = vmatprep.subr.bf16.mxu1 %v5617_v51 }
 0x3a4   : > { %vm2447_vm7 = vcmp.ge.f32.partialorder %v2290_v58, 0.0  ;;  %v2575_v17 = vmul.f32 0.01, %v2290_v58  ;;  %v2699_v19 = vsel %vm2443_vm5, %v2286_v21, %v2571_v42  ;;  %v5620_v12 = vld [vmem:[#allocation13 + $0xb4] ss:$8 sps:$4 sm:$0xff]  }
 0x3a5   : > { %v2702_v26 = vsel %vm2446_vm6, %v2288_v56, %v2574_v37  ;;  %4111 = vmatpush1.bf16.msra.mxu1 %v5615_v40 }
 0x3a6   : > { %v2293_v1 = vpop.f32.mrb[104].mxu1  ;;  %v2703_v47 = vsel %vm2447_vm7, %v2290_v58, %v2575_v17  ;;  %v2822_v38 = vpack.c.bf16 %v2702_v26, %v2698_v55  ;;  %v5618_v55 = vld [vmem:[#allocation13 + $0xb0] ss:$8 sps:$4 sm:$0xff]   ;;  %4112 = vmatprep.subr.bf16.mxu1 %v5620_v12 }
 0x3a7   : > { %v2294_v27 = vadd.f32 %v2293_v1, %v6943_v0  ;;  %v2295_v48 = vpop.f32.mrb[105].mxu1  ;;  %v2823_v29 = vpack.c.bf16 %v2703_v47, %v2699_v19  ;;  %v5623_v1 = vld [vmem:[#allocation13 + $0xc4] ss:$8 sps:$4 sm:$0xff]  }
 0x3a8   : > { %v2296_v49 = vadd.f32 %v2295_v48, %v6946_v43  ;;  %v2297_v57 = vpop.f32.mrb[106].mxu1 }
 0x3a9   : > { %v2578_v23 = vmul.f32 0.01, %v2294_v27  ;;  %v2298_v39 = vadd.f32 %v2297_v57, %v6943_v0  ;;  %v2299_v34 = vpop.f32.mrb[107].mxu1  ;;  %3511 = vmatprep.mubr.bf16.mxu0 %v2823_v29  ;;  %vm2450_vm8 = vcmp.ge.f32.partialorder %v2294_v27, 0.0  ;;  %4113 = vmatpush1.bf16.msra.mxu1 %v5618_v55 }
 0x3aa   : > { %v2579_v60 = vmul.f32 0.01, %v2296_v49  ;;  %v2300_v44 = vadd.f32 %v2299_v34, %v6946_v43  ;;  %3512 = vmatmul.mubr.bf16.gmra.mrb[68].mxu0 %v2822_v38  ;;  %vm2451_vm9 = vcmp.ge.f32.partialorder %v2296_v49, 0.0  ;;  %4114 = vmatprep.subr.bf16.mxu1 %v5623_v1 }
 0x3ab   : > { %vm2454_vm10 = vcmp.ge.f32.partialorder %v2298_v39, 0.0  ;;  %v2582_v33 = vmul.f32 0.01, %v2298_v39  ;;  %v2706_v24 = vsel %vm2450_vm8, %v2294_v27, %v2578_v23  ;;  %v5621_v27 = vld [vmem:[#allocation13 + $0xc0] ss:$8 sps:$4 sm:$0xff]  }
 0x3ac   : > { %vm2455_vm11 = vcmp.ge.f32.partialorder %v2300_v44, 0.0  ;;  %v2583_v50 = vmul.f32 0.01, %v2300_v44  ;;  %v2707_v59 = vsel %vm2451_vm9, %v2296_v49, %v2579_v60  ;;  %v5626_v23 = vld [vmem:[#allocation13 + $0xd4] ss:$8 sps:$4 sm:$0xff]  }
 0x3ad   : > { %v2710_v2 = vsel %vm2454_vm10, %v2298_v39, %v2582_v33  ;;  %4115 = vmatpush1.bf16.msra.mxu1 %v5621_v27 }
 0x3ae   : > { %v2303_v3 = vpop.f32.mrb[108].mxu1  ;;  %v2711_v15 = vsel %vm2455_vm11, %v2300_v44, %v2583_v50  ;;  %v2826_v45 = vpack.c.bf16 %v2710_v2, %v2706_v24  ;;  %v5624_v24 = vld [vmem:[#allocation13 + $0xd0] ss:$8 sps:$4 sm:$0xff]   ;;  %4116 = vmatprep.subr.bf16.mxu1 %v5626_v23 }
 0x3af   : > { %v2304_v4 = vadd.f32 %v2303_v3, %v6943_v0  ;;  %v2305_v7 = vpop.f32.mrb[109].mxu1  ;;  %v2827_v9 = vpack.c.bf16 %v2711_v15, %v2707_v59  ;;  %v5629_v3 = vld [vmem:[#allocation13 + $0xe4] ss:$8 sps:$4 sm:$0xff]  }
 0x3b0   : > { %v2306_v18 = vadd.f32 %v2305_v7, %v6946_v43  ;;  %v2307_v5 = vpop.f32.mrb[110].mxu1 }
 0x3b1   : > { %v2586_v35 = vmul.f32 0.01, %v2304_v4  ;;  %v2308_v54 = vadd.f32 %v2307_v5, %v6943_v0  ;;  %v2309_v61 = vpop.f32.mrb[111].mxu1  ;;  %3521 = vmatprep.mubr.bf16.mxu0 %v2827_v9  ;;  %vm2458_vm12 = vcmp.ge.f32.partialorder %v2304_v4, 0.0  ;;  %4117 = vmatpush1.bf16.msra.mxu1 %v5624_v24 }
 0x3b2   : > { %v2587_v41 = vmul.f32 0.01, %v2306_v18  ;;  %v2310_v14 = vadd.f32 %v2309_v61, %v6946_v43  ;;  %3522 = vmatmul.mubr.bf16.gmra.mrb[72].mxu0 %v2826_v45  ;;  %vm2459_vm13 = vcmp.ge.f32.partialorder %v2306_v18, 0.0  ;;  %4118 = vmatprep.subr.bf16.mxu1 %v5629_v3 }
 0x3b3   : > { %vm2462_vm14 = vcmp.ge.f32.partialorder %v2308_v54, 0.0  ;;  %v2590_v28 = vmul.f32 0.01, %v2308_v54  ;;  %v2714_v53 = vsel %vm2458_vm12, %v2304_v4, %v2586_v35  ;;  %v5627_v4 = vld [vmem:[#allocation13 + $0xe0] ss:$8 sps:$4 sm:$0xff]  }
 0x3b4   : > { %vm2463_vm15 = vcmp.ge.f32.partialorder %v2310_v14, 0.0  ;;  %v2591_v52 = vmul.f32 0.01, %v2310_v14  ;;  %v2715_v32 = vsel %vm2459_vm13, %v2306_v18, %v2587_v41 }
 0x3b5   : > { %v2718_v62 = vsel %vm2462_vm14, %v2308_v54, %v2590_v28  ;;  %4119 = vmatpush1.bf16.msra.mxu1 %v5627_v4 }
 0x3b6   : > { %v2313_v63 = vpop.f32.mrb[112].mxu1  ;;  %v2719_v21 = vsel %vm2463_vm15, %v2310_v14, %v2591_v52  ;;  %v2830_v36 = vpack.c.bf16 %v2718_v62, %v2714_v53 }
 0x3b7   : > { %v2314_v56 = vadd.f32 %v2313_v63, %v6943_v0  ;;  %v2315_v16 = vpop.f32.mrb[113].mxu1  ;;  %v2831_v13 = vpack.c.bf16 %v2719_v21, %v2715_v32 }
 0x3b8   : > { %v2316_v42 = vadd.f32 %v2315_v16, %v6946_v43  ;;  %v2317_v58 = vpop.f32.mrb[114].mxu1 }
 0x3b9   : > { %v2594_v46 = vmul.f32 0.01, %v2314_v56  ;;  %v2318_v37 = vadd.f32 %v2317_v58, %v6943_v0  ;;  %v2319_v17 = vpop.f32.mrb[115].mxu1  ;;  %3531 = vmatprep.mubr.bf16.mxu0 %v2831_v13  ;;  %vm2466_vm0 = vcmp.ge.f32.partialorder %v2314_v56, 0.0 }
 0x3ba   : > { %v2595_v26 = vmul.f32 0.01, %v2316_v42  ;;  %v2320_v20 = vadd.f32 %v2319_v17, %v6946_v43  ;;  %3532 = vmatmul.mubr.bf16.gmra.mrb[76].mxu0 %v2830_v36  ;;  %vm2467_vm1 = vcmp.ge.f32.partialorder %v2316_v42, 0.0 }
 0x3bb   : > { %vm2470_vm2 = vcmp.ge.f32.partialorder %v2318_v37, 0.0  ;;  %v2598_v19 = vmul.f32 0.01, %v2318_v37  ;;  %v2722_v38 = vsel %vm2466_vm0, %v2314_v56, %v2594_v46 }
 0x3bc   : > { %vm2471_vm3 = vcmp.ge.f32.partialorder %v2320_v20, 0.0  ;;  %v2599_v47 = vmul.f32 0.01, %v2320_v20  ;;  %v2723_v29 = vsel %vm2467_vm1, %v2316_v42, %v2595_v26 }
 0x3bd   : > { %v2726_v22 = vsel %vm2470_vm2, %v2318_v37, %v2598_v19 }
 0x3be   : > { %v2323_v48 = vpop.f32.mrb[116].mxu1  ;;  %v2727_v49 = vsel %vm2471_vm3, %v2320_v20, %v2599_v47  ;;  %v2834_v57 = vpack.c.bf16 %v2726_v22, %v2722_v38 }
 0x3bf   : > { %v2324_v39 = vadd.f32 %v2323_v48, %v6943_v0  ;;  %v2325_v34 = vpop.f32.mrb[117].mxu1  ;;  %v2835_v8 = vpack.c.bf16 %v2727_v49, %v2723_v29 }
 0x3c0   : > { %v2326_v60 = vadd.f32 %v2325_v34, %v6946_v43  ;;  %v2327_v44 = vpop.f32.mrb[118].mxu1 }
 0x3c1   : > { %v2602_v6 = vmul.f32 0.01, %v2324_v39  ;;  %v2328_v33 = vadd.f32 %v2327_v44, %v6943_v0  ;;  %v2329_v50 = vpop.f32.mrb[119].mxu1  ;;  %3541 = vmatprep.mubr.bf16.mxu0 %v2835_v8  ;;  %vm2474_vm4 = vcmp.ge.f32.partialorder %v2324_v39, 0.0 }
 0x3c2   : > { %v2603_v2 = vmul.f32 0.01, %v2326_v60  ;;  %v2330_v10 = vadd.f32 %v2329_v50, %v6946_v43  ;;  %3542 = vmatmul.mubr.bf16.gmra.mrb[80].mxu0 %v2834_v57  ;;  %vm2475_vm5 = vcmp.ge.f32.partialorder %v2326_v60, 0.0 }
 0x3c3   : > { %vm2478_vm6 = vcmp.ge.f32.partialorder %v2328_v33, 0.0  ;;  %v2606_v59 = vmul.f32 0.01, %v2328_v33  ;;  %v2730_v45 = vsel %vm2474_vm4, %v2324_v39, %v2602_v6 }
 0x3c4   : > { %vm2479_vm7 = vcmp.ge.f32.partialorder %v2330_v10, 0.0  ;;  %v2607_v15 = vmul.f32 0.01, %v2330_v10  ;;  %v2731_v9 = vsel %vm2475_vm5, %v2326_v60, %v2603_v2 }
 0x3c5   : > { %v2734_v31 = vsel %vm2478_vm6, %v2328_v33, %v2606_v59 }
 0x3c6   : > { %v2333_v7 = vpop.f32.mrb[120].mxu1  ;;  %v2735_v18 = vsel %vm2479_vm7, %v2330_v10, %v2607_v15  ;;  %v2838_v5 = vpack.c.bf16 %v2734_v31, %v2730_v45 }
 0x3c7   : > { %v2334_v35 = vadd.f32 %v2333_v7, %v6943_v0  ;;  %v2335_v54 = vpop.f32.mrb[121].mxu1  ;;  %v2839_v61 = vpack.c.bf16 %v2735_v18, %v2731_v9 }
 0x3c8   : > { %v2336_v11 = vadd.f32 %v2335_v54, %v6946_v43  ;;  %v2337_v41 = vpop.f32.mrb[122].mxu1 }
 0x3c9   : > { %v2610_v14 = vmul.f32 0.01, %v2334_v35  ;;  %v2338_v51 = vadd.f32 %v2337_v41, %v6943_v0  ;;  %v2339_v28 = vpop.f32.mrb[123].mxu1  ;;  %3551 = vmatprep.mubr.bf16.mxu0 %v2839_v61  ;;  %vm2482_vm8 = vcmp.ge.f32.partialorder %v2334_v35, 0.0 }
 0x3ca   : > { %v2611_v52 = vmul.f32 0.01, %v2336_v11  ;;  %v2340_v53 = vadd.f32 %v2339_v28, %v6946_v43  ;;  %3552 = vmatmul.mubr.bf16.gmra.mrb[84].mxu0 %v2838_v5  ;;  %vm2483_vm9 = vcmp.ge.f32.partialorder %v2336_v11, 0.0 }
 0x3cb   : > { %vm2486_vm10 = vcmp.ge.f32.partialorder %v2338_v51, 0.0  ;;  %v2614_v62 = vmul.f32 0.01, %v2338_v51  ;;  %v2738_v63 = vsel %vm2482_vm8, %v2334_v35, %v2610_v14 }
 0x3cc   : > { %vm2487_vm11 = vcmp.ge.f32.partialorder %v2340_v53, 0.0  ;;  %v2615_v40 = vmul.f32 0.01, %v2340_v53  ;;  %v2739_v36 = vsel %vm2483_vm9, %v2336_v11, %v2611_v52 }
 0x3cd   : > { %v2742_v32 = vsel %vm2486_vm10, %v2338_v51, %v2614_v62 }
 0x3ce   : > { %v2343_v21 = vpop.f32.mrb[124].mxu1  ;;  %v2743_v12 = vsel %vm2487_vm11, %v2340_v53, %v2615_v40  ;;  %v2842_v56 = vpack.c.bf16 %v2742_v32, %v2738_v63 }
 0x3cf   : > { %v2344_v16 = vadd.f32 %v2343_v21, %v6943_v0  ;;  %v2345_v13 = vpop.f32.mrb[125].mxu1  ;;  %v2843_v42 = vpack.c.bf16 %v2743_v12, %v2739_v36 }
 0x3d0   : > { %v2346_v58 = vadd.f32 %v2345_v13, %v6946_v43  ;;  %v2347_v46 = vpop.f32.mrb[126].mxu1 }
 0x3d1   : > { %v2618_v37 = vmul.f32 0.01, %v2344_v16  ;;  %v2348_v17 = vadd.f32 %v2347_v46, %v6943_v0  ;;  %v2349_v55 = vpop.f32.mrb[127].mxu1  ;;  %3561 = vmatprep.mubr.bf16.mxu0 %v2843_v42  ;;  %vm2490_vm12 = vcmp.ge.f32.partialorder %v2344_v16, 0.0 }
 0x3d2   : > { %v2619_v26 = vmul.f32 0.01, %v2346_v58  ;;  %v2350_v20 = vadd.f32 %v2349_v55, %v6946_v43  ;;  %3562 = vmatmul.mubr.bf16.gmra.mrb[88].mxu0 %v2842_v56  ;;  %vm2491_vm13 = vcmp.ge.f32.partialorder %v2346_v58, 0.0 }
 0x3d3   : > { %vm2494_vm14 = vcmp.ge.f32.partialorder %v2348_v17, 0.0  ;;  %v2622_v1 = vmul.f32 0.01, %v2348_v17  ;;  %v2746_v47 = vsel %vm2490_vm12, %v2344_v16, %v2618_v37 }
 0x3d4   : > { %vm2495_vm15 = vcmp.ge.f32.partialorder %v2350_v20, 0.0  ;;  %v2623_v19 = vmul.f32 0.01, %v2350_v20  ;;  %v2747_v27 = vsel %vm2491_vm13, %v2346_v58, %v2619_v26 }
 0x3d5   : > { %v2750_v38 = vsel %vm2494_vm14, %v2348_v17, %v2622_v1 }
 0x3d6   : > { %v2353_v22 = vpop.f32.mrb[128].mxu1  ;;  %v2751_v48 = vsel %vm2495_vm15, %v2350_v20, %v2623_v19  ;;  %v2846_v29 = vpack.c.bf16 %v2750_v38, %v2746_v47 }
 0x3d7   : > { %v2354_v49 = vadd.f32 %v2353_v22, %v6943_v0  ;;  %v2355_v57 = vpop.f32.mrb[129].mxu1  ;;  %v2847_v23 = vpack.c.bf16 %v2751_v48, %v2747_v27 }
 0x3d8   : > { %v2356_v39 = vadd.f32 %v2355_v57, %v6946_v43  ;;  %v2357_v34 = vpop.f32.mrb[130].mxu1 }
 0x3d9   : > { %v2626_v8 = vmul.f32 0.01, %v2354_v49  ;;  %v2358_v60 = vadd.f32 %v2357_v34, %v6943_v0  ;;  %v2359_v44 = vpop.f32.mrb[131].mxu1  ;;  %3571 = vmatprep.mubr.bf16.mxu0 %v2847_v23  ;;  %vm2498_vm0 = vcmp.ge.f32.partialorder %v2354_v49, 0.0 }
 0x3da   : > { %v2627_v6 = vmul.f32 0.01, %v2356_v39  ;;  %v2360_v33 = vadd.f32 %v2359_v44, %v6946_v43  ;;  %3572 = vmatmul.mubr.bf16.gmra.mrb[92].mxu0 %v2846_v29  ;;  %vm2499_vm1 = vcmp.ge.f32.partialorder %v2356_v39, 0.0 }
 0x3db   : > { %vm2502_vm2 = vcmp.ge.f32.partialorder %v2358_v60, 0.0  ;;  %v2630_v50 = vmul.f32 0.01, %v2358_v60  ;;  %v2754_v2 = vsel %vm2498_vm0, %v2354_v49, %v2626_v8 }
 0x3dc   : > { %vm2503_vm3 = vcmp.ge.f32.partialorder %v2360_v33, 0.0  ;;  %v2631_v24 = vmul.f32 0.01, %v2360_v33  ;;  %v2755_v59 = vsel %vm2499_vm1, %v2356_v39, %v2627_v6 }
 0x3dd   : > { %v2758_v10 = vsel %vm2502_vm2, %v2358_v60, %v2630_v50 }
 0x3de   : > { %v2363_v3 = vpop.f32.mrb[132].mxu1  ;;  %v2759_v15 = vsel %vm2503_vm3, %v2360_v33, %v2631_v24  ;;  %v2850_v45 = vpack.c.bf16 %v2758_v10, %v2754_v2 }
 0x3df   : > { %v2364_v31 = vadd.f32 %v2363_v3, %v6943_v0  ;;  %v2365_v4 = vpop.f32.mrb[133].mxu1  ;;  %v2851_v7 = vpack.c.bf16 %v2759_v15, %v2755_v59 }
 0x3e0   : > { %v2366_v9 = vadd.f32 %v2365_v4, %v6946_v43  ;;  %v2367_v18 = vpop.f32.mrb[134].mxu1 }
 0x3e1   : > { %v2634_v5 = vmul.f32 0.01, %v2364_v31  ;;  %v2368_v35 = vadd.f32 %v2367_v18, %v6943_v0  ;;  %v2369_v54 = vpop.f32.mrb[135].mxu1  ;;  %3581 = vmatprep.mubr.bf16.mxu0 %v2851_v7  ;;  %vm2506_vm4 = vcmp.ge.f32.partialorder %v2364_v31, 0.0 }
 0x3e2   : > { %v2635_v61 = vmul.f32 0.01, %v2366_v9  ;;  %v2370_v11 = vadd.f32 %v2369_v54, %v6946_v43  ;;  %3582 = vmatmul.mubr.bf16.gmra.mrb[96].mxu0 %v2850_v45  ;;  %vm2507_vm5 = vcmp.ge.f32.partialorder %v2366_v9, 0.0  ;;  %v5630_v54 = vld [vmem:[#allocation13 + $0xf0] ss:$8 sps:$4 sm:$0xff]  }
 0x3e3   : > { %vm2510_vm6 = vcmp.ge.f32.partialorder %v2368_v35, 0.0  ;;  %v2638_v41 = vmul.f32 0.01, %v2368_v35  ;;  %v2762_v51 = vsel %vm2506_vm4, %v2364_v31, %v2634_v5  ;;  %v5632_v5 = vld [vmem:[#allocation13 + $0xf4] ss:$8 sps:$4 sm:$0xff]  }
 0x3e4   : > { %vm2511_vm7 = vcmp.ge.f32.partialorder %v2370_v11, 0.0  ;;  %v2639_v14 = vmul.f32 0.01, %v2370_v11  ;;  %v2763_v53 = vsel %vm2507_vm5, %v2366_v9, %v2635_v61  ;;  %4120 = vmatprep.subr.bf16.mxu1 %v5632_v5 }
 0x3e5   : > { %v2766_v28 = vsel %vm2510_vm6, %v2368_v35, %v2638_v41  ;;  %4121 = vmatpush1.bf16.msra.mxu1 %v5630_v54 }
 0x3e6   : > { %v2373_v52 = vpop.f32.mrb[136].mxu1  ;;  %v2767_v62 = vsel %vm2511_vm7, %v2370_v11, %v2639_v14  ;;  %v2854_v40 = vpack.c.bf16 %v2766_v28, %v2762_v51 }
 0x3e7   : > { %v2374_v63 = vadd.f32 %v2373_v52, %v6943_v0  ;;  %v2375_v32 = vpop.f32.mrb[137].mxu1  ;;  %v2855_v21 = vpack.c.bf16 %v2767_v62, %v2763_v53 }
 0x3e8   : > { %v2376_v36 = vadd.f32 %v2375_v32, %v6946_v43  ;;  %v2377_v12 = vpop.f32.mrb[138].mxu1 }
 0x3e9   : > { %v2642_v56 = vmul.f32 0.01, %v2374_v63  ;;  %v2378_v16 = vadd.f32 %v2377_v12, %v6943_v0  ;;  %v2379_v13 = vpop.f32.mrb[139].mxu1  ;;  %3591 = vmatprep.mubr.bf16.mxu0 %v2855_v21  ;;  %vm2514_vm8 = vcmp.ge.f32.partialorder %v2374_v63, 0.0 }
 0x3ea   : > { %v2643_v42 = vmul.f32 0.01, %v2376_v36  ;;  %v2380_v58 = vadd.f32 %v2379_v13, %v6946_v43  ;;  %3592 = vmatmul.mubr.bf16.gmra.mrb[100].mxu0 %v2854_v40  ;;  %vm2515_vm9 = vcmp.ge.f32.partialorder %v2376_v36, 0.0 }
 0x3eb   : > { %vm2518_vm10 = vcmp.ge.f32.partialorder %v2378_v16, 0.0  ;;  %v2646_v46 = vmul.f32 0.01, %v2378_v16  ;;  %v2770_v17 = vsel %vm2514_vm8, %v2374_v63, %v2642_v56 }
 0x3ec   : > { %vm2519_vm11 = vcmp.ge.f32.partialorder %v2380_v58, 0.0  ;;  %v2647_v37 = vmul.f32 0.01, %v2380_v58  ;;  %v2771_v20 = vsel %vm2515_vm9, %v2376_v36, %v2643_v42 }
 0x3ed   : > { %v2774_v55 = vsel %vm2518_vm10, %v2378_v16, %v2646_v46 }
 0x3ee   : > { %v2383_v26 = vpop.f32.mrb[140].mxu1  ;;  %v2775_v1 = vsel %vm2519_vm11, %v2380_v58, %v2647_v37  ;;  %v2858_v19 = vpack.c.bf16 %v2774_v55, %v2770_v17 }
 0x3ef   : > { %v2384_v47 = vadd.f32 %v2383_v26, %v6943_v0  ;;  %v2385_v38 = vpop.f32.mrb[141].mxu1  ;;  %v2859_v22 = vpack.c.bf16 %v2775_v1, %v2771_v20 }
 0x3f0   : > { %v2386_v27 = vadd.f32 %v2385_v38, %v6946_v43  ;;  %v2387_v48 = vpop.f32.mrb[142].mxu1 }
 0x3f1   : > { %v2650_v29 = vmul.f32 0.01, %v2384_v47  ;;  %v2388_v49 = vadd.f32 %v2387_v48, %v6943_v0  ;;  %v2389_v57 = vpop.f32.mrb[143].mxu1  ;;  %3601 = vmatprep.mubr.bf16.mxu0 %v2859_v22  ;;  %vm2522_vm12 = vcmp.ge.f32.partialorder %v2384_v47, 0.0 }
 0x3f2   : > { %v2651_v23 = vmul.f32 0.01, %v2386_v27  ;;  %v2390_v39 = vadd.f32 %v2389_v57, %v6946_v43  ;;  %3602 = vmatmul.mubr.bf16.gmra.mrb[104].mxu0 %v2858_v19  ;;  %vm2523_vm13 = vcmp.ge.f32.partialorder %v2386_v27, 0.0 }
 0x3f3   : > { %vm2526_vm14 = vcmp.ge.f32.partialorder %v2388_v49, 0.0  ;;  %v2654_v34 = vmul.f32 0.01, %v2388_v49  ;;  %v2778_v60 = vsel %vm2522_vm12, %v2384_v47, %v2650_v29 }
 0x3f4   : > { %vm2527_vm15 = vcmp.ge.f32.partialorder %v2390_v39, 0.0  ;;  %v2655_v8 = vmul.f32 0.01, %v2390_v39  ;;  %v2779_v33 = vsel %vm2523_vm13, %v2386_v27, %v2651_v23 }
 0x3f5   : > { %v2782_v44 = vsel %vm2526_vm14, %v2388_v49, %v2654_v34 }
 0x3f6   : > { %v2393_v6 = vpop.f32.mrb[144].mxu1  ;;  %v2783_v50 = vsel %vm2527_vm15, %v2390_v39, %v2655_v8  ;;  %v2862_v24 = vpack.c.bf16 %v2782_v44, %v2778_v60 }
 0x3f7   : > { %v2394_v2 = vadd.f32 %v2393_v6, %v6943_v0  ;;  %v2395_v10 = vpop.f32.mrb[145].mxu1  ;;  %v2863_v3 = vpack.c.bf16 %v2783_v50, %v2779_v33 }
 0x3f8   : > { %v2396_v59 = vadd.f32 %v2395_v10, %v6946_v43  ;;  %v2397_v15 = vpop.f32.mrb[146].mxu1 }
 0x3f9   : > { %v2658_v45 = vmul.f32 0.01, %v2394_v2  ;;  %v2398_v31 = vadd.f32 %v2397_v15, %v6943_v0  ;;  %v2399_v4 = vpop.f32.mrb[147].mxu1  ;;  %3611 = vmatprep.mubr.bf16.mxu0 %v2863_v3  ;;  %vm2530_vm0 = vcmp.ge.f32.partialorder %v2394_v2, 0.0 }
 0x3fa   : > { %v2659_v7 = vmul.f32 0.01, %v2396_v59  ;;  %v2400_v9 = vadd.f32 %v2399_v4, %v6946_v43  ;;  %3612 = vmatmul.mubr.bf16.gmra.mrb[108].mxu0 %v2862_v24  ;;  %vm2531_vm1 = vcmp.ge.f32.partialorder %v2396_v59, 0.0 }
 0x3fb   : > { %vm2534_vm2 = vcmp.ge.f32.partialorder %v2398_v31, 0.0  ;;  %v2662_v18 = vmul.f32 0.01, %v2398_v31  ;;  %v2786_v61 = vsel %vm2530_vm0, %v2394_v2, %v2658_v45 }
 0x3fc   : > { %vm2535_vm3 = vcmp.ge.f32.partialorder %v2400_v9, 0.0  ;;  %v2663_v35 = vmul.f32 0.01, %v2400_v9  ;;  %v2787_v14 = vsel %vm2531_vm1, %v2396_v59, %v2659_v7 }
 0x3fd   : > { %v2790_v11 = vsel %vm2534_vm2, %v2398_v31, %v2662_v18 }
 0x3fe   : > { %v2403_v41 = vpop.f32.mrb[148].mxu1  ;;  %v2791_v51 = vsel %vm2535_vm3, %v2400_v9, %v2663_v35  ;;  %v2866_v28 = vpack.c.bf16 %v2790_v11, %v2786_v61 }
 0x3ff   : > { %v2404_v52 = vadd.f32 %v2403_v41, %v6943_v0  ;;  %v2405_v53 = vpop.f32.mrb[149].mxu1  ;;  %v2867_v62 = vpack.c.bf16 %v2791_v51, %v2787_v14 }
 0x400   : > { %v2406_v40 = vadd.f32 %v2405_v53, %v6946_v43  ;;  %v2407_v63 = vpop.f32.mrb[150].mxu1 }
 0x401   : > { %v2666_v32 = vmul.f32 0.01, %v2404_v52  ;;  %v2408_v21 = vadd.f32 %v2407_v63, %v6943_v0  ;;  %v2409_v36 = vpop.f32.mrb[151].mxu1  ;;  %3621 = vmatprep.mubr.bf16.mxu0 %v2867_v62  ;;  %vm2538_vm4 = vcmp.ge.f32.partialorder %v2404_v52, 0.0 }
 0x402   : > { %v2667_v12 = vmul.f32 0.01, %v2406_v40  ;;  %v2410_v56 = vadd.f32 %v2409_v36, %v6946_v43  ;;  %3622 = vmatmul.mubr.bf16.gmra.mrb[112].mxu0 %v2866_v28  ;;  %vm2539_vm5 = vcmp.ge.f32.partialorder %v2406_v40, 0.0 }
 0x403   : > { %vm2542_vm6 = vcmp.ge.f32.partialorder %v2408_v21, 0.0  ;;  %v2670_v16 = vmul.f32 0.01, %v2408_v21  ;;  %v2794_v42 = vsel %vm2538_vm4, %v2404_v52, %v2666_v32 }
 0x404   : > { %vm2543_vm7 = vcmp.ge.f32.partialorder %v2410_v56, 0.0  ;;  %v2671_v13 = vmul.f32 0.01, %v2410_v56  ;;  %v2795_v37 = vsel %vm2539_vm5, %v2406_v40, %v2667_v12 }
 0x405   : > { %v2798_v58 = vsel %vm2542_vm6, %v2408_v21, %v2670_v16 }
 0x406   : > { %v2413_v46 = vpop.f32.mrb[152].mxu1  ;;  %v2799_v17 = vsel %vm2543_vm7, %v2410_v56, %v2671_v13  ;;  %v2870_v55 = vpack.c.bf16 %v2798_v58, %v2794_v42 }
 0x407   : > { %v2414_v26 = vadd.f32 %v2413_v46, %v6943_v0  ;;  %v2415_v20 = vpop.f32.mrb[153].mxu1  ;;  %v2871_v1 = vpack.c.bf16 %v2799_v17, %v2795_v37 }
 0x408   : > { %v2416_v19 = vadd.f32 %v2415_v20, %v6946_v43  ;;  %v2417_v47 = vpop.f32.mrb[154].mxu1 }
 0x409   : > { %v2674_v38 = vmul.f32 0.01, %v2414_v26  ;;  %v2418_v22 = vadd.f32 %v2417_v47, %v6943_v0  ;;  %v2419_v27 = vpop.f32.mrb[155].mxu1  ;;  %3631 = vmatprep.mubr.bf16.mxu0 %v2871_v1  ;;  %vm2546_vm8 = vcmp.ge.f32.partialorder %v2414_v26, 0.0 }
 0x40a   : > { %v2675_v48 = vmul.f32 0.01, %v2416_v19  ;;  %v2420_v29 = vadd.f32 %v2419_v27, %v6946_v43  ;;  %3632 = vmatmul.mubr.bf16.gmra.mrb[116].mxu0 %v2870_v55  ;;  %vm2547_vm9 = vcmp.ge.f32.partialorder %v2416_v19, 0.0 }
 0x40b   : > { %vm2550_vm10 = vcmp.ge.f32.partialorder %v2418_v22, 0.0  ;;  %v2678_v49 = vmul.f32 0.01, %v2418_v22  ;;  %v2802_v23 = vsel %vm2546_vm8, %v2414_v26, %v2674_v38 }
 0x40c   : > { %vm2551_vm11 = vcmp.ge.f32.partialorder %v2420_v29, 0.0  ;;  %v2679_v57 = vmul.f32 0.01, %v2420_v29  ;;  %v2803_v8 = vsel %vm2547_vm9, %v2416_v19, %v2675_v48 }
 0x40d   : > { %v2806_v39 = vsel %vm2550_vm10, %v2418_v22, %v2678_v49 }
 0x40e   : > { %v2423_v34 = vpop.f32.mrb[156].mxu1  ;;  %v2807_v60 = vsel %vm2551_vm11, %v2420_v29, %v2679_v57  ;;  %v2874_v44 = vpack.c.bf16 %v2806_v39, %v2802_v23 }
 0x40f   : > { %v2424_v6 = vadd.f32 %v2423_v34, %v6943_v0  ;;  %v2425_v33 = vpop.f32.mrb[157].mxu1  ;;  %v2875_v50 = vpack.c.bf16 %v2807_v60, %v2803_v8 }
 0x410   : > { %v2426_v24 = vadd.f32 %v2425_v33, %v6946_v43  ;;  %v2427_v2 = vpop.f32.mrb[158].mxu1 }
 0x411   : > { %v2682_v10 = vmul.f32 0.01, %v2424_v6  ;;  %v2428_v3 = vadd.f32 %v2427_v2, %v6943_v0  ;;  %v2429_v59 = vpop.f32.mrb[159].mxu1  ;;  %3641 = vmatprep.mubr.bf16.mxu0 %v2875_v50  ;;  %vm2554_vm12 = vcmp.ge.f32.partialorder %v2424_v6, 0.0  ;;  %v2944_v0 = vld [vmem:[%s7373_s26] sm:$0x3] }
 0x412   : > { %v2683_v15 = vmul.f32 0.01, %v2426_v24  ;;  %v2430_v45 = vadd.f32 %v2429_v59, %v6946_v43  ;;  %3642 = vmatmul.mubr.bf16.gmra.mrb[120].mxu0 %v2874_v44  ;;  %vm2555_vm13 = vcmp.ge.f32.partialorder %v2426_v24, 0.0  ;;  %v7016_v43 = vrot.slane %v2944_v0, %v7370_v30 }
 0x413   : > { %vm2558_vm14 = vcmp.ge.f32.partialorder %v2428_v3, 0.0  ;;  %v2686_v31 = vmul.f32 0.01, %v2428_v3  ;;  %v2810_v7 = vsel %vm2554_vm12, %v2424_v6, %v2682_v10  ;;  %v7019_v61 = vrot.slane %v2944_v0, %v7371_v25 }
 0x414   : > { %vm2559_vm15 = vcmp.ge.f32.partialorder %v2430_v45, 0.0  ;;  %v2687_v4 = vmul.f32 0.01, %v2430_v45  ;;  %v2811_v18 = vsel %vm2555_vm13, %v2426_v24, %v2683_v15 }
 0x415   : > { %v2814_v9 = vsel %vm2558_vm14, %v2428_v3, %v2686_v31 }
 0x416   : > { %v2815_v5 = vsel %vm2559_vm15, %v2430_v45, %v2687_v4  ;;  %v2878_v35 = vpack.c.bf16 %v2814_v9, %v2810_v7 }
 0x417   : > { %v2879_v54 = vpack.c.bf16 %v2815_v5, %v2811_v18 }
 0x419   : > { %3651 = vmatprep.mubr.bf16.mxu0 %v2879_v54 }
 0x41a   : > { %3652 = vmatmul.mubr.bf16.gmra.mrb[124].mxu0 %v2878_v35 }
 0x475   : > { %v3503_v11 = vpop.f32.mrb[64].mxu0 }
 0x476   : > { %v5052_v41 = vadd.f32 %v3503_v11, %v7016_v43  ;;  %v3505_v14 = vpop.f32.mrb[65].mxu0 }
 0x477   : > { %v5053_v51 = vadd.f32 %v3505_v14, %v7019_v61  ;;  %v3507_v28 = vpop.f32.mrb[66].mxu0 }
 0x478   : > { %v3726_v52 = vmul.f32 0.01, %v5052_v41  ;;  %v5054_v53 = vadd.f32 %v3507_v28, %v7016_v43  ;;  %v3509_v62 = vpop.f32.mrb[67].mxu0  ;;  %vm3662_vm0 = vcmp.ge.f32.partialorder %v5052_v41, 0.0 }
 0x479   : > { %v3727_v40 = vmul.f32 0.01, %v5053_v51  ;;  %v5055_v63 = vadd.f32 %v3509_v62, %v7019_v61  ;;  %vm3663_vm1 = vcmp.ge.f32.partialorder %v5053_v51, 0.0 }
 0x47a   : > { %vm3664_vm2 = vcmp.ge.f32.partialorder %v5054_v53, 0.0  ;;  %v3728_v32 = vmul.f32 0.01, %v5054_v53  ;;  %v3790_v36 = vsel %vm3662_vm0, %v5052_v41, %v3726_v52 }
 0x47b   : > { %vm3665_vm3 = vcmp.ge.f32.partialorder %v5055_v63, 0.0  ;;  %v3729_v21 = vmul.f32 0.01, %v5055_v63  ;;  %v3791_v13 = vsel %vm3663_vm1, %v5053_v51, %v3727_v40 }
 0x47c   : > { %v3792_v12 = vsel %vm3664_vm2, %v5054_v53, %v3728_v32 }
 0x47d   : > { %v3854_v56 = vpack.c.bf16 %v3792_v12, %v3790_v36  ;;  %v3513_v16 = vpop.f32.mrb[68].mxu0  ;;  %v3793_v42 = vsel %vm3665_vm3, %v5055_v63, %v3729_v21 }
 0x47e   : > { %v5056_v58 = vadd.f32 %v3513_v16, %v7016_v43  ;;  %v3515_v46 = vpop.f32.mrb[69].mxu0  ;;  %v3855_v37 = vpack.c.bf16 %v3793_v42, %v3791_v13 }
 0x47f   : > { %v5057_v17 = vadd.f32 %v3515_v46, %v7019_v61  ;;  %v3517_v55 = vpop.f32.mrb[70].mxu0 }
 0x480   : > { %v3730_v26 = vmul.f32 0.01, %v5056_v58  ;;  %v5058_v20 = vadd.f32 %v3517_v55, %v7016_v43  ;;  %v3519_v1 = vpop.f32.mrb[71].mxu0  ;;  %4122 = vmatprep.mubr.bf16.mxu1 %v3855_v37  ;;  %vm3666_vm4 = vcmp.ge.f32.partialorder %v5056_v58, 0.0 }
 0x481   : > { %v3731_v19 = vmul.f32 0.01, %v5057_v17  ;;  %v5059_v47 = vadd.f32 %v3519_v1, %v7019_v61  ;;  %4123 = vmatmul.mubr.bf16.vlgmr.msra.gmra.mrb[160].mxu1 %v3854_v56  ;;  %vm3667_vm5 = vcmp.ge.f32.partialorder %v5057_v17, 0.0 }
 0x482   : > { %vm3668_vm6 = vcmp.ge.f32.partialorder %v5058_v20, 0.0  ;;  %v3732_v38 = vmul.f32 0.01, %v5058_v20  ;;  %v3794_v27 = vsel %vm3666_vm4, %v5056_v58, %v3730_v26 }
 0x483   : > { %vm3669_vm7 = vcmp.ge.f32.partialorder %v5059_v47, 0.0  ;;  %v3733_v22 = vmul.f32 0.01, %v5059_v47  ;;  %v3795_v49 = vsel %vm3667_vm5, %v5057_v17, %v3731_v19 }
 0x484   : > { %v3796_v48 = vsel %vm3668_vm6, %v5058_v20, %v3732_v38 }
 0x485   : > { %v3523_v29 = vpop.f32.mrb[72].mxu0  ;;  %v3797_v57 = vsel %vm3669_vm7, %v5059_v47, %v3733_v22  ;;  %v3856_v23 = vpack.c.bf16 %v3796_v48, %v3794_v27 }
 0x486   : > { %v5060_v39 = vadd.f32 %v3523_v29, %v7016_v43  ;;  %v3525_v34 = vpop.f32.mrb[73].mxu0  ;;  %v3857_v8 = vpack.c.bf16 %v3797_v57, %v3795_v49 }
 0x487   : > { %v5061_v60 = vadd.f32 %v3525_v34, %v7019_v61  ;;  %v3527_v44 = vpop.f32.mrb[74].mxu0 }
 0x488   : > { %v3734_v6 = vmul.f32 0.01, %v5060_v39  ;;  %v5062_v33 = vadd.f32 %v3527_v44, %v7016_v43  ;;  %v3529_v50 = vpop.f32.mrb[75].mxu0  ;;  %4132 = vmatprep.mubr.bf16.mxu1 %v3857_v8  ;;  %vm3670_vm8 = vcmp.ge.f32.partialorder %v5060_v39, 0.0 }
 0x489   : > { %v3735_v24 = vmul.f32 0.01, %v5061_v60  ;;  %v5063_v2 = vadd.f32 %v3529_v50, %v7019_v61  ;;  %4133 = vmatmul.mubr.bf16.gmra.mrb[164].mxu1 %v3856_v23  ;;  %vm3671_vm9 = vcmp.ge.f32.partialorder %v5061_v60, 0.0 }
 0x48a   : > { %vm3672_vm10 = vcmp.ge.f32.partialorder %v5062_v33, 0.0  ;;  %v3736_v10 = vmul.f32 0.01, %v5062_v33  ;;  %v3798_v59 = vsel %vm3670_vm8, %v5060_v39, %v3734_v6 }
 0x48b   : > { %vm3673_vm11 = vcmp.ge.f32.partialorder %v5063_v2, 0.0  ;;  %v3737_v3 = vmul.f32 0.01, %v5063_v2  ;;  %v3799_v31 = vsel %vm3671_vm9, %v5061_v60, %v3735_v24 }
 0x48c   : > { %v3800_v15 = vsel %vm3672_vm10, %v5062_v33, %v3736_v10 }
 0x48d   : > { %v3533_v45 = vpop.f32.mrb[76].mxu0  ;;  %v3801_v4 = vsel %vm3673_vm11, %v5063_v2, %v3737_v3  ;;  %v3858_v7 = vpack.c.bf16 %v3800_v15, %v3798_v59 }
 0x48e   : > { %v5064_v9 = vadd.f32 %v3533_v45, %v7016_v43  ;;  %v3535_v18 = vpop.f32.mrb[77].mxu0  ;;  %v3859_v5 = vpack.c.bf16 %v3801_v4, %v3799_v31 }
 0x48f   : > { %v5065_v35 = vadd.f32 %v3535_v18, %v7019_v61  ;;  %v3537_v54 = vpop.f32.mrb[78].mxu0 }
 0x490   : > { %v3738_v0 = vmul.f32 0.01, %v5064_v9  ;;  %v5066_v11 = vadd.f32 %v3537_v54, %v7016_v43  ;;  %v3539_v41 = vpop.f32.mrb[79].mxu0  ;;  %4142 = vmatprep.mubr.bf16.mxu1 %v3859_v5  ;;  %vm3674_vm12 = vcmp.ge.f32.partialorder %v5064_v9, 0.0 }
 0x491   : > { %v3739_v14 = vmul.f32 0.01, %v5065_v35  ;;  %v5067_v51 = vadd.f32 %v3539_v41, %v7019_v61  ;;  %4143 = vmatmul.mubr.bf16.gmra.mrb[168].mxu1 %v3858_v7  ;;  %vm3675_vm13 = vcmp.ge.f32.partialorder %v5065_v35, 0.0 }
 0x492   : > { %vm3676_vm14 = vcmp.ge.f32.partialorder %v5066_v11, 0.0  ;;  %v3740_v28 = vmul.f32 0.01, %v5066_v11  ;;  %v3802_v53 = vsel %vm3674_vm12, %v5064_v9, %v3738_v0 }
 0x493   : > { %vm3677_vm15 = vcmp.ge.f32.partialorder %v5067_v51, 0.0  ;;  %v3741_v52 = vmul.f32 0.01, %v5067_v51  ;;  %v3803_v63 = vsel %vm3675_vm13, %v5065_v35, %v3739_v14 }
 0x494   : > { %v3804_v62 = vsel %vm3676_vm14, %v5066_v11, %v3740_v28 }
 0x495   : > { %v3543_v40 = vpop.f32.mrb[80].mxu0  ;;  %v3805_v32 = vsel %vm3677_vm15, %v5067_v51, %v3741_v52  ;;  %v3860_v21 = vpack.c.bf16 %v3804_v62, %v3802_v53 }
 0x496   : > { %v5068_v36 = vadd.f32 %v3543_v40, %v7016_v43  ;;  %v3545_v12 = vpop.f32.mrb[81].mxu0  ;;  %v3861_v56 = vpack.c.bf16 %v3805_v32, %v3803_v63 }
 0x497   : > { %v5069_v16 = vadd.f32 %v3545_v12, %v7019_v61  ;;  %v3547_v13 = vpop.f32.mrb[82].mxu0 }
 0x498   : > { %v3742_v42 = vmul.f32 0.01, %v5068_v36  ;;  %v5070_v58 = vadd.f32 %v3547_v13, %v7016_v43  ;;  %v3549_v46 = vpop.f32.mrb[83].mxu0  ;;  %4152 = vmatprep.mubr.bf16.mxu1 %v3861_v56  ;;  %vm3678_vm0 = vcmp.ge.f32.partialorder %v5068_v36, 0.0 }
 0x499   : > { %v3743_v37 = vmul.f32 0.01, %v5069_v16  ;;  %v5071_v17 = vadd.f32 %v3549_v46, %v7019_v61  ;;  %4153 = vmatmul.mubr.bf16.gmra.mrb[172].mxu1 %v3860_v21  ;;  %vm3679_vm1 = vcmp.ge.f32.partialorder %v5069_v16, 0.0 }
 0x49a   : > { %vm3680_vm2 = vcmp.ge.f32.partialorder %v5070_v58, 0.0  ;;  %v3744_v55 = vmul.f32 0.01, %v5070_v58  ;;  %v3806_v20 = vsel %vm3678_vm0, %v5068_v36, %v3742_v42 }
 0x49b   : > { %vm3681_vm3 = vcmp.ge.f32.partialorder %v5071_v17, 0.0  ;;  %v3745_v26 = vmul.f32 0.01, %v5071_v17  ;;  %v3807_v47 = vsel %vm3679_vm1, %v5069_v16, %v3743_v37 }
 0x49c   : > { %v3808_v1 = vsel %vm3680_vm2, %v5070_v58, %v3744_v55 }
 0x49d   : > { %v3553_v19 = vpop.f32.mrb[84].mxu0  ;;  %v3809_v38 = vsel %vm3681_vm3, %v5071_v17, %v3745_v26  ;;  %v3862_v22 = vpack.c.bf16 %v3808_v1, %v3806_v20 }
 0x49e   : > { %v5072_v27 = vadd.f32 %v3553_v19, %v7016_v43  ;;  %v3555_v48 = vpop.f32.mrb[85].mxu0  ;;  %v3863_v29 = vpack.c.bf16 %v3809_v38, %v3807_v47 }
 0x49f   : > { %v5073_v49 = vadd.f32 %v3555_v48, %v7019_v61  ;;  %v3557_v57 = vpop.f32.mrb[86].mxu0 }
 0x4a0   : > { %v3746_v23 = vmul.f32 0.01, %v5072_v27  ;;  %v5074_v39 = vadd.f32 %v3557_v57, %v7016_v43  ;;  %v3559_v34 = vpop.f32.mrb[87].mxu0  ;;  %4162 = vmatprep.mubr.bf16.mxu1 %v3863_v29  ;;  %vm3682_vm4 = vcmp.ge.f32.partialorder %v5072_v27, 0.0 }
 0x4a1   : > { %v3747_v8 = vmul.f32 0.01, %v5073_v49  ;;  %v5075_v60 = vadd.f32 %v3559_v34, %v7019_v61  ;;  %4163 = vmatmul.mubr.bf16.gmra.mrb[176].mxu1 %v3862_v22  ;;  %vm3683_vm5 = vcmp.ge.f32.partialorder %v5073_v49, 0.0 }
 0x4a2   : > { %vm3684_vm6 = vcmp.ge.f32.partialorder %v5074_v39, 0.0  ;;  %v3748_v44 = vmul.f32 0.01, %v5074_v39  ;;  %v3810_v33 = vsel %vm3682_vm4, %v5072_v27, %v3746_v23 }
 0x4a3   : > { %vm3685_vm7 = vcmp.ge.f32.partialorder %v5075_v60, 0.0  ;;  %v3749_v6 = vmul.f32 0.01, %v5075_v60  ;;  %v3811_v2 = vsel %vm3683_vm5, %v5073_v49, %v3747_v8 }
 0x4a4   : > { %v3812_v50 = vsel %vm3684_vm6, %v5074_v39, %v3748_v44 }
 0x4a5   : > { %v3563_v24 = vpop.f32.mrb[88].mxu0  ;;  %v3813_v10 = vsel %vm3685_vm7, %v5075_v60, %v3749_v6  ;;  %v3864_v3 = vpack.c.bf16 %v3812_v50, %v3810_v33 }
 0x4a6   : > { %v5076_v59 = vadd.f32 %v3563_v24, %v7016_v43  ;;  %v3565_v15 = vpop.f32.mrb[89].mxu0  ;;  %v3865_v45 = vpack.c.bf16 %v3813_v10, %v3811_v2 }
 0x4a7   : > { %v5077_v31 = vadd.f32 %v3565_v15, %v7019_v61  ;;  %v3567_v4 = vpop.f32.mrb[90].mxu0 }
 0x4a8   : > { %v3750_v7 = vmul.f32 0.01, %v5076_v59  ;;  %v5078_v9 = vadd.f32 %v3567_v4, %v7016_v43  ;;  %v3569_v18 = vpop.f32.mrb[91].mxu0  ;;  %4172 = vmatprep.mubr.bf16.mxu1 %v3865_v45  ;;  %vm3686_vm8 = vcmp.ge.f32.partialorder %v5076_v59, 0.0 }
 0x4a9   : > { %v3751_v5 = vmul.f32 0.01, %v5077_v31  ;;  %v5079_v35 = vadd.f32 %v3569_v18, %v7019_v61  ;;  %4173 = vmatmul.mubr.bf16.gmra.mrb[180].mxu1 %v3864_v3  ;;  %vm3687_vm9 = vcmp.ge.f32.partialorder %v5077_v31, 0.0 }
 0x4aa   : > { %vm3688_vm10 = vcmp.ge.f32.partialorder %v5078_v9, 0.0  ;;  %v3752_v54 = vmul.f32 0.01, %v5078_v9  ;;  %v3814_v11 = vsel %vm3686_vm8, %v5076_v59, %v3750_v7 }
 0x4ab   : > { %vm3689_vm11 = vcmp.ge.f32.partialorder %v5079_v35, 0.0  ;;  %v3753_v0 = vmul.f32 0.01, %v5079_v35  ;;  %v3815_v51 = vsel %vm3687_vm9, %v5077_v31, %v3751_v5 }
 0x4ac   : > { %v3816_v41 = vsel %vm3688_vm10, %v5078_v9, %v3752_v54 }
 0x4ad   : > { %v3573_v14 = vpop.f32.mrb[92].mxu0  ;;  %v3817_v28 = vsel %vm3689_vm11, %v5079_v35, %v3753_v0  ;;  %v3866_v52 = vpack.c.bf16 %v3816_v41, %v3814_v11 }
 0x4ae   : > { %v5080_v53 = vadd.f32 %v3573_v14, %v7016_v43  ;;  %v3575_v62 = vpop.f32.mrb[93].mxu0  ;;  %v3867_v40 = vpack.c.bf16 %v3817_v28, %v3815_v51 }
 0x4af   : > { %v5081_v63 = vadd.f32 %v3575_v62, %v7019_v61  ;;  %v3577_v32 = vpop.f32.mrb[94].mxu0 }
 0x4b0   : > { %v3754_v21 = vmul.f32 0.01, %v5080_v53  ;;  %v5082_v36 = vadd.f32 %v3577_v32, %v7016_v43  ;;  %v3579_v12 = vpop.f32.mrb[95].mxu0  ;;  %4182 = vmatprep.mubr.bf16.mxu1 %v3867_v40  ;;  %vm3690_vm12 = vcmp.ge.f32.partialorder %v5080_v53, 0.0 }
 0x4b1   : > { %v3755_v56 = vmul.f32 0.01, %v5081_v63  ;;  %v5083_v16 = vadd.f32 %v3579_v12, %v7019_v61  ;;  %4183 = vmatmul.mubr.bf16.gmra.mrb[184].mxu1 %v3866_v52  ;;  %vm3691_vm13 = vcmp.ge.f32.partialorder %v5081_v63, 0.0 }
 0x4b2   : > { %vm3692_vm14 = vcmp.ge.f32.partialorder %v5082_v36, 0.0  ;;  %v3756_v13 = vmul.f32 0.01, %v5082_v36  ;;  %v3818_v58 = vsel %vm3690_vm12, %v5080_v53, %v3754_v21 }
 0x4b3   : > { %vm3693_vm15 = vcmp.ge.f32.partialorder %v5083_v16, 0.0  ;;  %v3757_v42 = vmul.f32 0.01, %v5083_v16  ;;  %v3819_v17 = vsel %vm3691_vm13, %v5081_v63, %v3755_v56 }
 0x4b4   : > { %v3820_v46 = vsel %vm3692_vm14, %v5082_v36, %v3756_v13 }
 0x4b5   : > { %v3583_v37 = vpop.f32.mrb[96].mxu0  ;;  %v3821_v55 = vsel %vm3693_vm15, %v5083_v16, %v3757_v42  ;;  %v3868_v26 = vpack.c.bf16 %v3820_v46, %v3818_v58 }
 0x4b6   : > { %v5084_v20 = vadd.f32 %v3583_v37, %v7016_v43  ;;  %v3585_v1 = vpop.f32.mrb[97].mxu0  ;;  %v3869_v19 = vpack.c.bf16 %v3821_v55, %v3819_v17 }
 0x4b7   : > { %v5085_v47 = vadd.f32 %v3585_v1, %v7019_v61  ;;  %v3587_v38 = vpop.f32.mrb[98].mxu0 }
 0x4b8   : > { %v3758_v22 = vmul.f32 0.01, %v5084_v20  ;;  %v5086_v27 = vadd.f32 %v3587_v38, %v7016_v43  ;;  %v3589_v48 = vpop.f32.mrb[99].mxu0  ;;  %4192 = vmatprep.mubr.bf16.mxu1 %v3869_v19  ;;  %vm3694_vm0 = vcmp.ge.f32.partialorder %v5084_v20, 0.0 }
 0x4b9   : > { %v3759_v29 = vmul.f32 0.01, %v5085_v47  ;;  %v5087_v49 = vadd.f32 %v3589_v48, %v7019_v61  ;;  %4193 = vmatmul.mubr.bf16.gmra.mrb[188].mxu1 %v3868_v26  ;;  %vm3695_vm1 = vcmp.ge.f32.partialorder %v5085_v47, 0.0 }
 0x4ba   : > { %vm3696_vm2 = vcmp.ge.f32.partialorder %v5086_v27, 0.0  ;;  %v3760_v57 = vmul.f32 0.01, %v5086_v27  ;;  %v3822_v39 = vsel %vm3694_vm0, %v5084_v20, %v3758_v22 }
 0x4bb   : > { %vm3697_vm3 = vcmp.ge.f32.partialorder %v5087_v49, 0.0  ;;  %v3761_v23 = vmul.f32 0.01, %v5087_v49  ;;  %v3823_v60 = vsel %vm3695_vm1, %v5085_v47, %v3759_v29 }
 0x4bc   : > { %v3824_v34 = vsel %vm3696_vm2, %v5086_v27, %v3760_v57 }
 0x4bd   : > { %v3593_v8 = vpop.f32.mrb[100].mxu0  ;;  %v3825_v44 = vsel %vm3697_vm3, %v5087_v49, %v3761_v23  ;;  %v3870_v6 = vpack.c.bf16 %v3824_v34, %v3822_v39 }
 0x4be   : > { %v5088_v33 = vadd.f32 %v3593_v8, %v7016_v43  ;;  %v3595_v50 = vpop.f32.mrb[101].mxu0  ;;  %v3871_v24 = vpack.c.bf16 %v3825_v44, %v3823_v60 }
 0x4bf   : > { %v5089_v2 = vadd.f32 %v3595_v50, %v7019_v61  ;;  %v3597_v10 = vpop.f32.mrb[102].mxu0 }
 0x4c0   : > { %v3762_v3 = vmul.f32 0.01, %v5088_v33  ;;  %v5090_v59 = vadd.f32 %v3597_v10, %v7016_v43  ;;  %v3599_v15 = vpop.f32.mrb[103].mxu0  ;;  %4202 = vmatprep.mubr.bf16.mxu1 %v3871_v24  ;;  %vm3698_vm4 = vcmp.ge.f32.partialorder %v5088_v33, 0.0 }
 0x4c1   : > { %v3763_v45 = vmul.f32 0.01, %v5089_v2  ;;  %v5091_v31 = vadd.f32 %v3599_v15, %v7019_v61  ;;  %4203 = vmatmul.mubr.bf16.gmra.mrb[192].mxu1 %v3870_v6  ;;  %vm3699_vm5 = vcmp.ge.f32.partialorder %v5089_v2, 0.0 }
 0x4c2   : > { %vm3700_vm6 = vcmp.ge.f32.partialorder %v5090_v59, 0.0  ;;  %v3764_v4 = vmul.f32 0.01, %v5090_v59  ;;  %v3826_v9 = vsel %vm3698_vm4, %v5088_v33, %v3762_v3 }
 0x4c3   : > { %vm3701_vm7 = vcmp.ge.f32.partialorder %v5091_v31, 0.0  ;;  %v3765_v7 = vmul.f32 0.01, %v5091_v31  ;;  %v3827_v35 = vsel %vm3699_vm5, %v5089_v2, %v3763_v45 }
 0x4c4   : > { %v3828_v18 = vsel %vm3700_vm6, %v5090_v59, %v3764_v4 }
 0x4c5   : > { %v3603_v5 = vpop.f32.mrb[104].mxu0  ;;  %v3829_v54 = vsel %vm3701_vm7, %v5091_v31, %v3765_v7  ;;  %v3872_v0 = vpack.c.bf16 %v3828_v18, %v3826_v9 }
 0x4c6   : > { %v5092_v11 = vadd.f32 %v3603_v5, %v7016_v43  ;;  %v3605_v41 = vpop.f32.mrb[105].mxu0  ;;  %v3873_v14 = vpack.c.bf16 %v3829_v54, %v3827_v35 }
 0x4c7   : > { %v5093_v51 = vadd.f32 %v3605_v41, %v7019_v61  ;;  %v3607_v28 = vpop.f32.mrb[106].mxu0 }
 0x4c8   : > { %v3766_v52 = vmul.f32 0.01, %v5092_v11  ;;  %v5094_v53 = vadd.f32 %v3607_v28, %v7016_v43  ;;  %v3609_v62 = vpop.f32.mrb[107].mxu0  ;;  %4212 = vmatprep.mubr.bf16.mxu1 %v3873_v14  ;;  %vm3702_vm8 = vcmp.ge.f32.partialorder %v5092_v11, 0.0 }
 0x4c9   : > { %v3767_v40 = vmul.f32 0.01, %v5093_v51  ;;  %v5095_v63 = vadd.f32 %v3609_v62, %v7019_v61  ;;  %4213 = vmatmul.mubr.bf16.gmra.mrb[196].mxu1 %v3872_v0  ;;  %vm3703_vm9 = vcmp.ge.f32.partialorder %v5093_v51, 0.0 }
 0x4ca   : > { %vm3704_vm10 = vcmp.ge.f32.partialorder %v5094_v53, 0.0  ;;  %v3768_v32 = vmul.f32 0.01, %v5094_v53  ;;  %v3830_v36 = vsel %vm3702_vm8, %v5092_v11, %v3766_v52 }
 0x4cb   : > { %vm3705_vm11 = vcmp.ge.f32.partialorder %v5095_v63, 0.0  ;;  %v3769_v21 = vmul.f32 0.01, %v5095_v63  ;;  %v3831_v16 = vsel %vm3703_vm9, %v5093_v51, %v3767_v40 }
 0x4cc   : > { %v3832_v12 = vsel %vm3704_vm10, %v5094_v53, %v3768_v32 }
 0x4cd   : > { %v3613_v56 = vpop.f32.mrb[108].mxu0  ;;  %v3833_v13 = vsel %vm3705_vm11, %v5095_v63, %v3769_v21  ;;  %v3874_v42 = vpack.c.bf16 %v3832_v12, %v3830_v36 }
 0x4ce   : > { %v5096_v58 = vadd.f32 %v3613_v56, %v7016_v43  ;;  %v3615_v46 = vpop.f32.mrb[109].mxu0  ;;  %v3875_v37 = vpack.c.bf16 %v3833_v13, %v3831_v16 }
 0x4cf   : > { %v5097_v17 = vadd.f32 %v3615_v46, %v7019_v61  ;;  %v3617_v55 = vpop.f32.mrb[110].mxu0 }
 0x4d0   : > { %v3770_v26 = vmul.f32 0.01, %v5096_v58  ;;  %v5098_v20 = vadd.f32 %v3617_v55, %v7016_v43  ;;  %v3619_v1 = vpop.f32.mrb[111].mxu0  ;;  %4222 = vmatprep.mubr.bf16.mxu1 %v3875_v37  ;;  %vm3706_vm12 = vcmp.ge.f32.partialorder %v5096_v58, 0.0 }
 0x4d1   : > { %v3771_v19 = vmul.f32 0.01, %v5097_v17  ;;  %v5099_v47 = vadd.f32 %v3619_v1, %v7019_v61  ;;  %4223 = vmatmul.mubr.bf16.gmra.mrb[200].mxu1 %v3874_v42  ;;  %vm3707_vm13 = vcmp.ge.f32.partialorder %v5097_v17, 0.0 }
 0x4d2   : > { %vm3708_vm14 = vcmp.ge.f32.partialorder %v5098_v20, 0.0  ;;  %v3772_v38 = vmul.f32 0.01, %v5098_v20  ;;  %v3834_v27 = vsel %vm3706_vm12, %v5096_v58, %v3770_v26 }
 0x4d3   : > { %vm3709_vm15 = vcmp.ge.f32.partialorder %v5099_v47, 0.0  ;;  %v3773_v22 = vmul.f32 0.01, %v5099_v47  ;;  %v3835_v49 = vsel %vm3707_vm13, %v5097_v17, %v3771_v19 }
 0x4d4   : > { %v3836_v48 = vsel %vm3708_vm14, %v5098_v20, %v3772_v38 }
 0x4d5   : > { %v3623_v29 = vpop.f32.mrb[112].mxu0  ;;  %v3837_v57 = vsel %vm3709_vm15, %v5099_v47, %v3773_v22  ;;  %v3876_v23 = vpack.c.bf16 %v3836_v48, %v3834_v27 }
 0x4d6   : > { %v5100_v39 = vadd.f32 %v3623_v29, %v7016_v43  ;;  %v3625_v34 = vpop.f32.mrb[113].mxu0  ;;  %v3877_v8 = vpack.c.bf16 %v3837_v57, %v3835_v49 }
 0x4d7   : > { %v5101_v60 = vadd.f32 %v3625_v34, %v7019_v61  ;;  %v3627_v44 = vpop.f32.mrb[114].mxu0 }
 0x4d8   : > { %v3774_v6 = vmul.f32 0.01, %v5100_v39  ;;  %v5102_v33 = vadd.f32 %v3627_v44, %v7016_v43  ;;  %v3629_v50 = vpop.f32.mrb[115].mxu0  ;;  %4232 = vmatprep.mubr.bf16.mxu1 %v3877_v8  ;;  %vm3710_vm0 = vcmp.ge.f32.partialorder %v5100_v39, 0.0 }
 0x4d9   : > { %v3775_v24 = vmul.f32 0.01, %v5101_v60  ;;  %v5103_v2 = vadd.f32 %v3629_v50, %v7019_v61  ;;  %4233 = vmatmul.mubr.bf16.gmra.mrb[204].mxu1 %v3876_v23  ;;  %vm3711_vm1 = vcmp.ge.f32.partialorder %v5101_v60, 0.0 }
 0x4da   : > { %vm3712_vm2 = vcmp.ge.f32.partialorder %v5102_v33, 0.0  ;;  %v3776_v10 = vmul.f32 0.01, %v5102_v33  ;;  %v3838_v59 = vsel %vm3710_vm0, %v5100_v39, %v3774_v6 }
 0x4db   : > { %vm3713_vm3 = vcmp.ge.f32.partialorder %v5103_v2, 0.0  ;;  %v3777_v3 = vmul.f32 0.01, %v5103_v2  ;;  %v3839_v31 = vsel %vm3711_vm1, %v5101_v60, %v3775_v24 }
 0x4dc   : > { %v3840_v15 = vsel %vm3712_vm2, %v5102_v33, %v3776_v10 }
 0x4dd   : > { %v3633_v45 = vpop.f32.mrb[116].mxu0  ;;  %v3841_v4 = vsel %vm3713_vm3, %v5103_v2, %v3777_v3  ;;  %v3878_v7 = vpack.c.bf16 %v3840_v15, %v3838_v59 }
 0x4de   : > { %v5104_v9 = vadd.f32 %v3633_v45, %v7016_v43  ;;  %v3635_v18 = vpop.f32.mrb[117].mxu0  ;;  %v3879_v5 = vpack.c.bf16 %v3841_v4, %v3839_v31 }
 0x4df   : > { %v5105_v35 = vadd.f32 %v3635_v18, %v7019_v61  ;;  %v3637_v54 = vpop.f32.mrb[118].mxu0 }
 0x4e0   : > { %v3778_v0 = vmul.f32 0.01, %v5104_v9  ;;  %v5106_v11 = vadd.f32 %v3637_v54, %v7016_v43  ;;  %v3639_v41 = vpop.f32.mrb[119].mxu0  ;;  %4242 = vmatprep.mubr.bf16.mxu1 %v3879_v5  ;;  %vm3714_vm4 = vcmp.ge.f32.partialorder %v5104_v9, 0.0 }
 0x4e1   : > { %v3779_v14 = vmul.f32 0.01, %v5105_v35  ;;  %v5107_v51 = vadd.f32 %v3639_v41, %v7019_v61  ;;  %4243 = vmatmul.mubr.bf16.gmra.mrb[208].mxu1 %v3878_v7  ;;  %vm3715_vm5 = vcmp.ge.f32.partialorder %v5105_v35, 0.0 }
 0x4e2   : > { %vm3716_vm6 = vcmp.ge.f32.partialorder %v5106_v11, 0.0  ;;  %v3780_v28 = vmul.f32 0.01, %v5106_v11  ;;  %v3842_v53 = vsel %vm3714_vm4, %v5104_v9, %v3778_v0 }
 0x4e3   : > { %vm3717_vm7 = vcmp.ge.f32.partialorder %v5107_v51, 0.0  ;;  %v3781_v52 = vmul.f32 0.01, %v5107_v51  ;;  %v3843_v63 = vsel %vm3715_vm5, %v5105_v35, %v3779_v14 }
 0x4e4   : > { %v3844_v62 = vsel %vm3716_vm6, %v5106_v11, %v3780_v28 }
 0x4e5   : > { %v3643_v40 = vpop.f32.mrb[120].mxu0  ;;  %v3845_v32 = vsel %vm3717_vm7, %v5107_v51, %v3781_v52  ;;  %v3880_v21 = vpack.c.bf16 %v3844_v62, %v3842_v53 }
 0x4e6   : > { %v5108_v36 = vadd.f32 %v3643_v40, %v7016_v43  ;;  %v3645_v12 = vpop.f32.mrb[121].mxu0  ;;  %v3881_v56 = vpack.c.bf16 %v3845_v32, %v3843_v63 }
 0x4e7   : > { %v5109_v16 = vadd.f32 %v3645_v12, %v7019_v61  ;;  %v3647_v13 = vpop.f32.mrb[122].mxu0 }
 0x4e8   : > { %v3782_v42 = vmul.f32 0.01, %v5108_v36  ;;  %v5110_v58 = vadd.f32 %v3647_v13, %v7016_v43  ;;  %v3649_v46 = vpop.f32.mrb[123].mxu0  ;;  %4252 = vmatprep.mubr.bf16.mxu1 %v3881_v56  ;;  %vm3718_vm8 = vcmp.ge.f32.partialorder %v5108_v36, 0.0 }
 0x4e9   : > { %v3783_v37 = vmul.f32 0.01, %v5109_v16  ;;  %v5111_v17 = vadd.f32 %v3649_v46, %v7019_v61  ;;  %4253 = vmatmul.mubr.bf16.gmra.mrb[212].mxu1 %v3880_v21  ;;  %vm3719_vm9 = vcmp.ge.f32.partialorder %v5109_v16, 0.0 }
 0x4ea   : > { %vm3720_vm10 = vcmp.ge.f32.partialorder %v5110_v58, 0.0  ;;  %v3784_v55 = vmul.f32 0.01, %v5110_v58  ;;  %v3846_v20 = vsel %vm3718_vm8, %v5108_v36, %v3782_v42 }
 0x4eb   : > { %vm3721_vm11 = vcmp.ge.f32.partialorder %v5111_v17, 0.0  ;;  %v3785_v26 = vmul.f32 0.01, %v5111_v17  ;;  %v3847_v47 = vsel %vm3719_vm9, %v5109_v16, %v3783_v37 }
 0x4ec   : > { %v3848_v1 = vsel %vm3720_vm10, %v5110_v58, %v3784_v55 }
 0x4ed   : > { %v3653_v19 = vpop.f32.mrb[124].mxu0  ;;  %v3849_v38 = vsel %vm3721_vm11, %v5111_v17, %v3785_v26  ;;  %v3882_v22 = vpack.c.bf16 %v3848_v1, %v3846_v20 }
 0x4ee   : > { %v5112_v27 = vadd.f32 %v3653_v19, %v7016_v43  ;;  %v3655_v48 = vpop.f32.mrb[125].mxu0  ;;  %v3883_v29 = vpack.c.bf16 %v3849_v38, %v3847_v47 }
 0x4ef   : > { %v5113_v49 = vadd.f32 %v3655_v48, %v7019_v61  ;;  %v3657_v57 = vpop.f32.mrb[126].mxu0 }
 0x4f0   : > { %v3786_v23 = vmul.f32 0.01, %v5112_v27  ;;  %v5114_v39 = vadd.f32 %v3657_v57, %v7016_v43  ;;  %v3659_v34 = vpop.f32.mrb[127].mxu0  ;;  %4262 = vmatprep.mubr.bf16.mxu1 %v3883_v29  ;;  %vm3722_vm12 = vcmp.ge.f32.partialorder %v5112_v27, 0.0  ;;  %v3918_v43 = vld [vmem:[%s7374_s0] sm:$0x3] }
 0x4f1   : > { %v3787_v8 = vmul.f32 0.01, %v5113_v49  ;;  %v5115_v60 = vadd.f32 %v3659_v34, %v7019_v61  ;;  %4263 = vmatmul.mubr.bf16.gmra.mrb[216].mxu1 %v3882_v22  ;;  %vm3723_vm13 = vcmp.ge.f32.partialorder %v5113_v49, 0.0  ;;  %v7089_v61 = vrot.slane %v3918_v43, %v7370_v30 }
 0x4f2   : > { %vm3724_vm14 = vcmp.ge.f32.partialorder %v5114_v39, 0.0  ;;  %v3788_v44 = vmul.f32 0.01, %v5114_v39  ;;  %v3850_v33 = vsel %vm3722_vm12, %v5112_v27, %v3786_v23  ;;  %v7092_v59 = vrot.slane %v3918_v43, %v7371_v25 }
 0x4f3   : > { %vm3725_vm15 = vcmp.ge.f32.partialorder %v5115_v60, 0.0  ;;  %v3789_v6 = vmul.f32 0.01, %v5115_v60  ;;  %v3851_v24 = vsel %vm3723_vm13, %v5113_v49, %v3787_v8 }
 0x4f4   : > { %v3852_v50 = vsel %vm3724_vm14, %v5114_v39, %v3788_v44 }
 0x4f5   : > { %v3853_v2 = vsel %vm3725_vm15, %v5115_v60, %v3789_v6  ;;  %v3884_v10 = vpack.c.bf16 %v3852_v50, %v3850_v33 }
 0x4f6   : > { %v3885_v3 = vpack.c.bf16 %v3853_v2, %v3851_v24 }
 0x4f8   : > { %4272 = vmatprep.mubr.bf16.mxu1 %v3885_v3 }
 0x4f9   : > { %4273 = vmatmul.mubr.bf16.gmra.mrb[220].mxu1 %v3884_v10 }
 0x554   : > { %v4124_v15 = vpop.f32.mrb[160].mxu1 }
 0x555   : > { %v4125_v45 = vadd.f32 %v4124_v15, %v7089_v61  ;;  %v4126_v31 = vpop.f32.mrb[161].mxu1 }
 0x556   : > { %v4127_v4 = vadd.f32 %v4126_v31, %v7092_v59  ;;  %v4128_v7 = vpop.f32.mrb[162].mxu1 }
 0x557   : > { %v4283_v9 = vmul.f32 0.5, %v4125_v45  ;;  %v4129_v18 = vadd.f32 %v4128_v7, %v7089_v61  ;;  %v4130_v5 = vpop.f32.mrb[163].mxu1 }
 0x558   : > { %v4284_v35 = vmul.f32 0.5, %v4127_v4  ;;  %v4131_v54 = vadd.f32 %v4130_v5, %v7092_v59 }
 0x559   : > { %5633 = vtanh.f32 %v4283_v9  ;;  %v4285_v30 = vmul.f32 0.5, %v4129_v18 }
 0x55a   : > { %5635 = vtanh.f32 %v4284_v35  ;;  %v4286_v0 = vmul.f32 0.5, %v4131_v54 }
 0x55b   : > { %5637 = vtanh.f32 %v4285_v30 }
 0x55c   : > { %5639 = vtanh.f32 %v4286_v0  ;;  %v4134_v25 = vpop.f32.mrb[164].mxu1 }
 0x55d   : > { %v4135_v11 = vadd.f32 %v4134_v25, %v7089_v61  ;;  %v4136_v41 = vpop.f32.mrb[165].mxu1 }
 0x55e   : > { %v4137_v14 = vadd.f32 %v4136_v41, %v7092_v59  ;;  %v4138_v51 = vpop.f32.mrb[166].mxu1 }
 0x55f   : > { %v4287_v28 = vmul.f32 0.5, %v4135_v11  ;;  %v4139_v52 = vadd.f32 %v4138_v51, %v7089_v61  ;;  %v4140_v53 = vpop.f32.mrb[167].mxu1 }
 0x560   : > { %v4288_v62 = vmul.f32 0.5, %v4137_v14  ;;  %v4141_v40 = vadd.f32 %v4140_v53, %v7092_v59 }
 0x561   : > { %5641 = vtanh.f32 %v4287_v28  ;;  %v4289_v63 = vmul.f32 0.5, %v4139_v52 }
 0x562   : > { %5643 = vtanh.f32 %v4288_v62  ;;  %v4290_v32 = vmul.f32 0.5, %v4141_v40 }
 0x563   : > { %v5634_v21 = vpop.eup %5633  ;;  %5645 = vtanh.f32 %v4289_v63 }
 0x564   : > { %v5636_v36 = vpop.eup %5635  ;;  %v4411_v12 = vmul.f32 0.5, %v5634_v21  ;;  %5647 = vtanh.f32 %v4290_v32  ;;  %v4144_v56 = vpop.f32.mrb[168].mxu1 }
 0x565   : > { %v5638_v16 = vpop.eup %5637  ;;  %v4412_v13 = vmul.f32 0.5, %v5636_v36  ;;  %v4145_v42 = vadd.f32 %v4144_v56, %v7089_v61  ;;  %v4146_v58 = vpop.f32.mrb[169].mxu1 }
 0x566   : > { %v5640_v46 = vpop.eup %5639  ;;  %v4475_v37 = vadd.f32 0.5, %v4411_v12  ;;  %v4413_v17 = vmul.f32 0.5, %v5638_v16  ;;  %v4147_v55 = vadd.f32 %v4146_v58, %v7092_v59  ;;  %v4148_v26 = vpop.f32.mrb[170].mxu1 }
 0x567   : > { %v4476_v20 = vadd.f32 0.5, %v4412_v13  ;;  %v4414_v1 = vmul.f32 0.5, %v5640_v46  ;;  %v4291_v19 = vmul.f32 0.5, %v4145_v42  ;;  %v4149_v47 = vadd.f32 %v4148_v26, %v7089_v61  ;;  %v4150_v38 = vpop.f32.mrb[171].mxu1 }
 0x568   : > { %4539 = vst [vmem:[%s7107_s9] sm:$0xff] %v4475_v37  ;;  %v4477_v22 = vadd.f32 0.5, %v4413_v17  ;;  %v4292_v27 = vmul.f32 0.5, %v4147_v55  ;;  %v4151_v48 = vadd.f32 %v4150_v38, %v7092_v59 }
 0x569   : > { %4540 = vst [vmem:[%s7107_s9 + $0x8] sm:$0xff] %v4476_v20  ;;  %v4478_v29 = vadd.f32 0.5, %v4414_v1  ;;  %5649 = vtanh.f32 %v4291_v19  ;;  %v4293_v49 = vmul.f32 0.5, %v4149_v47 }
 0x56a   : > { %4541 = vst [vmem:[%s7107_s9 + $0x10] sm:$0xff] %v4477_v22  ;;  %5651 = vtanh.f32 %v4292_v27  ;;  %v4294_v57 = vmul.f32 0.5, %v4151_v48 }
 0x56b   : > { %v5642_v23 = vpop.eup %5641  ;;  %4542 = vst [vmem:[%s7107_s9 + $0x18] sm:$0xff] %v4478_v29  ;;  %5653 = vtanh.f32 %v4293_v49 }
 0x56c   : > { %v5644_v39 = vpop.eup %5643  ;;  %v4415_v34 = vmul.f32 0.5, %v5642_v23  ;;  %5655 = vtanh.f32 %v4294_v57  ;;  %v4154_v8 = vpop.f32.mrb[172].mxu1 }
 0x56d   : > { %v5646_v60 = vpop.eup %5645  ;;  %v4416_v44 = vmul.f32 0.5, %v5644_v39  ;;  %v4155_v6 = vadd.f32 %v4154_v8, %v7089_v61  ;;  %v4156_v33 = vpop.f32.mrb[173].mxu1 }
 0x56e   : > { %v5648_v50 = vpop.eup %5647  ;;  %v4479_v24 = vadd.f32 0.5, %v4415_v34  ;;  %v4417_v2 = vmul.f32 0.5, %v5646_v60  ;;  %v4157_v10 = vadd.f32 %v4156_v33, %v7092_v59  ;;  %v4158_v3 = vpop.f32.mrb[174].mxu1 }
 0x56f   : > { %v4480_v43 = vadd.f32 0.5, %v4416_v44  ;;  %v4418_v15 = vmul.f32 0.5, %v5648_v50  ;;  %v4295_v45 = vmul.f32 0.5, %v4155_v6  ;;  %v4159_v31 = vadd.f32 %v4158_v3, %v7089_v61  ;;  %v4160_v4 = vpop.f32.mrb[175].mxu1 }
 0x570   : > { %4543 = vst [vmem:[%s7107_s9 + $0x20] sm:$0xff] %v4479_v24  ;;  %v4481_v7 = vadd.f32 0.5, %v4417_v2  ;;  %v4296_v9 = vmul.f32 0.5, %v4157_v10  ;;  %v4161_v18 = vadd.f32 %v4160_v4, %v7092_v59 }
 0x571   : > { %4544 = vst [vmem:[%s7107_s9 + $0x28] sm:$0xff] %v4480_v43  ;;  %v4482_v5 = vadd.f32 0.5, %v4418_v15  ;;  %5657 = vtanh.f32 %v4295_v45  ;;  %v4297_v35 = vmul.f32 0.5, %v4159_v31 }
 0x572   : > { %4545 = vst [vmem:[%s7107_s9 + $0x30] sm:$0xff] %v4481_v7  ;;  %5659 = vtanh.f32 %v4296_v9  ;;  %v4298_v54 = vmul.f32 0.5, %v4161_v18 }
 0x573   : > { %v5650_v30 = vpop.eup %5649  ;;  %4546 = vst [vmem:[%s7107_s9 + $0x38] sm:$0xff] %v4482_v5  ;;  %5661 = vtanh.f32 %v4297_v35 }
 0x574   : > { %v5652_v0 = vpop.eup %5651  ;;  %v4419_v25 = vmul.f32 0.5, %v5650_v30  ;;  %5663 = vtanh.f32 %v4298_v54  ;;  %v4164_v11 = vpop.f32.mrb[176].mxu1 }
 0x575   : > { %v5654_v41 = vpop.eup %5653  ;;  %v4420_v14 = vmul.f32 0.5, %v5652_v0  ;;  %v4165_v51 = vadd.f32 %v4164_v11, %v7089_v61  ;;  %v4166_v28 = vpop.f32.mrb[177].mxu1 }
 0x576   : > { %v5656_v52 = vpop.eup %5655  ;;  %v4483_v53 = vadd.f32 0.5, %v4419_v25  ;;  %v4421_v62 = vmul.f32 0.5, %v5654_v41  ;;  %v4167_v40 = vadd.f32 %v4166_v28, %v7092_v59  ;;  %v4168_v63 = vpop.f32.mrb[178].mxu1 }
 0x577   : > { %v4484_v32 = vadd.f32 0.5, %v4420_v14  ;;  %v4422_v21 = vmul.f32 0.5, %v5656_v52  ;;  %v4299_v36 = vmul.f32 0.5, %v4165_v51  ;;  %v4169_v12 = vadd.f32 %v4168_v63, %v7089_v61  ;;  %v4170_v56 = vpop.f32.mrb[179].mxu1 }
 0x578   : > { %4547 = vst [vmem:[%s7107_s9 + $0x40] sm:$0xff] %v4483_v53  ;;  %v4485_v16 = vadd.f32 0.5, %v4421_v62  ;;  %v4300_v13 = vmul.f32 0.5, %v4167_v40  ;;  %v4171_v42 = vadd.f32 %v4170_v56, %v7092_v59 }
 0x579   : > { %4548 = vst [vmem:[%s7107_s9 + $0x48] sm:$0xff] %v4484_v32  ;;  %v4486_v58 = vadd.f32 0.5, %v4422_v21  ;;  %5665 = vtanh.f32 %v4299_v36  ;;  %v4301_v46 = vmul.f32 0.5, %v4169_v12 }
 0x57a   : > { %4549 = vst [vmem:[%s7107_s9 + $0x50] sm:$0xff] %v4485_v16  ;;  %5667 = vtanh.f32 %v4300_v13  ;;  %v4302_v37 = vmul.f32 0.5, %v4171_v42 }
 0x57b   : > { %v5658_v17 = vpop.eup %5657  ;;  %4550 = vst [vmem:[%s7107_s9 + $0x58] sm:$0xff] %v4486_v58  ;;  %5669 = vtanh.f32 %v4301_v46 }
 0x57c   : > { %v5660_v55 = vpop.eup %5659  ;;  %v4423_v26 = vmul.f32 0.5, %v5658_v17  ;;  %5671 = vtanh.f32 %v4302_v37  ;;  %v4174_v20 = vpop.f32.mrb[180].mxu1 }
 0x57d   : > { %v5662_v1 = vpop.eup %5661  ;;  %v4424_v19 = vmul.f32 0.5, %v5660_v55  ;;  %v4175_v47 = vadd.f32 %v4174_v20, %v7089_v61  ;;  %v4176_v38 = vpop.f32.mrb[181].mxu1 }
 0x57e   : > { %v5664_v22 = vpop.eup %5663  ;;  %v4487_v27 = vadd.f32 0.5, %v4423_v26  ;;  %v4425_v48 = vmul.f32 0.5, %v5662_v1  ;;  %v4177_v29 = vadd.f32 %v4176_v38, %v7092_v59  ;;  %v4178_v49 = vpop.f32.mrb[182].mxu1 }
 0x57f   : > { %v4488_v57 = vadd.f32 0.5, %v4424_v19  ;;  %v4426_v23 = vmul.f32 0.5, %v5664_v22  ;;  %v4303_v39 = vmul.f32 0.5, %v4175_v47  ;;  %v4179_v34 = vadd.f32 %v4178_v49, %v7089_v61  ;;  %v4180_v8 = vpop.f32.mrb[183].mxu1 }
 0x580   : > { %4551 = vst [vmem:[%s7107_s9 + $0x60] sm:$0xff] %v4487_v27  ;;  %v4489_v60 = vadd.f32 0.5, %v4425_v48  ;;  %v4304_v44 = vmul.f32 0.5, %v4177_v29  ;;  %v4181_v6 = vadd.f32 %v4180_v8, %v7092_v59 }
 0x581   : > { %4552 = vst [vmem:[%s7107_s9 + $0x68] sm:$0xff] %v4488_v57  ;;  %v4490_v33 = vadd.f32 0.5, %v4426_v23  ;;  %5673 = vtanh.f32 %v4303_v39  ;;  %v4305_v50 = vmul.f32 0.5, %v4179_v34 }
 0x582   : > { %4553 = vst [vmem:[%s7107_s9 + $0x70] sm:$0xff] %v4489_v60  ;;  %5675 = vtanh.f32 %v4304_v44  ;;  %v4306_v24 = vmul.f32 0.5, %v4181_v6 }
 0x583   : > { %v5666_v2 = vpop.eup %5665  ;;  %4554 = vst [vmem:[%s7107_s9 + $0x78] sm:$0xff] %v4490_v33  ;;  %5677 = vtanh.f32 %v4305_v50 }
 0x584   : > { %v5668_v10 = vpop.eup %5667  ;;  %v4427_v3 = vmul.f32 0.5, %v5666_v2  ;;  %5679 = vtanh.f32 %v4306_v24  ;;  %v4184_v43 = vpop.f32.mrb[184].mxu1 }
 0x585   : > { %v5670_v15 = vpop.eup %5669  ;;  %v4428_v45 = vmul.f32 0.5, %v5668_v10  ;;  %v4185_v31 = vadd.f32 %v4184_v43, %v7089_v61  ;;  %v4186_v4 = vpop.f32.mrb[185].mxu1 }
 0x586   : > { %v5672_v7 = vpop.eup %5671  ;;  %v4491_v9 = vadd.f32 0.5, %v4427_v3  ;;  %v4429_v18 = vmul.f32 0.5, %v5670_v15  ;;  %v4187_v5 = vadd.f32 %v4186_v4, %v7092_v59  ;;  %v4188_v35 = vpop.f32.mrb[186].mxu1 }
 0x587   : > { %v4492_v54 = vadd.f32 0.5, %v4428_v45  ;;  %v4430_v30 = vmul.f32 0.5, %v5672_v7  ;;  %v4307_v0 = vmul.f32 0.5, %v4185_v31  ;;  %v4189_v25 = vadd.f32 %v4188_v35, %v7089_v61  ;;  %v4190_v11 = vpop.f32.mrb[187].mxu1 }
 0x588   : > { %4555 = vst [vmem:[%s7107_s9 + $0x80] sm:$0xff] %v4491_v9  ;;  %v4493_v41 = vadd.f32 0.5, %v4429_v18  ;;  %v4308_v14 = vmul.f32 0.5, %v4187_v5  ;;  %v4191_v51 = vadd.f32 %v4190_v11, %v7092_v59 }
 0x589   : > { %4556 = vst [vmem:[%s7107_s9 + $0x88] sm:$0xff] %v4492_v54  ;;  %v4494_v28 = vadd.f32 0.5, %v4430_v30  ;;  %5681 = vtanh.f32 %v4307_v0  ;;  %v4309_v52 = vmul.f32 0.5, %v4189_v25 }
 0x58a   : > { %4557 = vst [vmem:[%s7107_s9 + $0x90] sm:$0xff] %v4493_v41  ;;  %5683 = vtanh.f32 %v4308_v14  ;;  %v4310_v53 = vmul.f32 0.5, %v4191_v51 }
 0x58b   : > { %v5674_v62 = vpop.eup %5673  ;;  %4558 = vst [vmem:[%s7107_s9 + $0x98] sm:$0xff] %v4494_v28  ;;  %5685 = vtanh.f32 %v4309_v52 }
 0x58c   : > { %v5676_v40 = vpop.eup %5675  ;;  %v4431_v63 = vmul.f32 0.5, %v5674_v62  ;;  %5687 = vtanh.f32 %v4310_v53  ;;  %v4194_v32 = vpop.f32.mrb[188].mxu1 }
 0x58d   : > { %v5678_v21 = vpop.eup %5677  ;;  %v4432_v36 = vmul.f32 0.5, %v5676_v40  ;;  %v4195_v12 = vadd.f32 %v4194_v32, %v7089_v61  ;;  %v4196_v56 = vpop.f32.mrb[189].mxu1 }
 0x58e   : > { %v5680_v16 = vpop.eup %5679  ;;  %v4495_v13 = vadd.f32 0.5, %v4431_v63  ;;  %v4433_v42 = vmul.f32 0.5, %v5678_v21  ;;  %v4197_v58 = vadd.f32 %v4196_v56, %v7092_v59  ;;  %v4198_v46 = vpop.f32.mrb[190].mxu1 }
 0x58f   : > { %v4496_v37 = vadd.f32 0.5, %v4432_v36  ;;  %v4434_v17 = vmul.f32 0.5, %v5680_v16  ;;  %v4311_v55 = vmul.f32 0.5, %v4195_v12  ;;  %v4199_v26 = vadd.f32 %v4198_v46, %v7089_v61  ;;  %v4200_v20 = vpop.f32.mrb[191].mxu1 }
 0x590   : > { %4559 = vst [vmem:[%s7107_s9 + $0xa0] sm:$0xff] %v4495_v13  ;;  %v4497_v1 = vadd.f32 0.5, %v4433_v42  ;;  %v4312_v19 = vmul.f32 0.5, %v4197_v58  ;;  %v4201_v47 = vadd.f32 %v4200_v20, %v7092_v59 }
 0x591   : > { %4560 = vst [vmem:[%s7107_s9 + $0xa8] sm:$0xff] %v4496_v37  ;;  %v4498_v38 = vadd.f32 0.5, %v4434_v17  ;;  %5689 = vtanh.f32 %v4311_v55  ;;  %v4313_v22 = vmul.f32 0.5, %v4199_v26 }
 0x592   : > { %4561 = vst [vmem:[%s7107_s9 + $0xb0] sm:$0xff] %v4497_v1  ;;  %5691 = vtanh.f32 %v4312_v19  ;;  %v4314_v27 = vmul.f32 0.5, %v4201_v47 }
 0x593   : > { %v5682_v48 = vpop.eup %5681  ;;  %4562 = vst [vmem:[%s7107_s9 + $0xb8] sm:$0xff] %v4498_v38  ;;  %5693 = vtanh.f32 %v4313_v22 }
 0x594   : > { %v5684_v29 = vpop.eup %5683  ;;  %v4435_v49 = vmul.f32 0.5, %v5682_v48  ;;  %5695 = vtanh.f32 %v4314_v27  ;;  %v4204_v57 = vpop.f32.mrb[192].mxu1 }
 0x595   : > { %v5686_v23 = vpop.eup %5685  ;;  %v4436_v39 = vmul.f32 0.5, %v5684_v29  ;;  %v4205_v34 = vadd.f32 %v4204_v57, %v7089_v61  ;;  %v4206_v8 = vpop.f32.mrb[193].mxu1 }
 0x596   : > { %v5688_v60 = vpop.eup %5687  ;;  %v4499_v44 = vadd.f32 0.5, %v4435_v49  ;;  %v4437_v6 = vmul.f32 0.5, %v5686_v23  ;;  %v4207_v33 = vadd.f32 %v4206_v8, %v7092_v59  ;;  %v4208_v50 = vpop.f32.mrb[194].mxu1 }
 0x597   : > { %v4500_v24 = vadd.f32 0.5, %v4436_v39  ;;  %v4438_v2 = vmul.f32 0.5, %v5688_v60  ;;  %v4315_v10 = vmul.f32 0.5, %v4205_v34  ;;  %v4209_v3 = vadd.f32 %v4208_v50, %v7089_v61  ;;  %v4210_v43 = vpop.f32.mrb[195].mxu1 }
 0x598   : > { %4563 = vst [vmem:[%s7107_s9 + $0xc0] sm:$0xff] %v4499_v44  ;;  %v4501_v15 = vadd.f32 0.5, %v4437_v6  ;;  %v4316_v45 = vmul.f32 0.5, %v4207_v33  ;;  %v4211_v31 = vadd.f32 %v4210_v43, %v7092_v59 }
 0x599   : > { %4564 = vst [vmem:[%s7107_s9 + $0xc8] sm:$0xff] %v4500_v24  ;;  %v4502_v4 = vadd.f32 0.5, %v4438_v2  ;;  %5697 = vtanh.f32 %v4315_v10  ;;  %v4317_v7 = vmul.f32 0.5, %v4209_v3 }
 0x59a   : > { %4565 = vst [vmem:[%s7107_s9 + $0xd0] sm:$0xff] %v4501_v15  ;;  %5699 = vtanh.f32 %v4316_v45  ;;  %v4318_v9 = vmul.f32 0.5, %v4211_v31 }
 0x59b   : > { %v5690_v18 = vpop.eup %5689  ;;  %4566 = vst [vmem:[%s7107_s9 + $0xd8] sm:$0xff] %v4502_v4  ;;  %5701 = vtanh.f32 %v4317_v7 }
 0x59c   : > { %v5692_v5 = vpop.eup %5691  ;;  %v4439_v35 = vmul.f32 0.5, %v5690_v18  ;;  %5703 = vtanh.f32 %v4318_v9  ;;  %v4214_v54 = vpop.f32.mrb[196].mxu1 }
 0x59d   : > { %v5694_v30 = vpop.eup %5693  ;;  %v4440_v0 = vmul.f32 0.5, %v5692_v5  ;;  %v4215_v25 = vadd.f32 %v4214_v54, %v7089_v61  ;;  %v4216_v11 = vpop.f32.mrb[197].mxu1 }
 0x59e   : > { %v5696_v41 = vpop.eup %5695  ;;  %v4503_v14 = vadd.f32 0.5, %v4439_v35  ;;  %v4441_v51 = vmul.f32 0.5, %v5694_v30  ;;  %v4217_v28 = vadd.f32 %v4216_v11, %v7092_v59  ;;  %v4218_v52 = vpop.f32.mrb[198].mxu1 }
 0x59f   : > { %v4504_v53 = vadd.f32 0.5, %v4440_v0  ;;  %v4442_v62 = vmul.f32 0.5, %v5696_v41  ;;  %v4319_v40 = vmul.f32 0.5, %v4215_v25  ;;  %v4219_v63 = vadd.f32 %v4218_v52, %v7089_v61  ;;  %v4220_v32 = vpop.f32.mrb[199].mxu1 }
 0x5a0   : > { %4567 = vst [vmem:[%s7107_s9 + $0xe0] sm:$0xff] %v4503_v14  ;;  %v4505_v21 = vadd.f32 0.5, %v4441_v51  ;;  %v4320_v36 = vmul.f32 0.5, %v4217_v28  ;;  %v4221_v12 = vadd.f32 %v4220_v32, %v7092_v59 }
 0x5a1   : > { %4568 = vst [vmem:[%s7107_s9 + $0xe8] sm:$0xff] %v4504_v53  ;;  %v4506_v56 = vadd.f32 0.5, %v4442_v62  ;;  %5705 = vtanh.f32 %v4319_v40  ;;  %v4321_v16 = vmul.f32 0.5, %v4219_v63 }
 0x5a2   : > { %4569 = vst [vmem:[%s7107_s9 + $0xf0] sm:$0xff] %v4505_v21  ;;  %5707 = vtanh.f32 %v4320_v36  ;;  %v4322_v13 = vmul.f32 0.5, %v4221_v12 }
 0x5a3   : > { %v5698_v42 = vpop.eup %5697  ;;  %4570 = vst [vmem:[%s7107_s9 + $0xf8] sm:$0xff] %v4506_v56  ;;  %5709 = vtanh.f32 %v4321_v16 }
 0x5a4   : > { %v5700_v58 = vpop.eup %5699  ;;  %v4443_v46 = vmul.f32 0.5, %v5698_v42  ;;  %5711 = vtanh.f32 %v4322_v13  ;;  %v4224_v37 = vpop.f32.mrb[200].mxu1 }
 0x5a5   : > { %v5702_v17 = vpop.eup %5701  ;;  %v4444_v55 = vmul.f32 0.5, %v5700_v58  ;;  %v4225_v26 = vadd.f32 %v4224_v37, %v7089_v61  ;;  %v4226_v20 = vpop.f32.mrb[201].mxu1 }
 0x5a6   : > { %v5704_v1 = vpop.eup %5703  ;;  %v4507_v19 = vadd.f32 0.5, %v4443_v46  ;;  %v4445_v47 = vmul.f32 0.5, %v5702_v17  ;;  %v4227_v38 = vadd.f32 %v4226_v20, %v7092_v59  ;;  %v4228_v22 = vpop.f32.mrb[202].mxu1 }
 0x5a7   : > { %v4508_v27 = vadd.f32 0.5, %v4444_v55  ;;  %v4446_v48 = vmul.f32 0.5, %v5704_v1  ;;  %v4323_v29 = vmul.f32 0.5, %v4225_v26  ;;  %v4229_v49 = vadd.f32 %v4228_v22, %v7089_v61  ;;  %v4230_v57 = vpop.f32.mrb[203].mxu1 }
 0x5a8   : > { %4571 = vst [vmem:[%s7107_s9 + $0x100] sm:$0xff] %v4507_v19  ;;  %v4509_v23 = vadd.f32 0.5, %v4445_v47  ;;  %v4324_v39 = vmul.f32 0.5, %v4227_v38  ;;  %v4231_v34 = vadd.f32 %v4230_v57, %v7092_v59 }
 0x5a9   : > { %4572 = vst [vmem:[%s7107_s9 + $0x108] sm:$0xff] %v4508_v27  ;;  %v4510_v8 = vadd.f32 0.5, %v4446_v48  ;;  %5713 = vtanh.f32 %v4323_v29  ;;  %v4325_v60 = vmul.f32 0.5, %v4229_v49 }
 0x5aa   : > { %4573 = vst [vmem:[%s7107_s9 + $0x110] sm:$0xff] %v4509_v23  ;;  %5715 = vtanh.f32 %v4324_v39  ;;  %v4326_v44 = vmul.f32 0.5, %v4231_v34 }
 0x5ab   : > { %v5706_v6 = vpop.eup %5705  ;;  %4574 = vst [vmem:[%s7107_s9 + $0x118] sm:$0xff] %v4510_v8  ;;  %5717 = vtanh.f32 %v4325_v60 }
 0x5ac   : > { %v5708_v33 = vpop.eup %5707  ;;  %v4447_v50 = vmul.f32 0.5, %v5706_v6  ;;  %5719 = vtanh.f32 %v4326_v44  ;;  %v4234_v24 = vpop.f32.mrb[204].mxu1 }
 0x5ad   : > { %v5710_v2 = vpop.eup %5709  ;;  %v4448_v10 = vmul.f32 0.5, %v5708_v33  ;;  %v4235_v3 = vadd.f32 %v4234_v24, %v7089_v61  ;;  %v4236_v43 = vpop.f32.mrb[205].mxu1 }
 0x5ae   : > { %v5712_v15 = vpop.eup %5711  ;;  %v4511_v45 = vadd.f32 0.5, %v4447_v50  ;;  %v4449_v31 = vmul.f32 0.5, %v5710_v2  ;;  %v4237_v4 = vadd.f32 %v4236_v43, %v7092_v59  ;;  %v4238_v7 = vpop.f32.mrb[206].mxu1 }
 0x5af   : > { %v4512_v9 = vadd.f32 0.5, %v4448_v10  ;;  %v4450_v18 = vmul.f32 0.5, %v5712_v15  ;;  %v4327_v5 = vmul.f32 0.5, %v4235_v3  ;;  %v4239_v35 = vadd.f32 %v4238_v7, %v7089_v61  ;;  %v4240_v54 = vpop.f32.mrb[207].mxu1 }
 0x5b0   : > { %4575 = vst [vmem:[%s7107_s9 + $0x120] sm:$0xff] %v4511_v45  ;;  %v4513_v30 = vadd.f32 0.5, %v4449_v31  ;;  %v4328_v0 = vmul.f32 0.5, %v4237_v4  ;;  %v4241_v25 = vadd.f32 %v4240_v54, %v7092_v59 }
 0x5b1   : > { %4576 = vst [vmem:[%s7107_s9 + $0x128] sm:$0xff] %v4512_v9  ;;  %v4514_v11 = vadd.f32 0.5, %v4450_v18  ;;  %5721 = vtanh.f32 %v4327_v5  ;;  %v4329_v41 = vmul.f32 0.5, %v4239_v35 }
 0x5b2   : > { %4577 = vst [vmem:[%s7107_s9 + $0x130] sm:$0xff] %v4513_v30  ;;  %5723 = vtanh.f32 %v4328_v0  ;;  %v4330_v14 = vmul.f32 0.5, %v4241_v25 }
 0x5b3   : > { %v5714_v51 = vpop.eup %5713  ;;  %4578 = vst [vmem:[%s7107_s9 + $0x138] sm:$0xff] %v4514_v11  ;;  %5725 = vtanh.f32 %v4329_v41 }
 0x5b4   : > { %v5716_v28 = vpop.eup %5715  ;;  %v4451_v52 = vmul.f32 0.5, %v5714_v51  ;;  %5727 = vtanh.f32 %v4330_v14  ;;  %v4244_v53 = vpop.f32.mrb[208].mxu1 }
 0x5b5   : > { %v5718_v62 = vpop.eup %5717  ;;  %v4452_v40 = vmul.f32 0.5, %v5716_v28  ;;  %v4245_v63 = vadd.f32 %v4244_v53, %v7089_v61  ;;  %v4246_v32 = vpop.f32.mrb[209].mxu1 }
 0x5b6   : > { %v5720_v21 = vpop.eup %5719  ;;  %v4515_v36 = vadd.f32 0.5, %v4451_v52  ;;  %v4453_v12 = vmul.f32 0.5, %v5718_v62  ;;  %v4247_v56 = vadd.f32 %v4246_v32, %v7092_v59  ;;  %v4248_v16 = vpop.f32.mrb[210].mxu1 }
 0x5b7   : > { %v4516_v13 = vadd.f32 0.5, %v4452_v40  ;;  %v4454_v42 = vmul.f32 0.5, %v5720_v21  ;;  %v4331_v58 = vmul.f32 0.5, %v4245_v63  ;;  %v4249_v46 = vadd.f32 %v4248_v16, %v7089_v61  ;;  %v4250_v37 = vpop.f32.mrb[211].mxu1 }
 0x5b8   : > { %4579 = vst [vmem:[%s7107_s9 + $0x140] sm:$0xff] %v4515_v36  ;;  %v4517_v17 = vadd.f32 0.5, %v4453_v12  ;;  %v4332_v55 = vmul.f32 0.5, %v4247_v56  ;;  %v4251_v26 = vadd.f32 %v4250_v37, %v7092_v59 }
 0x5b9   : > { %4580 = vst [vmem:[%s7107_s9 + $0x148] sm:$0xff] %v4516_v13  ;;  %v4518_v20 = vadd.f32 0.5, %v4454_v42  ;;  %5729 = vtanh.f32 %v4331_v58  ;;  %v4333_v1 = vmul.f32 0.5, %v4249_v46 }
 0x5ba   : > { %4581 = vst [vmem:[%s7107_s9 + $0x150] sm:$0xff] %v4517_v17  ;;  %5731 = vtanh.f32 %v4332_v55  ;;  %v4334_v19 = vmul.f32 0.5, %v4251_v26 }
 0x5bb   : > { %v5722_v47 = vpop.eup %5721  ;;  %4582 = vst [vmem:[%s7107_s9 + $0x158] sm:$0xff] %v4518_v20  ;;  %5733 = vtanh.f32 %v4333_v1 }
 0x5bc   : > { %v5724_v38 = vpop.eup %5723  ;;  %v4455_v22 = vmul.f32 0.5, %v5722_v47  ;;  %5735 = vtanh.f32 %v4334_v19  ;;  %v4254_v27 = vpop.f32.mrb[212].mxu1 }
 0x5bd   : > { %v5726_v48 = vpop.eup %5725  ;;  %v4456_v29 = vmul.f32 0.5, %v5724_v38  ;;  %v4255_v49 = vadd.f32 %v4254_v27, %v7089_v61  ;;  %v4256_v57 = vpop.f32.mrb[213].mxu1 }
 0x5be   : > { %v5728_v23 = vpop.eup %5727  ;;  %v4519_v39 = vadd.f32 0.5, %v4455_v22  ;;  %v4457_v34 = vmul.f32 0.5, %v5726_v48  ;;  %v4257_v8 = vadd.f32 %v4256_v57, %v7092_v59  ;;  %v4258_v60 = vpop.f32.mrb[214].mxu1 }
 0x5bf   : > { %v4520_v44 = vadd.f32 0.5, %v4456_v29  ;;  %v4458_v6 = vmul.f32 0.5, %v5728_v23  ;;  %v4335_v33 = vmul.f32 0.5, %v4255_v49  ;;  %v4259_v50 = vadd.f32 %v4258_v60, %v7089_v61  ;;  %v4260_v24 = vpop.f32.mrb[215].mxu1 }
 0x5c0   : > { %4583 = vst [vmem:[%s7107_s9 + $0x160] sm:$0xff] %v4519_v39  ;;  %v4521_v2 = vadd.f32 0.5, %v4457_v34  ;;  %v4336_v10 = vmul.f32 0.5, %v4257_v8  ;;  %v4261_v3 = vadd.f32 %v4260_v24, %v7092_v59 }
 0x5c1   : > { %4584 = vst [vmem:[%s7107_s9 + $0x168] sm:$0xff] %v4520_v44  ;;  %v4522_v43 = vadd.f32 0.5, %v4458_v6  ;;  %5737 = vtanh.f32 %v4335_v33  ;;  %v4337_v15 = vmul.f32 0.5, %v4259_v50 }
 0x5c2   : > { %4585 = vst [vmem:[%s7107_s9 + $0x170] sm:$0xff] %v4521_v2  ;;  %5739 = vtanh.f32 %v4336_v10  ;;  %v4338_v45 = vmul.f32 0.5, %v4261_v3 }
 0x5c3   : > { %v5730_v31 = vpop.eup %5729  ;;  %4586 = vst [vmem:[%s7107_s9 + $0x178] sm:$0xff] %v4522_v43  ;;  %5741 = vtanh.f32 %v4337_v15 }
 0x5c4   : > { %v5732_v4 = vpop.eup %5731  ;;  %v4459_v7 = vmul.f32 0.5, %v5730_v31  ;;  %5743 = vtanh.f32 %v4338_v45  ;;  %v4264_v9 = vpop.f32.mrb[216].mxu1 }
 0x5c5   : > { %v5734_v18 = vpop.eup %5733  ;;  %v4460_v5 = vmul.f32 0.5, %v5732_v4  ;;  %v4265_v35 = vadd.f32 %v4264_v9, %v7089_v61  ;;  %v4266_v54 = vpop.f32.mrb[217].mxu1 }
 0x5c6   : > { %v5736_v30 = vpop.eup %5735  ;;  %v4523_v0 = vadd.f32 0.5, %v4459_v7  ;;  %v4461_v25 = vmul.f32 0.5, %v5734_v18  ;;  %v4267_v11 = vadd.f32 %v4266_v54, %v7092_v59  ;;  %v4268_v41 = vpop.f32.mrb[218].mxu1 }
 0x5c7   : > { %v4524_v14 = vadd.f32 0.5, %v4460_v5  ;;  %v4462_v51 = vmul.f32 0.5, %v5736_v30  ;;  %v4339_v28 = vmul.f32 0.5, %v4265_v35  ;;  %v4269_v52 = vadd.f32 %v4268_v41, %v7089_v61  ;;  %v4270_v53 = vpop.f32.mrb[219].mxu1 }
 0x5c8   : > { %4587 = vst [vmem:[%s7107_s9 + $0x180] sm:$0xff] %v4523_v0  ;;  %v4525_v62 = vadd.f32 0.5, %v4461_v25  ;;  %v4340_v40 = vmul.f32 0.5, %v4267_v11  ;;  %v4271_v63 = vadd.f32 %v4270_v53, %v7092_v59 }
 0x5c9   : > { %4588 = vst [vmem:[%s7107_s9 + $0x188] sm:$0xff] %v4524_v14  ;;  %v4526_v32 = vadd.f32 0.5, %v4462_v51  ;;  %5745 = vtanh.f32 %v4339_v28  ;;  %v4341_v21 = vmul.f32 0.5, %v4269_v52 }
 0x5ca   : > { %4589 = vst [vmem:[%s7107_s9 + $0x190] sm:$0xff] %v4525_v62  ;;  %5747 = vtanh.f32 %v4340_v40  ;;  %v4342_v36 = vmul.f32 0.5, %v4271_v63 }
 0x5cb   : > { %v5738_v12 = vpop.eup %5737  ;;  %4590 = vst [vmem:[%s7107_s9 + $0x198] sm:$0xff] %v4526_v32  ;;  %5749 = vtanh.f32 %v4341_v21 }
 0x5cc   : > { %v5740_v56 = vpop.eup %5739  ;;  %v4463_v16 = vmul.f32 0.5, %v5738_v12  ;;  %5751 = vtanh.f32 %v4342_v36  ;;  %v4274_v13 = vpop.f32.mrb[220].mxu1 }
 0x5cd   : > { %v5742_v42 = vpop.eup %5741  ;;  %v4464_v58 = vmul.f32 0.5, %v5740_v56  ;;  %v4275_v46 = vadd.f32 %v4274_v13, %v7089_v61  ;;  %v4276_v37 = vpop.f32.mrb[221].mxu1 }
 0x5ce   : > { %v5744_v17 = vpop.eup %5743  ;;  %v4527_v55 = vadd.f32 0.5, %v4463_v16  ;;  %v4465_v26 = vmul.f32 0.5, %v5742_v42  ;;  %v4277_v20 = vadd.f32 %v4276_v37, %v7092_v59  ;;  %v4278_v1 = vpop.f32.mrb[222].mxu1 }
 0x5cf   : > { %v4528_v19 = vadd.f32 0.5, %v4464_v58  ;;  %v4466_v47 = vmul.f32 0.5, %v5744_v17  ;;  %v4343_v38 = vmul.f32 0.5, %v4275_v46  ;;  %v4279_v22 = vadd.f32 %v4278_v1, %v7089_v61  ;;  %v4280_v27 = vpop.f32.mrb[223].mxu1 }
 0x5d0   : > { %4591 = vst [vmem:[%s7107_s9 + $0x1a0] sm:$0xff] %v4527_v55  ;;  %v4529_v48 = vadd.f32 0.5, %v4465_v26  ;;  %v4344_v29 = vmul.f32 0.5, %v4277_v20  ;;  %v4281_v49 = vadd.f32 %v4280_v27, %v7092_v59 }
 0x5d1   : > { %4592 = vst [vmem:[%s7107_s9 + $0x1a8] sm:$0xff] %v4528_v19  ;;  %v4530_v57 = vadd.f32 0.5, %v4466_v47  ;;  %5753 = vtanh.f32 %v4343_v38  ;;  %v4345_v23 = vmul.f32 0.5, %v4279_v22 }
 0x5d2   : > { %4593 = vst [vmem:[%s7107_s9 + $0x1b0] sm:$0xff] %v4529_v48  ;;  %5755 = vtanh.f32 %v4344_v29  ;;  %v4346_v39 = vmul.f32 0.5, %v4281_v49 }
 0x5d3   : > { %v5746_v34 = vpop.eup %5745  ;;  %4594 = vst [vmem:[%s7107_s9 + $0x1b8] sm:$0xff] %v4530_v57  ;;  %5757 = vtanh.f32 %v4345_v23 }
 0x5d4   : > { %v5748_v61 = vpop.eup %5747  ;;  %v4467_v8 = vmul.f32 0.5, %v5746_v34  ;;  %5759 = vtanh.f32 %v4346_v39 }
 0x5d5   : > { %v5750_v60 = vpop.eup %5749  ;;  %v4468_v44 = vmul.f32 0.5, %v5748_v61 }
 0x5d6   : > { %v5752_v59 = vpop.eup %5751  ;;  %v4531_v6 = vadd.f32 0.5, %v4467_v8  ;;  %v4469_v33 = vmul.f32 0.5, %v5750_v60 }
 0x5d7   : > { %v4532_v50 = vadd.f32 0.5, %v4468_v44  ;;  %v4470_v24 = vmul.f32 0.5, %v5752_v59 }
 0x5d8   : > { %4595 = vst [vmem:[%s7107_s9 + $0x1c0] sm:$0xff] %v4531_v6  ;;  %v4533_v2 = vadd.f32 0.5, %v4469_v33 }
 0x5d9   : > { %4596 = vst [vmem:[%s7107_s9 + $0x1c8] sm:$0xff] %v4532_v50  ;;  %v4534_v10 = vadd.f32 0.5, %v4470_v24 }
 0x5da   : > { %4597 = vst [vmem:[%s7107_s9 + $0x1d0] sm:$0xff] %v4533_v2 }
 0x5db   : > { %v5754_v3 = vpop.eup %5753  ;;  %4598 = vst [vmem:[%s7107_s9 + $0x1d8] sm:$0xff] %v4534_v10 }
 0x5dc   : > { %v5756_v43 = vpop.eup %5755  ;;  %v4471_v15 = vmul.f32 0.5, %v5754_v3 }
 0x5dd   : > { %v5758_v45 = vpop.eup %5757  ;;  %v4472_v31 = vmul.f32 0.5, %v5756_v43 }
 0x5de   : > { %v5760_v4 = vpop.eup %5759  ;;  %v4535_v7 = vadd.f32 0.5, %v4471_v15  ;;  %v4473_v9 = vmul.f32 0.5, %v5758_v45 }
 0x5df   : > { %v4536_v18 = vadd.f32 0.5, %v4472_v31  ;;  %v4474_v5 = vmul.f32 0.5, %v5760_v4 }
 0x5e0   : > { %4599 = vst [vmem:[%s7107_s9 + $0x1e0] sm:$0xff] %v4535_v7  ;;  %v4537_v35 = vadd.f32 0.5, %v4473_v9 }
 0x5e1   : > { %4600 = vst [vmem:[%s7107_s9 + $0x1e8] sm:$0xff] %v4536_v18  ;;  %v4538_v54 = vadd.f32 0.5, %v4474_v5 }
 0x5e2   : > { %4601 = vst [vmem:[%s7107_s9 + $0x1f0] sm:$0xff] %v4537_v35 }
 0x5e3   : > { %4602 = vst [vmem:[%s7107_s9 + $0x1f8] sm:$0xff] %v4538_v54 }
 0x5e4   : > { %5974 = shalt.err (!%p5971_p8)
}
 0x5e5   : > { %s5975_s15 = scalar_lea.hbm %s7228_s7, 8192  ;;  %s5979_s3 = scalar_lea.hbm %s7375_s8, 16384 }
 0x5e6   : > { %p5976_p11 = scmp.ne.s32.totalorder %s7228_s7, %s5975_s15  ;;  %p5980_p1 = scmp.lt.u32.totalorder %s7228_s7, %s7375_s8 }
 0x5e7   : > { %p5981_p13 = scmp.lt.u32.totalorder %s5979_s3, %s5975_s15  ;;  %p5983_p7 = scmp.lt.u32.totalorder %s5975_s15, %s7228_s7 }
 0x5e8   : > { %p5977_p3 = pnand %p5976_p11, %p7376_p2 }
 0x5e9   : > { %p5982_p0 = por %p5981_p13, %p5980_p1 }
 0x5ea   : > { %p5978_p12 = pneg %p5977_p3 }
 0x5eb   : > { %p5984_p6 = por %p5983_p7, %p5982_p0 }
 0x5ed   : > { %p5985_p10 = pnand %p5984_p6, %p5978_p12 }
 0x5ef   : > { %5988 = shalt.err (!%p5985_p10)
}
 0x5f0   : > { %s6058_s21 = smov 256   ;;  %s6059_s5 = smov 16  }
 0x5f1   : > { %5236 = dma.vmem_to_hbm [thread:$0]  (%p7376_p2), %s7230_s27, 8192, %s7228_s7, %s4604_s23, %s6058_s21, %s6058_s21, %s6059_s5  }
 0x5f2 PF: > { %s4633_s0 = sand.u32 1, %s6031_s17   ;;  %p7377_p5 = scmp.ne.s32.totalorder %s7338_s29, 0 }
 0x5f3   : > { %p7378_p9 = scmp.ge.s32.totalorder %s6043_s20, 2  ;;  %s4634_s9 = scalar_lea.sflag [#allocation4], %s4633_s0 }
 0x5f5   : > { %p5262_p4 = pnand %p7378_p9, %p7377_p5 }
 0x5f7   : > { %6026 = dma.done.wait (!%p5262_p4), %s4634_s9, 8192  }
 0x5f8   : > { %6028 = vsyncadd (!%p5262_p4), %s4634_s9, 4294959104  ;;  %s7379_s12 = sld [smem:[#allocation21_spill]]  ;;  %s7380_s19 = sld [smem:[#allocation22_spill]] }
 0x5f9   : > { %p29_p8 = scmp.ge.s32.totalorder %s6293_s16, 4   ;;  %s7381_s17 = smov %s6035_s18 }
 0x5fa   : > { %s7383_s20 = smov %s6293_s16 }
 0x5fb   :  { %31 = sbr.rel (!%p29_p8) target bundleno = 19 (0x13), region = 142 }
 0x5fe   : > { %s7382_s18 = smov %s7379_s12 }
 0x602   :  { %4639 = vsyncpa [#allocation3], 1 }
 0x603   :  { %4641 = vsyncpa [#allocation3 + $0x1], 1 }
 0x604   :  { %4642 = vsyncpa [#allocation6], 1 }
 0x605   :  { %4644 = vsyncpa [#allocation6 + $0x1], 1 }
 0x606   :  { %4645 = vsyncpa [#allocation9], 1 }
 0x607   :  { %4646 = vsyncpa [#allocation12], 1 }
 0x608   :  { %4647 = vsyncpa [#allocation4], 1 }
 0x609   :  { %4649 = vsyncpa [#allocation4 + $0x1], 1 }

</bundles_post_ra>
